<compile_context>
chip_gen: v7x
topology: tpu7x:2x2x1
jax: 0.10.0
libtpu: 0.0.40
codegen_flags: <defaults>
</compile_context>

<pallas_src>
import math
from functools import partial

import jax
import jax.numpy as jnp
from jax.experimental import pallas as pl
from jax.experimental.pallas import tpu as pltpu

NUM_LAYERS = 4
HIDDEN = 50        # true hidden size
INPUT = 2
FC1 = 100
OUT = 2
HPAD = 64          # padded hidden size  (2*HPAD = 128 = one lane width)
WIDTH = 2 * HPAD   # 128: combined fwd|bwd state width, also padded fc widths
FPAD = 8           # padded raw-feature width (2 -> 8, one aligned sublane tile)


def _round_up(v, m):
    return ((v + m - 1) // m) * m


def rnn_mlp_kernel(x_ref, wd0_ref, wa0_ref, wd_ref, wa_ref, whh_ref, b_ref,
                   w1f_ref, w1b_ref, b1_ref, w2_ref, b2_ref,
                   out_ref, lo_ref, *, T):
    # x_ref:   (T, BT, 8)       time-major raw features (lanes [0:2] real)
    # wd0/wa0: (8, 128)         layer-0 diag / anti input weights
    # wd/wa:   (L-1, 128, 128)  layers 1..3 diag / anti input weights
    # whh_ref: (L, 128, 128)    block-diagonal recurrent weights (fwd | bwd blocks)
    # b_ref:   (L, 1, 128)      b_ih + b_hh per layer, fwd|bwd halves
    # w1f/w1b: (128, 128)       fc1 split: fwd-hidden rows / bwd-hidden rows
    # b1,w2,b2: fc biases / fc2 weight (real cols [0:2])
    # out_ref: (BT, 128)        lane-dense output slab
    # lo_ref:  (T, BT, 128)     VMEM scratch; during a layer: row s = merged input, then
    #                           overwritten with the state [h_fwd(s) | h_bwd(T-1-s)].
    BT, W = out_ref.shape

    def recurrence(whh):
        # Serial chain: per step one block-diagonal 128x128 matmul (MXU), one add (VPU),
        # one tanh (EUP) and ONE full-width unmasked store.  whh is loop-invariant; the
        # explicit matmul_push_rhs/acc/pop path is intentionally not used (see header).
        state = jnp.zeros((BT, W), jnp.float32)
        for s in range(T):
            state = jnp.tanh(
                lo_ref[s] + jnp.dot(state, whh, preferred_element_type=jnp.float32))
            lo_ref[s] = state          # lane-dense (BT,128) store, step-ordered rows

    # ---- layer 0: lane-narrow input, projected per step (no padded-x matmul, no seed copy)
    wd0 = wd0_ref[...]
    wa0 = wa0_ref[...]
    b0 = b_ref[0]
    for s in range(T):
        lo_ref[s] = (jnp.dot(x_ref[s], wd0, preferred_element_type=jnp.float32)
                     + jnp.dot(x_ref[T - 1 - s], wa0, preferred_element_type=jnp.float32)
                     + b0)
    recurrence(whh_ref[0])

    # ---- layers 1..3: hoisted bulk projections on the step-ordered previous states
    for layer in range(1, NUM_LAYERS):
        src = lo_ref[...].reshape(T * BT, W)          # layout-free leading-dim merge
        p = jnp.dot(src, wd_ref[layer - 1], preferred_element_type=jnp.float32) + b_ref[layer]
        q = jnp.dot(src, wa_ref[layer - 1], preferred_element_type=jnp.float32)
        # Merged step-ordered inputs: inp[s] = P[s] + Q[T-1-s] (time reversal folded into
        # the diag/anti weight split -- no jnp.where, no masks).
        for s in range(T):
            lo_ref[s] = p[s * BT:(s + 1) * BT] + q[(T - 1 - s) * BT:(T - s) * BT]
        recurrence(whh_ref[layer])

    # dropout1: identity at inference.  Last timestep: h_fwd(T-1) lives in lo[T-1] lanes
    # [0:64]; h_bwd(T-1) was produced at step 0, so it lives in lo[0] lanes [64:128].
    # The split fc1 weights (zeroed complementary rows) pick the right halves on the MXU.
    z = (jnp.dot(lo_ref[T - 1], w1f_ref[...], preferred_element_type=jnp.float32)
         + jnp.dot(lo_ref[0], w1b_ref[...], preferred_element_type=jnp.float32)
         + b1_ref[...])
    z = jnp.maximum(z, 0.0)                            # ReLU; dropout2: identity
    y = jnp.dot(z, w2_ref[...], preferred_element_type=jnp.float32) + b2_ref[...]
    out_ref[...] = y.astype(out_ref.dtype)


def model_predictor_forward(x, params, *, batch_block=None):
    """x: (B, T, 2) float32 -> (B, 2) float32 (ModelPredictor.forward, eval mode)."""
    B, T, F = x.shape
    assert F == INPUT

    # Batch blocking: pack up to 128 sequences per block (fills MXU LHS rows); the grid
    # over batch blocks is marked "parallel" so v7x's two TensorCores split it.
    if batch_block is None:
        batch_block = min(_round_up(B, 8), 128)
    BT = _round_up(max(batch_block, 8), 8)
    Bp = _round_up(B, BT)
    grid = (Bp // BT,)

    # Lane-narrow, time-major input: (T, Bp, 8) with features in lanes [0:2].
    xt = jnp.transpose(x.astype(jnp.float32), (1, 0, 2))
    x_pad = jnp.zeros((T, Bp, FPAD), jnp.float32).at[:, :B, :INPUT].set(xt)

    (wd0, wa0, wd, wa, whh, b, w1f, w1b, b1, w2, b2) = params
    weights = (wd0, wa0, wd, wa, whh, b, w1f, w1b, b1, w2, b2)

    def full_spec(a):
        n = a.ndim
        return pl.BlockSpec(a.shape, lambda i: (0,) * n)

    # Raise the scoped-VMEM limit only when the per-block footprint needs it (v5e's
    # default is the tightest); at the demo size we stay on the default.
    block_bytes = (2 * T * BT * FPAD * 4        # x block (double-buffered)
                   + T * BT * WIDTH * 4         # lo scratch
                   + 2 * BT * WIDTH * 4         # out block (double-buffered)
                   + sum(int(w.size) * 4 for w in weights))
    vmem_limit = None if block_bytes < (12 << 20) else min(block_bytes + (8 << 20), 56 << 20)

    out = pl.pallas_call(
        partial(rnn_mlp_kernel, T=T),
        grid=grid,
        out_shape=jax.ShapeDtypeStruct((Bp, WIDTH), jnp.float32),
        in_specs=[pl.BlockSpec((T, BT, FPAD), lambda i: (0, i, 0))]
                 + [full_spec(w) for w in weights],
        out_specs=pl.BlockSpec((BT, WIDTH), lambda i: (i, 0)),
        scratch_shapes=[pltpu.VMEM((T, BT, WIDTH), jnp.float32)],
        compiler_params=pltpu.CompilerParams(
            dimension_semantics=("parallel",),
            vmem_limit_bytes=vmem_limit),
    )(x_pad, *weights)
    return out[:B, :OUT]


def init_params(key):
    """Deterministic init with PyTorch-default shapes, packed into padded diag/anti tiles."""
    scale_rnn = 1.0 / math.sqrt(HIDDEN)
    keys = jax.random.split(key, NUM_LAYERS * 2 * 4 + 4)
    ki = iter(keys)

    def u(k, shape, s):
        return jax.random.uniform(k, shape, jnp.float32, -s, s)

    wd0 = jnp.zeros((FPAD, WIDTH), jnp.float32)
    wa0 = jnp.zeros((FPAD, WIDTH), jnp.float32)
    wd = jnp.zeros((NUM_LAYERS - 1, WIDTH, WIDTH), jnp.float32)
    wa = jnp.zeros((NUM_LAYERS - 1, WIDTH, WIDTH), jnp.float32)
    whh = jnp.zeros((NUM_LAYERS, WIDTH, WIDTH), jnp.float32)
    b = jnp.zeros((NUM_LAYERS, 1, WIDTH), jnp.float32)

    for layer in range(NUM_LAYERS):
        in_size = INPUT if layer == 0 else 2 * HIDDEN
        for d in range(2):                       # d=0 forward, d=1 backward
            col = d * HPAD
            w_ih = u(next(ki), (in_size, HIDDEN), scale_rnn)   # (in, H) transposed store
            w_hh = u(next(ki), (HIDDEN, HIDDEN), scale_rnn)
            b_ih = u(next(ki), (1, HIDDEN), scale_rnn)
            b_hh = u(next(ki), (1, HIDDEN), scale_rnn)
            if layer == 0:
                if d == 0:
                    wd0 = wd0.at[0:INPUT, 0:HIDDEN].set(w_ih)
                else:
                    wa0 = wa0.at[0:INPUT, HPAD:HPAD + HIDDEN].set(w_ih)
            else:
                idx = layer - 1
                if d == 0:
                    # prev-fwd features -> fwd cols (diag); prev-bwd features -> fwd cols (anti)
                    wd = wd.at[idx, 0:HIDDEN, 0:HIDDEN].set(w_ih[:HIDDEN])
                    wa = wa.at[idx, HPAD:HPAD + HIDDEN, 0:HIDDEN].set(w_ih[HIDDEN:])
                else:
                    # prev-fwd features -> bwd cols (anti); prev-bwd features -> bwd cols (diag)
                    wa = wa.at[idx, 0:HIDDEN, HPAD:HPAD + HIDDEN].set(w_ih[:HIDDEN])
                    wd = wd.at[idx, HPAD:HPAD + HIDDEN, HPAD:HPAD + HIDDEN].set(w_ih[HIDDEN:])
            whh = whh.at[layer, col:col + HIDDEN, col:col + HIDDEN].set(w_hh)
            b = b.at[layer, :, col:col + HIDDEN].set(b_ih + b_hh)

    scale_fc1 = 1.0 / math.sqrt(2 * HIDDEN)
    scale_fc2 = 1.0 / math.sqrt(FC1)
    w1_raw = u(next(ki), (2 * HIDDEN, FC1), scale_fc1)
    b1_raw = u(next(ki), (1, FC1), scale_fc1)
    w2_raw = u(next(ki), (FC1, OUT), scale_fc2)
    b2_raw = u(next(ki), (1, OUT), scale_fc2)

    w1f = jnp.zeros((WIDTH, WIDTH), jnp.float32).at[0:HIDDEN, 0:FC1].set(w1_raw[:HIDDEN])
    w1b = jnp.zeros((WIDTH, WIDTH), jnp.float32).at[HPAD:HPAD + HIDDEN, 0:FC1].set(w1_raw[HIDDEN:])
    b1 = jnp.zeros((1, WIDTH), jnp.float32).at[:, 0:FC1].set(b1_raw)
    w2 = jnp.zeros((WIDTH, WIDTH), jnp.float32).at[0:FC1, 0:OUT].set(w2_raw)
    b2 = jnp.zeros((1, WIDTH), jnp.float32).at[:, 0:OUT].set(b2_raw)

    return wd0, wa0, wd, wa, whh, b, w1f, w1b, b1, w2, b2


def reference_forward(x, params):
    """Pure-JAX reference with the original per-direction loop structure (HIGHEST precision)."""
    wd0, wa0, wd, wa, whh, b, w1f, w1b, b1, w2, b2 = params
    B, T, F = x.shape
    H, HP = HIDDEN, HPAD
    dot = lambda a, bb: jnp.dot(a, bb, precision=jax.lax.Precision.HIGHEST)

    layer_in = x.astype(jnp.float32)                      # (B, T, in)
    for l in range(NUM_LAYERS):
        outs = []
        for d in range(2):
            col = d * HP
            if l == 0:
                w_ih = (wd0 if d == 0 else wa0)[0:INPUT, col:col + H]
            else:
                idx = l - 1
                if d == 0:
                    w_ih = jnp.concatenate(
                        [wd[idx][0:H, 0:H], wa[idx][HP:HP + H, 0:H]], axis=0)
                else:
                    w_ih = jnp.concatenate(
                        [wa[idx][0:H, HP:HP + H], wd[idx][HP:HP + H, HP:HP + H]], axis=0)
            w_hh = whh[l][col:col + H, col:col + H]
            bias = b[l][:, col:col + H]
            h = jnp.zeros((B, H), jnp.float32)
            hs = [None] * T
            ts = range(T) if d == 0 else range(T - 1, -1, -1)
            for t in ts:
                h = jnp.tanh(dot(layer_in[:, t], w_ih) + dot(h, w_hh) + bias)
                hs[t] = h
            outs.append(jnp.stack(hs, axis=1))            # (B, T, H)
        layer_in = jnp.concatenate(outs, axis=-1)         # (B, T, 2H)

    h_last = layer_in[:, -1, :]
    w1u = jnp.concatenate([w1f[0:H, 0:FC1], w1b[HP:HP + H, 0:FC1]], axis=0)
    z = jnp.maximum(dot(h_last, w1u) + b1[:, 0:FC1], 0.0)
    return dot(z, w2[0:FC1, 0:OUT]) + b2[:, 0:OUT]


if __name__ == "__main__":
    key = jax.random.PRNGKey(0)
    k_param, k_x = jax.random.split(key)

    params = init_params(k_param)
    B, T = 2, 8
    x = jax.random.normal(k_x, (B, T, INPUT), jnp.float32)

    out = model_predictor_forward(x, params)
    jax.block_until_ready(out)
    assert out.shape == (B, OUT) and out.dtype == jnp.float32

    ref = reference_forward(x, params)
    assert jnp.allclose(out, ref, atol=1e-3, rtol=1e-3), (out, ref)

    print("KERNEL_OK")
</pallas_src>

<mosaic_0001>
module attributes {stable_mosaic.version = 11 : i64} {
  func.func @rnn_mlp_kernel(%arg0: i32, %arg1: memref<8x8x8xf32, #tpu.memory_space<vmem>>, %arg2: memref<8x128xf32, #tpu.memory_space<vmem>>, %arg3: memref<8x128xf32, #tpu.memory_space<vmem>>, %arg4: memref<3x128x128xf32, #tpu.memory_space<vmem>>, %arg5: memref<3x128x128xf32, #tpu.memory_space<vmem>>, %arg6: memref<4x128x128xf32, #tpu.memory_space<vmem>>, %arg7: memref<4x1x128xf32, #tpu.memory_space<vmem>>, %arg8: memref<128x128xf32, #tpu.memory_space<vmem>>, %arg9: memref<128x128xf32, #tpu.memory_space<vmem>>, %arg10: memref<1x128xf32, #tpu.memory_space<vmem>>, %arg11: memref<128x128xf32, #tpu.memory_space<vmem>>, %arg12: memref<1x128xf32, #tpu.memory_space<vmem>>, %arg13: memref<8x128xf32, #tpu.memory_space<vmem>>, %arg14: memref<8x8x128xf32, #tpu.memory_space<vmem>>) attributes {dimension_semantics = [#tpu.dimension_semantics<parallel>], iteration_bounds = array<i64: 1>, scalar_prefetch = 0 : i64, scratch_operands = 1 : i64, tpu.core_type = #tpu.core_type<tc>, window_params = [{transform_indices = @transform_0, window_bounds = array<i64: 8, 8, 8>}, {pipeline_mode = #tpu.pipeline_mode<synchronous>, transform_indices = @transform_1, window_bounds = array<i64: 8, 128>}, {pipeline_mode = #tpu.pipeline_mode<synchronous>, transform_indices = @transform_2, window_bounds = array<i64: 8, 128>}, {pipeline_mode = #tpu.pipeline_mode<synchronous>, transform_indices = @transform_3, window_bounds = array<i64: 3, 128, 128>}, {pipeline_mode = #tpu.pipeline_mode<synchronous>, transform_indices = @transform_4, window_bounds = array<i64: 3, 128, 128>}, {pipeline_mode = #tpu.pipeline_mode<synchronous>, transform_indices = @transform_5, window_bounds = array<i64: 4, 128, 128>}, {pipeline_mode = #tpu.pipeline_mode<synchronous>, transform_indices = @transform_6, window_bounds = array<i64: 4, 1, 128>}, {pipeline_mode = #tpu.pipeline_mode<synchronous>, transform_indices = @transform_7, window_bounds = array<i64: 128, 128>}, {pipeline_mode = #tpu.pipeline_mode<synchronous>, transform_indices = @transform_8, window_bounds = array<i64: 128, 128>}, {pipeline_mode = #tpu.pipeline_mode<synchronous>, transform_indices = @transform_9, window_bounds = array<i64: 1, 128>}, {pipeline_mode = #tpu.pipeline_mode<synchronous>, transform_indices = @transform_10, window_bounds = array<i64: 128, 128>}, {pipeline_mode = #tpu.pipeline_mode<synchronous>, transform_indices = @transform_11, window_bounds = array<i64: 1, 128>}, {transform_indices = @transform_12, window_bounds = array<i64: 8, 128>}]} {
    %c0 = arith.constant 0 : index
    %c0_0 = arith.constant 0 : index
    %0 = vector.load %arg2[%c0, %c0_0] : memref<8x128xf32, #tpu.memory_space<vmem>>, vector<8x128xf32>
    %c0_1 = arith.constant 0 : index
    %c0_2 = arith.constant 0 : index
    %1 = vector.load %arg3[%c0_1, %c0_2] : memref<8x128xf32, #tpu.memory_space<vmem>>, vector<8x128xf32>
    %c0_3 = arith.constant 0 : index
    %c0_4 = arith.constant 0 : index
    %c0_5 = arith.constant 0 : index
    %2 = vector.load %arg7[%c0_3, %c0_4, %c0_5] : memref<4x1x128xf32, #tpu.memory_space<vmem>>, vector<1x1x128xf32>
    %3 = vector.shape_cast %2 : vector<1x1x128xf32> to vector<1x128xf32>
    %c0_6 = arith.constant 0 : index
    %c0_7 = arith.constant 0 : index
    %c0_8 = arith.constant 0 : index
    %4 = vector.load %arg1[%c0_6, %c0_7, %c0_8] : memref<8x8x8xf32, #tpu.memory_space<vmem>>, vector<1x8x8xf32>
    %5 = vector.shape_cast %4 : vector<1x8x8xf32> to vector<8x8xf32>
    %cst = arith.constant dense<0.000000e+00> : vector<8x128xf32>
    %6 = tpu.matmul %5, %0, %cst {dimension_numbers = #tpu.dot_dimension_numbers<[1], [0], [0], [1], [0, 0, 1, 1], [], []>} : vector<8x8xf32>, vector<8x128xf32>, vector<8x128xf32> -> vector<8x128xf32>
    %c7 = arith.constant 7 : index
    %c0_9 = arith.constant 0 : index
    %c0_10 = arith.constant 0 : index
    %7 = vector.load %arg1[%c7, %c0_9, %c0_10] : memref<8x8x8xf32, #tpu.memory_space<vmem>>, vector<1x8x8xf32>
    %8 = vector.shape_cast %7 : vector<1x8x8xf32> to vector<8x8xf32>
    %cst_11 = arith.constant dense<0.000000e+00> : vector<8x128xf32>
    %9 = tpu.matmul %8, %1, %cst_11 {dimension_numbers = #tpu.dot_dimension_numbers<[1], [0], [0], [1], [0, 0, 1, 1], [], []>} : vector<8x8xf32>, vector<8x128xf32>, vector<8x128xf32> -> vector<8x128xf32>
    %10 = arith.addf %6, %9 : vector<8x128xf32>
    %11 = vector.broadcast %3 : vector<1x128xf32> to vector<8x128xf32>
    %12 = arith.addf %10, %11 : vector<8x128xf32>
    %c0_12 = arith.constant 0 : index
    %c0_13 = arith.constant 0 : index
    %c0_14 = arith.constant 0 : index
    %13 = vector.load %arg14[%c0_12, %c0_13, %c0_14] : memref<8x8x128xf32, #tpu.memory_space<vmem>>, vector<1x8x128xf32>
    %14 = vector.shape_cast %13 : vector<1x8x128xf32> to vector<8x128xf32>
    %15 = vector.shape_cast %12 : vector<8x128xf32> to vector<1x8x128xf32>
    tpu.vector_store %arg14[%c0_12, %c0_13, %c0_14], %15 {strides = array<i32>} : memref<8x8x128xf32, #tpu.memory_space<vmem>>, vector<1x8x128xf32>,
    %c1 = arith.constant 1 : index
    %c0_15 = arith.constant 0 : index
    %c0_16 = arith.constant 0 : index
    %16 = vector.load %arg1[%c1, %c0_15, %c0_16] : memref<8x8x8xf32, #tpu.memory_space<vmem>>, vector<1x8x8xf32>
    %17 = vector.shape_cast %16 : vector<1x8x8xf32> to vector<8x8xf32>
    %cst_17 = arith.constant dense<0.000000e+00> : vector<8x128xf32>
    %18 = tpu.matmul %17, %0, %cst_17 {dimension_numbers = #tpu.dot_dimension_numbers<[1], [0], [0], [1], [0, 0, 1, 1], [], []>} : vector<8x8xf32>, vector<8x128xf32>, vector<8x128xf32> -> vector<8x128xf32>
    %c6 = arith.constant 6 : index
    %c0_18 = arith.constant 0 : index
    %c0_19 = arith.constant 0 : index
    %19 = vector.load %arg1[%c6, %c0_18, %c0_19] : memref<8x8x8xf32, #tpu.memory_space<vmem>>, vector<1x8x8xf32>
    %20 = vector.shape_cast %19 : vector<1x8x8xf32> to vector<8x8xf32>
    %cst_20 = arith.constant dense<0.000000e+00> : vector<8x128xf32>
    %21 = tpu.matmul %20, %1, %cst_20 {dimension_numbers = #tpu.dot_dimension_numbers<[1], [0], [0], [1], [0, 0, 1, 1], [], []>} : vector<8x8xf32>, vector<8x128xf32>, vector<8x128xf32> -> vector<8x128xf32>
    %22 = arith.addf %18, %21 : vector<8x128xf32>
    %23 = vector.broadcast %3 : vector<1x128xf32> to vector<8x128xf32>
    %24 = arith.addf %22, %23 : vector<8x128xf32>
    %c1_21 = arith.constant 1 : index
    %c0_22 = arith.constant 0 : index
    %c0_23 = arith.constant 0 : index
    %25 = vector.load %arg14[%c1_21, %c0_22, %c0_23] : memref<8x8x128xf32, #tpu.memory_space<vmem>>, vector<1x8x128xf32>
    %26 = vector.shape_cast %25 : vector<1x8x128xf32> to vector<8x128xf32>
    %27 = vector.shape_cast %24 : vector<8x128xf32> to vector<1x8x128xf32>
    tpu.vector_store %arg14[%c1_21, %c0_22, %c0_23], %27 {strides = array<i32>} : memref<8x8x128xf32, #tpu.memory_space<vmem>>, vector<1x8x128xf32>,
    %c2 = arith.constant 2 : index
    %c0_24 = arith.constant 0 : index
    %c0_25 = arith.constant 0 : index
    %28 = vector.load %arg1[%c2, %c0_24, %c0_25] : memref<8x8x8xf32, #tpu.memory_space<vmem>>, vector<1x8x8xf32>
    %29 = vector.shape_cast %28 : vector<1x8x8xf32> to vector<8x8xf32>
    %cst_26 = arith.constant dense<0.000000e+00> : vector<8x128xf32>
    %30 = tpu.matmul %29, %0, %cst_26 {dimension_numbers = #tpu.dot_dimension_numbers<[1], [0], [0], [1], [0, 0, 1, 1], [], []>} : vector<8x8xf32>, vector<8x128xf32>, vector<8x128xf32> -> vector<8x128xf32>
    %c5 = arith.constant 5 : index
    %c0_27 = arith.constant 0 : index
    %c0_28 = arith.constant 0 : index
    %31 = vector.load %arg1[%c5, %c0_27, %c0_28] : memref<8x8x8xf32, #tpu.memory_space<vmem>>, vector<1x8x8xf32>
    %32 = vector.shape_cast %31 : vector<1x8x8xf32> to vector<8x8xf32>
    %cst_29 = arith.constant dense<0.000000e+00> : vector<8x128xf32>
    %33 = tpu.matmul %32, %1, %cst_29 {dimension_numbers = #tpu.dot_dimension_numbers<[1], [0], [0], [1], [0, 0, 1, 1], [], []>} : vector<8x8xf32>, vector<8x128xf32>, vector<8x128xf32> -> vector<8x128xf32>
    %34 = arith.addf %30, %33 : vector<8x128xf32>
    %35 = vector.broadcast %3 : vector<1x128xf32> to vector<8x128xf32>
    %36 = arith.addf %34, %35 : vector<8x128xf32>
    %c2_30 = arith.constant 2 : index
    %c0_31 = arith.constant 0 : index
    %c0_32 = arith.constant 0 : index
    %37 = vector.load %arg14[%c2_30, %c0_31, %c0_32] : memref<8x8x128xf32, #tpu.memory_space<vmem>>, vector<1x8x128xf32>
    %38 = vector.shape_cast %37 : vector<1x8x128xf32> to vector<8x128xf32>
    %39 = vector.shape_cast %36 : vector<8x128xf32> to vector<1x8x128xf32>
    tpu.vector_store %arg14[%c2_30, %c0_31, %c0_32], %39 {strides = array<i32>} : memref<8x8x128xf32, #tpu.memory_space<vmem>>, vector<1x8x128xf32>,
    %c3 = arith.constant 3 : index
    %c0_33 = arith.constant 0 : index
    %c0_34 = arith.constant 0 : index
    %40 = vector.load %arg1[%c3, %c0_33, %c0_34] : memref<8x8x8xf32, #tpu.memory_space<vmem>>, vector<1x8x8xf32>
    %41 = vector.shape_cast %40 : vector<1x8x8xf32> to vector<8x8xf32>
    %cst_35 = arith.constant dense<0.000000e+00> : vector<8x128xf32>
    %42 = tpu.matmul %41, %0, %cst_35 {dimension_numbers = #tpu.dot_dimension_numbers<[1], [0], [0], [1], [0, 0, 1, 1], [], []>} : vector<8x8xf32>, vector<8x128xf32>, vector<8x128xf32> -> vector<8x128xf32>
    %c4 = arith.constant 4 : index
    %c0_36 = arith.constant 0 : index
    %c0_37 = arith.constant 0 : index
    %43 = vector.load %arg1[%c4, %c0_36, %c0_37] : memref<8x8x8xf32, #tpu.memory_space<vmem>>, vector<1x8x8xf32>
    %44 = vector.shape_cast %43 : vector<1x8x8xf32> to vector<8x8xf32>
    %cst_38 = arith.constant dense<0.000000e+00> : vector<8x128xf32>
    %45 = tpu.matmul %44, %1, %cst_38 {dimension_numbers = #tpu.dot_dimension_numbers<[1], [0], [0], [1], [0, 0, 1, 1], [], []>} : vector<8x8xf32>, vector<8x128xf32>, vector<8x128xf32> -> vector<8x128xf32>
    %46 = arith.addf %42, %45 : vector<8x128xf32>
    %47 = vector.broadcast %3 : vector<1x128xf32> to vector<8x128xf32>
    %48 = arith.addf %46, %47 : vector<8x128xf32>
    %c3_39 = arith.constant 3 : index
    %c0_40 = arith.constant 0 : index
    %c0_41 = arith.constant 0 : index
    %49 = vector.load %arg14[%c3_39, %c0_40, %c0_41] : memref<8x8x128xf32, #tpu.memory_space<vmem>>, vector<1x8x128xf32>
    %50 = vector.shape_cast %49 : vector<1x8x128xf32> to vector<8x128xf32>
    %51 = vector.shape_cast %48 : vector<8x128xf32> to vector<1x8x128xf32>
    tpu.vector_store %arg14[%c3_39, %c0_40, %c0_41], %51 {strides = array<i32>} : memref<8x8x128xf32, #tpu.memory_space<vmem>>, vector<1x8x128xf32>,
    %c4_42 = arith.constant 4 : index
    %c0_43 = arith.constant 0 : index
    %c0_44 = arith.constant 0 : index
    %52 = vector.load %arg1[%c4_42, %c0_43, %c0_44] : memref<8x8x8xf32, #tpu.memory_space<vmem>>, vector<1x8x8xf32>
    %53 = vector.shape_cast %52 : vector<1x8x8xf32> to vector<8x8xf32>
    %cst_45 = arith.constant dense<0.000000e+00> : vector<8x128xf32>
    %54 = tpu.matmul %53, %0, %cst_45 {dimension_numbers = #tpu.dot_dimension_numbers<[1], [0], [0], [1], [0, 0, 1, 1], [], []>} : vector<8x8xf32>, vector<8x128xf32>, vector<8x128xf32> -> vector<8x128xf32>
    %c3_46 = arith.constant 3 : index
    %c0_47 = arith.constant 0 : index
    %c0_48 = arith.constant 0 : index
    %55 = vector.load %arg1[%c3_46, %c0_47, %c0_48] : memref<8x8x8xf32, #tpu.memory_space<vmem>>, vector<1x8x8xf32>
    %56 = vector.shape_cast %55 : vector<1x8x8xf32> to vector<8x8xf32>
    %cst_49 = arith.constant dense<0.000000e+00> : vector<8x128xf32>
    %57 = tpu.matmul %56, %1, %cst_49 {dimension_numbers = #tpu.dot_dimension_numbers<[1], [0], [0], [1], [0, 0, 1, 1], [], []>} : vector<8x8xf32>, vector<8x128xf32>, vector<8x128xf32> -> vector<8x128xf32>
    %58 = arith.addf %54, %57 : vector<8x128xf32>
    %59 = vector.broadcast %3 : vector<1x128xf32> to vector<8x128xf32>
    %60 = arith.addf %58, %59 : vector<8x128xf32>
    %c4_50 = arith.constant 4 : index
    %c0_51 = arith.constant 0 : index
    %c0_52 = arith.constant 0 : index
    %61 = vector.load %arg14[%c4_50, %c0_51, %c0_52] : memref<8x8x128xf32, #tpu.memory_space<vmem>>, vector<1x8x128xf32>
    %62 = vector.shape_cast %61 : vector<1x8x128xf32> to vector<8x128xf32>
    %63 = vector.shape_cast %60 : vector<8x128xf32> to vector<1x8x128xf32>
    tpu.vector_store %arg14[%c4_50, %c0_51, %c0_52], %63 {strides = array<i32>} : memref<8x8x128xf32, #tpu.memory_space<vmem>>, vector<1x8x128xf32>,
    %c5_53 = arith.constant 5 : index
    %c0_54 = arith.constant 0 : index
    %c0_55 = arith.constant 0 : index
    %64 = vector.load %arg1[%c5_53, %c0_54, %c0_55] : memref<8x8x8xf32, #tpu.memory_space<vmem>>, vector<1x8x8xf32>
    %65 = vector.shape_cast %64 : vector<1x8x8xf32> to vector<8x8xf32>
    %cst_56 = arith.constant dense<0.000000e+00> : vector<8x128xf32>
    %66 = tpu.matmul %65, %0, %cst_56 {dimension_numbers = #tpu.dot_dimension_numbers<[1], [0], [0], [1], [0, 0, 1, 1], [], []>} : vector<8x8xf32>, vector<8x128xf32>, vector<8x128xf32> -> vector<8x128xf32>
    %c2_57 = arith.constant 2 : index
    %c0_58 = arith.constant 0 : index
    %c0_59 = arith.constant 0 : index
    %67 = vector.load %arg1[%c2_57, %c0_58, %c0_59] : memref<8x8x8xf32, #tpu.memory_space<vmem>>, vector<1x8x8xf32>
    %68 = vector.shape_cast %67 : vector<1x8x8xf32> to vector<8x8xf32>
    %cst_60 = arith.constant dense<0.000000e+00> : vector<8x128xf32>
    %69 = tpu.matmul %68, %1, %cst_60 {dimension_numbers = #tpu.dot_dimension_numbers<[1], [0], [0], [1], [0, 0, 1, 1], [], []>} : vector<8x8xf32>, vector<8x128xf32>, vector<8x128xf32> -> vector<8x128xf32>
    %70 = arith.addf %66, %69 : vector<8x128xf32>
    %71 = vector.broadcast %3 : vector<1x128xf32> to vector<8x128xf32>
    %72 = arith.addf %70, %71 : vector<8x128xf32>
    %c5_61 = arith.constant 5 : index
    %c0_62 = arith.constant 0 : index
    %c0_63 = arith.constant 0 : index
    %73 = vector.load %arg14[%c5_61, %c0_62, %c0_63] : memref<8x8x128xf32, #tpu.memory_space<vmem>>, vector<1x8x128xf32>
    %74 = vector.shape_cast %73 : vector<1x8x128xf32> to vector<8x128xf32>
    %75 = vector.shape_cast %72 : vector<8x128xf32> to vector<1x8x128xf32>
    tpu.vector_store %arg14[%c5_61, %c0_62, %c0_63], %75 {strides = array<i32>} : memref<8x8x128xf32, #tpu.memory_space<vmem>>, vector<1x8x128xf32>,
    %c6_64 = arith.constant 6 : index
    %c0_65 = arith.constant 0 : index
    %c0_66 = arith.constant 0 : index
    %76 = vector.load %arg1[%c6_64, %c0_65, %c0_66] : memref<8x8x8xf32, #tpu.memory_space<vmem>>, vector<1x8x8xf32>
    %77 = vector.shape_cast %76 : vector<1x8x8xf32> to vector<8x8xf32>
    %cst_67 = arith.constant dense<0.000000e+00> : vector<8x128xf32>
    %78 = tpu.matmul %77, %0, %cst_67 {dimension_numbers = #tpu.dot_dimension_numbers<[1], [0], [0], [1], [0, 0, 1, 1], [], []>} : vector<8x8xf32>, vector<8x128xf32>, vector<8x128xf32> -> vector<8x128xf32>
    %c1_68 = arith.constant 1 : index
    %c0_69 = arith.constant 0 : index
    %c0_70 = arith.constant 0 : index
    %79 = vector.load %arg1[%c1_68, %c0_69, %c0_70] : memref<8x8x8xf32, #tpu.memory_space<vmem>>, vector<1x8x8xf32>
    %80 = vector.shape_cast %79 : vector<1x8x8xf32> to vector<8x8xf32>
    %cst_71 = arith.constant dense<0.000000e+00> : vector<8x128xf32>
    %81 = tpu.matmul %80, %1, %cst_71 {dimension_numbers = #tpu.dot_dimension_numbers<[1], [0], [0], [1], [0, 0, 1, 1], [], []>} : vector<8x8xf32>, vector<8x128xf32>, vector<8x128xf32> -> vector<8x128xf32>
    %82 = arith.addf %78, %81 : vector<8x128xf32>
    %83 = vector.broadcast %3 : vector<1x128xf32> to vector<8x128xf32>
    %84 = arith.addf %82, %83 : vector<8x128xf32>
    %c6_72 = arith.constant 6 : index
    %c0_73 = arith.constant 0 : index
    %c0_74 = arith.constant 0 : index
    %85 = vector.load %arg14[%c6_72, %c0_73, %c0_74] : memref<8x8x128xf32, #tpu.memory_space<vmem>>, vector<1x8x128xf32>
    %86 = vector.shape_cast %85 : vector<1x8x128xf32> to vector<8x128xf32>
    %87 = vector.shape_cast %84 : vector<8x128xf32> to vector<1x8x128xf32>
    tpu.vector_store %arg14[%c6_72, %c0_73, %c0_74], %87 {strides = array<i32>} : memref<8x8x128xf32, #tpu.memory_space<vmem>>, vector<1x8x128xf32>,
    %c7_75 = arith.constant 7 : index
    %c0_76 = arith.constant 0 : index
    %c0_77 = arith.constant 0 : index
    %88 = vector.load %arg1[%c7_75, %c0_76, %c0_77] : memref<8x8x8xf32, #tpu.memory_space<vmem>>, vector<1x8x8xf32>
    %89 = vector.shape_cast %88 : vector<1x8x8xf32> to vector<8x8xf32>
    %cst_78 = arith.constant dense<0.000000e+00> : vector<8x128xf32>
    %90 = tpu.matmul %89, %0, %cst_78 {dimension_numbers = #tpu.dot_dimension_numbers<[1], [0], [0], [1], [0, 0, 1, 1], [], []>} : vector<8x8xf32>, vector<8x128xf32>, vector<8x128xf32> -> vector<8x128xf32>
    %c0_79 = arith.constant 0 : index
    %c0_80 = arith.constant 0 : index
    %c0_81 = arith.constant 0 : index
    %91 = vector.load %arg1[%c0_79, %c0_80, %c0_81] : memref<8x8x8xf32, #tpu.memory_space<vmem>>, vector<1x8x8xf32>
    %92 = vector.shape_cast %91 : vector<1x8x8xf32> to vector<8x8xf32>
    %cst_82 = arith.constant dense<0.000000e+00> : vector<8x128xf32>
    %93 = tpu.matmul %92, %1, %cst_82 {dimension_numbers = #tpu.dot_dimension_numbers<[1], [0], [0], [1], [0, 0, 1, 1], [], []>} : vector<8x8xf32>, vector<8x128xf32>, vector<8x128xf32> -> vector<8x128xf32>
    %94 = arith.addf %90, %93 : vector<8x128xf32>
    %95 = vector.broadcast %3 : vector<1x128xf32> to vector<8x128xf32>
    %96 = arith.addf %94, %95 : vector<8x128xf32>
    %c7_83 = arith.constant 7 : index
    %c0_84 = arith.constant 0 : index
    %c0_85 = arith.constant 0 : index
    %97 = vector.load %arg14[%c7_83, %c0_84, %c0_85] : memref<8x8x128xf32, #tpu.memory_space<vmem>>, vector<1x8x128xf32>
    %98 = vector.shape_cast %97 : vector<1x8x128xf32> to vector<8x128xf32>
    %99 = vector.shape_cast %96 : vector<8x128xf32> to vector<1x8x128xf32>
    tpu.vector_store %arg14[%c7_83, %c0_84, %c0_85], %99 {strides = array<i32>} : memref<8x8x128xf32, #tpu.memory_space<vmem>>, vector<1x8x128xf32>,
    %c0_86 = arith.constant 0 : index
    %c0_87 = arith.constant 0 : index
    %c0_88 = arith.constant 0 : index
    %100 = vector.load %arg6[%c0_86, %c0_87, %c0_88] : memref<4x128x128xf32, #tpu.memory_space<vmem>>, vector<1x128x128xf32>
    %101 = vector.shape_cast %100 : vector<1x128x128xf32> to vector<128x128xf32>
    %cst_89 = arith.constant 0.000000e+00 : f32
    %102 = vector.broadcast %cst_89 : f32 to vector<8x128xf32>
    %c0_90 = arith.constant 0 : index
    %c0_91 = arith.constant 0 : index
    %c0_92 = arith.constant 0 : index
    %103 = vector.load %arg14[%c0_90, %c0_91, %c0_92] : memref<8x8x128xf32, #tpu.memory_space<vmem>>, vector<1x8x128xf32>
    %104 = vector.shape_cast %103 : vector<1x8x128xf32> to vector<8x128xf32>
    %cst_93 = arith.constant dense<0.000000e+00> : vector<8x128xf32>
    %105 = tpu.matmul %102, %101, %cst_93 {dimension_numbers = #tpu.dot_dimension_numbers<[1], [0], [0], [1], [0, 0, 1, 1], [], []>} : vector<8x128xf32>, vector<128x128xf32>, vector<8x128xf32> -> vector<8x128xf32>
    %106 = arith.addf %104, %105 : vector<8x128xf32>
    %107 = math.tanh %106 : vector<8x128xf32>
    %c0_94 = arith.constant 0 : index
    %c0_95 = arith.constant 0 : index
    %c0_96 = arith.constant 0 : index
    %108 = vector.load %arg14[%c0_94, %c0_95, %c0_96] : memref<8x8x128xf32, #tpu.memory_space<vmem>>, vector<1x8x128xf32>
    %109 = vector.shape_cast %108 : vector<1x8x128xf32> to vector<8x128xf32>
    %110 = vector.shape_cast %107 : vector<8x128xf32> to vector<1x8x128xf32>
    tpu.vector_store %arg14[%c0_94, %c0_95, %c0_96], %110 {strides = array<i32>} : memref<8x8x128xf32, #tpu.memory_space<vmem>>, vector<1x8x128xf32>,
    %c1_97 = arith.constant 1 : index
    %c0_98 = arith.constant 0 : index
    %c0_99 = arith.constant 0 : index
    %111 = vector.load %arg14[%c1_97, %c0_98, %c0_99] : memref<8x8x128xf32, #tpu.memory_space<vmem>>, vector<1x8x128xf32>
    %112 = vector.shape_cast %111 : vector<1x8x128xf32> to vector<8x128xf32>
    %cst_100 = arith.constant dense<0.000000e+00> : vector<8x128xf32>
    %113 = tpu.matmul %107, %101, %cst_100 {dimension_numbers = #tpu.dot_dimension_numbers<[1], [0], [0], [1], [0, 0, 1, 1], [], []>} : vector<8x128xf32>, vector<128x128xf32>, vector<8x128xf32> -> vector<8x128xf32>
    %114 = arith.addf %112, %113 : vector<8x128xf32>
    %115 = math.tanh %114 : vector<8x128xf32>
    %c1_101 = arith.constant 1 : index
    %c0_102 = arith.constant 0 : index
    %c0_103 = arith.constant 0 : index
    %116 = vector.load %arg14[%c1_101, %c0_102, %c0_103] : memref<8x8x128xf32, #tpu.memory_space<vmem>>, vector<1x8x128xf32>
    %117 = vector.shape_cast %116 : vector<1x8x128xf32> to vector<8x128xf32>
    %118 = vector.shape_cast %115 : vector<8x128xf32> to vector<1x8x128xf32>
    tpu.vector_store %arg14[%c1_101, %c0_102, %c0_103], %118 {strides = array<i32>} : memref<8x8x128xf32, #tpu.memory_space<vmem>>, vector<1x8x128xf32>,
    %c2_104 = arith.constant 2 : index
    %c0_105 = arith.constant 0 : index
    %c0_106 = arith.constant 0 : index
    %119 = vector.load %arg14[%c2_104, %c0_105, %c0_106] : memref<8x8x128xf32, #tpu.memory_space<vmem>>, vector<1x8x128xf32>
    %120 = vector.shape_cast %119 : vector<1x8x128xf32> to vector<8x128xf32>
    %cst_107 = arith.constant dense<0.000000e+00> : vector<8x128xf32>
    %121 = tpu.matmul %115, %101, %cst_107 {dimension_numbers = #tpu.dot_dimension_numbers<[1], [0], [0], [1], [0, 0, 1, 1], [], []>} : vector<8x128xf32>, vector<128x128xf32>, vector<8x128xf32> -> vector<8x128xf32>
    %122 = arith.addf %120, %121 : vector<8x128xf32>
    %123 = math.tanh %122 : vector<8x128xf32>
    %c2_108 = arith.constant 2 : index
    %c0_109 = arith.constant 0 : index
    %c0_110 = arith.constant 0 : index
    %124 = vector.load %arg14[%c2_108, %c0_109, %c0_110] : memref<8x8x128xf32, #tpu.memory_space<vmem>>, vector<1x8x128xf32>
    %125 = vector.shape_cast %124 : vector<1x8x128xf32> to vector<8x128xf32>
    %126 = vector.shape_cast %123 : vector<8x128xf32> to vector<1x8x128xf32>
    tpu.vector_store %arg14[%c2_108, %c0_109, %c0_110], %126 {strides = array<i32>} : memref<8x8x128xf32, #tpu.memory_space<vmem>>, vector<1x8x128xf32>,
    %c3_111 = arith.constant 3 : index
    %c0_112 = arith.constant 0 : index
    %c0_113 = arith.constant 0 : index
    %127 = vector.load %arg14[%c3_111, %c0_112, %c0_113] : memref<8x8x128xf32, #tpu.memory_space<vmem>>, vector<1x8x128xf32>
    %128 = vector.shape_cast %127 : vector<1x8x128xf32> to vector<8x128xf32>
    %cst_114 = arith.constant dense<0.000000e+00> : vector<8x128xf32>
    %129 = tpu.matmul %123, %101, %cst_114 {dimension_numbers = #tpu.dot_dimension_numbers<[1], [0], [0], [1], [0, 0, 1, 1], [], []>} : vector<8x128xf32>, vector<128x128xf32>, vector<8x128xf32> -> vector<8x128xf32>
    %130 = arith.addf %128, %129 : vector<8x128xf32>
    %131 = math.tanh %130 : vector<8x128xf32>
    %c3_115 = arith.constant 3 : index
    %c0_116 = arith.constant 0 : index
    %c0_117 = arith.constant 0 : index
    %132 = vector.load %arg14[%c3_115, %c0_116, %c0_117] : memref<8x8x128xf32, #tpu.memory_space<vmem>>, vector<1x8x128xf32>
    %133 = vector.shape_cast %132 : vector<1x8x128xf32> to vector<8x128xf32>
    %134 = vector.shape_cast %131 : vector<8x128xf32> to vector<1x8x128xf32>
    tpu.vector_store %arg14[%c3_115, %c0_116, %c0_117], %134 {strides = array<i32>} : memref<8x8x128xf32, #tpu.memory_space<vmem>>, vector<1x8x128xf32>,
    %c4_118 = arith.constant 4 : index
    %c0_119 = arith.constant 0 : index
    %c0_120 = arith.constant 0 : index
    %135 = vector.load %arg14[%c4_118, %c0_119, %c0_120] : memref<8x8x128xf32, #tpu.memory_space<vmem>>, vector<1x8x128xf32>
    %136 = vector.shape_cast %135 : vector<1x8x128xf32> to vector<8x128xf32>
    %cst_121 = arith.constant dense<0.000000e+00> : vector<8x128xf32>
    %137 = tpu.matmul %131, %101, %cst_121 {dimension_numbers = #tpu.dot_dimension_numbers<[1], [0], [0], [1], [0, 0, 1, 1], [], []>} : vector<8x128xf32>, vector<128x128xf32>, vector<8x128xf32> -> vector<8x128xf32>
    %138 = arith.addf %136, %137 : vector<8x128xf32>
    %139 = math.tanh %138 : vector<8x128xf32>
    %c4_122 = arith.constant 4 : index
    %c0_123 = arith.constant 0 : index
    %c0_124 = arith.constant 0 : index
    %140 = vector.load %arg14[%c4_122, %c0_123, %c0_124] : memref<8x8x128xf32, #tpu.memory_space<vmem>>, vector<1x8x128xf32>
    %141 = vector.shape_cast %140 : vector<1x8x128xf32> to vector<8x128xf32>
    %142 = vector.shape_cast %139 : vector<8x128xf32> to vector<1x8x128xf32>
    tpu.vector_store %arg14[%c4_122, %c0_123, %c0_124], %142 {strides = array<i32>} : memref<8x8x128xf32, #tpu.memory_space<vmem>>, vector<1x8x128xf32>,
    %c5_125 = arith.constant 5 : index
    %c0_126 = arith.constant 0 : index
    %c0_127 = arith.constant 0 : index
    %143 = vector.load %arg14[%c5_125, %c0_126, %c0_127] : memref<8x8x128xf32, #tpu.memory_space<vmem>>, vector<1x8x128xf32>
    %144 = vector.shape_cast %143 : vector<1x8x128xf32> to vector<8x128xf32>
    %cst_128 = arith.constant dense<0.000000e+00> : vector<8x128xf32>
    %145 = tpu.matmul %139, %101, %cst_128 {dimension_numbers = #tpu.dot_dimension_numbers<[1], [0], [0], [1], [0, 0, 1, 1], [], []>} : vector<8x128xf32>, vector<128x128xf32>, vector<8x128xf32> -> vector<8x128xf32>
    %146 = arith.addf %144, %145 : vector<8x128xf32>
    %147 = math.tanh %146 : vector<8x128xf32>
    %c5_129 = arith.constant 5 : index
    %c0_130 = arith.constant 0 : index
    %c0_131 = arith.constant 0 : index
    %148 = vector.load %arg14[%c5_129, %c0_130, %c0_131] : memref<8x8x128xf32, #tpu.memory_space<vmem>>, vector<1x8x128xf32>
    %149 = vector.shape_cast %148 : vector<1x8x128xf32> to vector<8x128xf32>
    %150 = vector.shape_cast %147 : vector<8x128xf32> to vector<1x8x128xf32>
    tpu.vector_store %arg14[%c5_129, %c0_130, %c0_131], %150 {strides = array<i32>} : memref<8x8x128xf32, #tpu.memory_space<vmem>>, vector<1x8x128xf32>,
    %c6_132 = arith.constant 6 : index
    %c0_133 = arith.constant 0 : index
    %c0_134 = arith.constant 0 : index
    %151 = vector.load %arg14[%c6_132, %c0_133, %c0_134] : memref<8x8x128xf32, #tpu.memory_space<vmem>>, vector<1x8x128xf32>
    %152 = vector.shape_cast %151 : vector<1x8x128xf32> to vector<8x128xf32>
    %cst_135 = arith.constant dense<0.000000e+00> : vector<8x128xf32>
    %153 = tpu.matmul %147, %101, %cst_135 {dimension_numbers = #tpu.dot_dimension_numbers<[1], [0], [0], [1], [0, 0, 1, 1], [], []>} : vector<8x128xf32>, vector<128x128xf32>, vector<8x128xf32> -> vector<8x128xf32>
    %154 = arith.addf %152, %153 : vector<8x128xf32>
    %155 = math.tanh %154 : vector<8x128xf32>
    %c6_136 = arith.constant 6 : index
    %c0_137 = arith.constant 0 : index
    %c0_138 = arith.constant 0 : index
    %156 = vector.load %arg14[%c6_136, %c0_137, %c0_138] : memref<8x8x128xf32, #tpu.memory_space<vmem>>, vector<1x8x128xf32>
    %157 = vector.shape_cast %156 : vector<1x8x128xf32> to vector<8x128xf32>
    %158 = vector.shape_cast %155 : vector<8x128xf32> to vector<1x8x128xf32>
    tpu.vector_store %arg14[%c6_136, %c0_137, %c0_138], %158 {strides = array<i32>} : memref<8x8x128xf32, #tpu.memory_space<vmem>>, vector<1x8x128xf32>,
    %c7_139 = arith.constant 7 : index
    %c0_140 = arith.constant 0 : index
    %c0_141 = arith.constant 0 : index
    %159 = vector.load %arg14[%c7_139, %c0_140, %c0_141] : memref<8x8x128xf32, #tpu.memory_space<vmem>>, vector<1x8x128xf32>
    %160 = vector.shape_cast %159 : vector<1x8x128xf32> to vector<8x128xf32>
    %cst_142 = arith.constant dense<0.000000e+00> : vector<8x128xf32>
    %161 = tpu.matmul %155, %101, %cst_142 {dimension_numbers = #tpu.dot_dimension_numbers<[1], [0], [0], [1], [0, 0, 1, 1], [], []>} : vector<8x128xf32>, vector<128x128xf32>, vector<8x128xf32> -> vector<8x128xf32>
    %162 = arith.addf %160, %161 : vector<8x128xf32>
    %163 = math.tanh %162 : vector<8x128xf32>
    %c7_143 = arith.constant 7 : index
    %c0_144 = arith.constant 0 : index
    %c0_145 = arith.constant 0 : index
    %164 = vector.load %arg14[%c7_143, %c0_144, %c0_145] : memref<8x8x128xf32, #tpu.memory_space<vmem>>, vector<1x8x128xf32>
    %165 = vector.shape_cast %164 : vector<1x8x128xf32> to vector<8x128xf32>
    %166 = vector.shape_cast %163 : vector<8x128xf32> to vector<1x8x128xf32>
    tpu.vector_store %arg14[%c7_143, %c0_144, %c0_145], %166 {strides = array<i32>} : memref<8x8x128xf32, #tpu.memory_space<vmem>>, vector<1x8x128xf32>,
    %c0_146 = arith.constant 0 : index
    %c0_147 = arith.constant 0 : index
    %c0_148 = arith.constant 0 : index
    %167 = vector.load %arg14[%c0_146, %c0_147, %c0_148] : memref<8x8x128xf32, #tpu.memory_space<vmem>>, vector<8x8x128xf32>
    %168 = vector.shape_cast %167 : vector<8x8x128xf32> to vector<64x128xf32>
    %c0_149 = arith.constant 0 : index
    %c0_150 = arith.constant 0 : index
    %c0_151 = arith.constant 0 : index
    %169 = vector.load %arg4[%c0_149, %c0_150, %c0_151] : memref<3x128x128xf32, #tpu.memory_space<vmem>>, vector<1x128x128xf32>
    %170 = vector.shape_cast %169 : vector<1x128x128xf32> to vector<128x128xf32>
    %cst_152 = arith.constant dense<0.000000e+00> : vector<64x128xf32>
    %171 = tpu.matmul %168, %170, %cst_152 {dimension_numbers = #tpu.dot_dimension_numbers<[1], [0], [0], [1], [0, 0, 1, 1], [], []>} : vector<64x128xf32>, vector<128x128xf32>, vector<64x128xf32> -> vector<64x128xf32>
    %c1_153 = arith.constant 1 : index
    %c0_154 = arith.constant 0 : index
    %c0_155 = arith.constant 0 : index
    %172 = vector.load %arg7[%c1_153, %c0_154, %c0_155] : memref<4x1x128xf32, #tpu.memory_space<vmem>>, vector<1x1x128xf32>
    %173 = vector.shape_cast %172 : vector<1x1x128xf32> to vector<1x128xf32>
    %174 = vector.broadcast %173 : vector<1x128xf32> to vector<64x128xf32>
    %175 = arith.addf %171, %174 : vector<64x128xf32>
    %c0_156 = arith.constant 0 : index
    %c0_157 = arith.constant 0 : index
    %c0_158 = arith.constant 0 : index
    %176 = vector.load %arg5[%c0_156, %c0_157, %c0_158] : memref<3x128x128xf32, #tpu.memory_space<vmem>>, vector<1x128x128xf32>
    %177 = vector.shape_cast %176 : vector<1x128x128xf32> to vector<128x128xf32>
    %cst_159 = arith.constant dense<0.000000e+00> : vector<64x128xf32>
    %178 = tpu.matmul %168, %177, %cst_159 {dimension_numbers = #tpu.dot_dimension_numbers<[1], [0], [0], [1], [0, 0, 1, 1], [], []>} : vector<64x128xf32>, vector<128x128xf32>, vector<64x128xf32> -> vector<64x128xf32>
    %179 = vector.extract_strided_slice %175 {offsets = [0, 0], sizes = [8, 128], strides = [1, 1]} : vector<64x128xf32> to vector<8x128xf32>
    %180 = vector.extract_strided_slice %178 {offsets = [56, 0], sizes = [8, 128], strides = [1, 1]} : vector<64x128xf32> to vector<8x128xf32>
    %181 = arith.addf %179, %180 : vector<8x128xf32>
    %c0_160 = arith.constant 0 : index
    %c0_161 = arith.constant 0 : index
    %c0_162 = arith.constant 0 : index
    %182 = vector.load %arg14[%c0_160, %c0_161, %c0_162] : memref<8x8x128xf32, #tpu.memory_space<vmem>>, vector<1x8x128xf32>
    %183 = vector.shape_cast %182 : vector<1x8x128xf32> to vector<8x128xf32>
    %184 = vector.shape_cast %181 : vector<8x128xf32> to vector<1x8x128xf32>
    tpu.vector_store %arg14[%c0_160, %c0_161, %c0_162], %184 {strides = array<i32>} : memref<8x8x128xf32, #tpu.memory_space<vmem>>, vector<1x8x128xf32>,
    %185 = vector.extract_strided_slice %175 {offsets = [8, 0], sizes = [8, 128], strides = [1, 1]} : vector<64x128xf32> to vector<8x128xf32>
    %186 = vector.extract_strided_slice %178 {offsets = [48, 0], sizes = [8, 128], strides = [1, 1]} : vector<64x128xf32> to vector<8x128xf32>
    %187 = arith.addf %185, %186 : vector<8x128xf32>
    %c1_163 = arith.constant 1 : index
    %c0_164 = arith.constant 0 : index
    %c0_165 = arith.constant 0 : index
    %188 = vector.load %arg14[%c1_163, %c0_164, %c0_165] : memref<8x8x128xf32, #tpu.memory_space<vmem>>, vector<1x8x128xf32>
    %189 = vector.shape_cast %188 : vector<1x8x128xf32> to vector<8x128xf32>
    %190 = vector.shape_cast %187 : vector<8x128xf32> to vector<1x8x128xf32>
    tpu.vector_store %arg14[%c1_163, %c0_164, %c0_165], %190 {strides = array<i32>} : memref<8x8x128xf32, #tpu.memory_space<vmem>>, vector<1x8x128xf32>,
    %191 = vector.extract_strided_slice %175 {offsets = [16, 0], sizes = [8, 128], strides = [1, 1]} : vector<64x128xf32> to vector<8x128xf32>
    %192 = vector.extract_strided_slice %178 {offsets = [40, 0], sizes = [8, 128], strides = [1, 1]} : vector<64x128xf32> to vector<8x128xf32>
    %193 = arith.addf %191, %192 : vector<8x128xf32>
    %c2_166 = arith.constant 2 : index
    %c0_167 = arith.constant 0 : index
    %c0_168 = arith.constant 0 : index
    %194 = vector.load %arg14[%c2_166, %c0_167, %c0_168] : memref<8x8x128xf32, #tpu.memory_space<vmem>>, vector<1x8x128xf32>
    %195 = vector.shape_cast %194 : vector<1x8x128xf32> to vector<8x128xf32>
    %196 = vector.shape_cast %193 : vector<8x128xf32> to vector<1x8x128xf32>
    tpu.vector_store %arg14[%c2_166, %c0_167, %c0_168], %196 {strides = array<i32>} : memref<8x8x128xf32, #tpu.memory_space<vmem>>, vector<1x8x128xf32>,
    %197 = vector.extract_strided_slice %175 {offsets = [24, 0], sizes = [8, 128], strides = [1, 1]} : vector<64x128xf32> to vector<8x128xf32>
    %198 = vector.extract_strided_slice %178 {offsets = [32, 0], sizes = [8, 128], strides = [1, 1]} : vector<64x128xf32> to vector<8x128xf32>
    %199 = arith.addf %197, %198 : vector<8x128xf32>
    %c3_169 = arith.constant 3 : index
    %c0_170 = arith.constant 0 : index
    %c0_171 = arith.constant 0 : index
    %200 = vector.load %arg14[%c3_169, %c0_170, %c0_171] : memref<8x8x128xf32, #tpu.memory_space<vmem>>, vector<1x8x128xf32>
    %201 = vector.shape_cast %200 : vector<1x8x128xf32> to vector<8x128xf32>
    %202 = vector.shape_cast %199 : vector<8x128xf32> to vector<1x8x128xf32>
    tpu.vector_store %arg14[%c3_169, %c0_170, %c0_171], %202 {strides = array<i32>} : memref<8x8x128xf32, #tpu.memory_space<vmem>>, vector<1x8x128xf32>,
    %203 = vector.extract_strided_slice %175 {offsets = [32, 0], sizes = [8, 128], strides = [1, 1]} : vector<64x128xf32> to vector<8x128xf32>
    %204 = vector.extract_strided_slice %178 {offsets = [24, 0], sizes = [8, 128], strides = [1, 1]} : vector<64x128xf32> to vector<8x128xf32>
    %205 = arith.addf %203, %204 : vector<8x128xf32>
    %c4_172 = arith.constant 4 : index
    %c0_173 = arith.constant 0 : index
    %c0_174 = arith.constant 0 : index
    %206 = vector.load %arg14[%c4_172, %c0_173, %c0_174] : memref<8x8x128xf32, #tpu.memory_space<vmem>>, vector<1x8x128xf32>
    %207 = vector.shape_cast %206 : vector<1x8x128xf32> to vector<8x128xf32>
    %208 = vector.shape_cast %205 : vector<8x128xf32> to vector<1x8x128xf32>
    tpu.vector_store %arg14[%c4_172, %c0_173, %c0_174], %208 {strides = array<i32>} : memref<8x8x128xf32, #tpu.memory_space<vmem>>, vector<1x8x128xf32>,
    %209 = vector.extract_strided_slice %175 {offsets = [40, 0], sizes = [8, 128], strides = [1, 1]} : vector<64x128xf32> to vector<8x128xf32>
    %210 = vector.extract_strided_slice %178 {offsets = [16, 0], sizes = [8, 128], strides = [1, 1]} : vector<64x128xf32> to vector<8x128xf32>
    %211 = arith.addf %209, %210 : vector<8x128xf32>
    %c5_175 = arith.constant 5 : index
    %c0_176 = arith.constant 0 : index
    %c0_177 = arith.constant 0 : index
    %212 = vector.load %arg14[%c5_175, %c0_176, %c0_177] : memref<8x8x128xf32, #tpu.memory_space<vmem>>, vector<1x8x128xf32>
    %213 = vector.shape_cast %212 : vector<1x8x128xf32> to vector<8x128xf32>
    %214 = vector.shape_cast %211 : vector<8x128xf32> to vector<1x8x128xf32>
    tpu.vector_store %arg14[%c5_175, %c0_176, %c0_177], %214 {strides = array<i32>} : memref<8x8x128xf32, #tpu.memory_space<vmem>>, vector<1x8x128xf32>,
    %215 = vector.extract_strided_slice %175 {offsets = [48, 0], sizes = [8, 128], strides = [1, 1]} : vector<64x128xf32> to vector<8x128xf32>
    %216 = vector.extract_strided_slice %178 {offsets = [8, 0], sizes = [8, 128], strides = [1, 1]} : vector<64x128xf32> to vector<8x128xf32>
    %217 = arith.addf %215, %216 : vector<8x128xf32>
    %c6_178 = arith.constant 6 : index
    %c0_179 = arith.constant 0 : index
    %c0_180 = arith.constant 0 : index
    %218 = vector.load %arg14[%c6_178, %c0_179, %c0_180] : memref<8x8x128xf32, #tpu.memory_space<vmem>>, vector<1x8x128xf32>
    %219 = vector.shape_cast %218 : vector<1x8x128xf32> to vector<8x128xf32>
    %220 = vector.shape_cast %217 : vector<8x128xf32> to vector<1x8x128xf32>
    tpu.vector_store %arg14[%c6_178, %c0_179, %c0_180], %220 {strides = array<i32>} : memref<8x8x128xf32, #tpu.memory_space<vmem>>, vector<1x8x128xf32>,
    %221 = vector.extract_strided_slice %175 {offsets = [56, 0], sizes = [8, 128], strides = [1, 1]} : vector<64x128xf32> to vector<8x128xf32>
    %222 = vector.extract_strided_slice %178 {offsets = [0, 0], sizes = [8, 128], strides = [1, 1]} : vector<64x128xf32> to vector<8x128xf32>
    %223 = arith.addf %221, %222 : vector<8x128xf32>
    %c7_181 = arith.constant 7 : index
    %c0_182 = arith.constant 0 : index
    %c0_183 = arith.constant 0 : index
    %224 = vector.load %arg14[%c7_181, %c0_182, %c0_183] : memref<8x8x128xf32, #tpu.memory_space<vmem>>, vector<1x8x128xf32>
    %225 = vector.shape_cast %224 : vector<1x8x128xf32> to vector<8x128xf32>
    %226 = vector.shape_cast %223 : vector<8x128xf32> to vector<1x8x128xf32>
    tpu.vector_store %arg14[%c7_181, %c0_182, %c0_183], %226 {strides = array<i32>} : memref<8x8x128xf32, #tpu.memory_space<vmem>>, vector<1x8x128xf32>,
    %c1_184 = arith.constant 1 : index
    %c0_185 = arith.constant 0 : index
    %c0_186 = arith.constant 0 : index
    %227 = vector.load %arg6[%c1_184, %c0_185, %c0_186] : memref<4x128x128xf32, #tpu.memory_space<vmem>>, vector<1x128x128xf32>
    %228 = vector.shape_cast %227 : vector<1x128x128xf32> to vector<128x128xf32>
    %cst_187 = arith.constant 0.000000e+00 : f32
    %229 = vector.broadcast %cst_187 : f32 to vector<8x128xf32>
    %c0_188 = arith.constant 0 : index
    %c0_189 = arith.constant 0 : index
    %c0_190 = arith.constant 0 : index
    %230 = vector.load %arg14[%c0_188, %c0_189, %c0_190] : memref<8x8x128xf32, #tpu.memory_space<vmem>>, vector<1x8x128xf32>
    %231 = vector.shape_cast %230 : vector<1x8x128xf32> to vector<8x128xf32>
    %cst_191 = arith.constant dense<0.000000e+00> : vector<8x128xf32>
    %232 = tpu.matmul %229, %228, %cst_191 {dimension_numbers = #tpu.dot_dimension_numbers<[1], [0], [0], [1], [0, 0, 1, 1], [], []>} : vector<8x128xf32>, vector<128x128xf32>, vector<8x128xf32> -> vector<8x128xf32>
    %233 = arith.addf %231, %232 : vector<8x128xf32>
    %234 = math.tanh %233 : vector<8x128xf32>
    %c0_192 = arith.constant 0 : index
    %c0_193 = arith.constant 0 : index
    %c0_194 = arith.constant 0 : index
    %235 = vector.load %arg14[%c0_192, %c0_193, %c0_194] : memref<8x8x128xf32, #tpu.memory_space<vmem>>, vector<1x8x128xf32>
    %236 = vector.shape_cast %235 : vector<1x8x128xf32> to vector<8x128xf32>
    %237 = vector.shape_cast %234 : vector<8x128xf32> to vector<1x8x128xf32>
    tpu.vector_store %arg14[%c0_192, %c0_193, %c0_194], %237 {strides = array<i32>} : memref<8x8x128xf32, #tpu.memory_space<vmem>>, vector<1x8x128xf32>,
    %c1_195 = arith.constant 1 : index
    %c0_196 = arith.constant 0 : index
    %c0_197 = arith.constant 0 : index
    %238 = vector.load %arg14[%c1_195, %c0_196, %c0_197] : memref<8x8x128xf32, #tpu.memory_space<vmem>>, vector<1x8x128xf32>
    %239 = vector.shape_cast %238 : vector<1x8x128xf32> to vector<8x128xf32>
    %cst_198 = arith.constant dense<0.000000e+00> : vector<8x128xf32>
    %240 = tpu.matmul %234, %228, %cst_198 {dimension_numbers = #tpu.dot_dimension_numbers<[1], [0], [0], [1], [0, 0, 1, 1], [], []>} : vector<8x128xf32>, vector<128x128xf32>, vector<8x128xf32> -> vector<8x128xf32>
    %241 = arith.addf %239, %240 : vector<8x128xf32>
    %242 = math.tanh %241 : vector<8x128xf32>
    %c1_199 = arith.constant 1 : index
    %c0_200 = arith.constant 0 : index
    %c0_201 = arith.constant 0 : index
    %243 = vector.load %arg14[%c1_199, %c0_200, %c0_201] : memref<8x8x128xf32, #tpu.memory_space<vmem>>, vector<1x8x128xf32>
    %244 = vector.shape_cast %243 : vector<1x8x128xf32> to vector<8x128xf32>
    %245 = vector.shape_cast %242 : vector<8x128xf32> to vector<1x8x128xf32>
    tpu.vector_store %arg14[%c1_199, %c0_200, %c0_201], %245 {strides = array<i32>} : memref<8x8x128xf32, #tpu.memory_space<vmem>>, vector<1x8x128xf32>,
    %c2_202 = arith.constant 2 : index
    %c0_203 = arith.constant 0 : index
    %c0_204 = arith.constant 0 : index
    %246 = vector.load %arg14[%c2_202, %c0_203, %c0_204] : memref<8x8x128xf32, #tpu.memory_space<vmem>>, vector<1x8x128xf32>
    %247 = vector.shape_cast %246 : vector<1x8x128xf32> to vector<8x128xf32>
    %cst_205 = arith.constant dense<0.000000e+00> : vector<8x128xf32>
    %248 = tpu.matmul %242, %228, %cst_205 {dimension_numbers = #tpu.dot_dimension_numbers<[1], [0], [0], [1], [0, 0, 1, 1], [], []>} : vector<8x128xf32>, vector<128x128xf32>, vector<8x128xf32> -> vector<8x128xf32>
    %249 = arith.addf %247, %248 : vector<8x128xf32>
    %250 = math.tanh %249 : vector<8x128xf32>
    %c2_206 = arith.constant 2 : index
    %c0_207 = arith.constant 0 : index
    %c0_208 = arith.constant 0 : index
    %251 = vector.load %arg14[%c2_206, %c0_207, %c0_208] : memref<8x8x128xf32, #tpu.memory_space<vmem>>, vector<1x8x128xf32>
    %252 = vector.shape_cast %251 : vector<1x8x128xf32> to vector<8x128xf32>
    %253 = vector.shape_cast %250 : vector<8x128xf32> to vector<1x8x128xf32>
    tpu.vector_store %arg14[%c2_206, %c0_207, %c0_208], %253 {strides = array<i32>} : memref<8x8x128xf32, #tpu.memory_space<vmem>>, vector<1x8x128xf32>,
    %c3_209 = arith.constant 3 : index
    %c0_210 = arith.constant 0 : index
    %c0_211 = arith.constant 0 : index
    %254 = vector.load %arg14[%c3_209, %c0_210, %c0_211] : memref<8x8x128xf32, #tpu.memory_space<vmem>>, vector<1x8x128xf32>
    %255 = vector.shape_cast %254 : vector<1x8x128xf32> to vector<8x128xf32>
    %cst_212 = arith.constant dense<0.000000e+00> : vector<8x128xf32>
    %256 = tpu.matmul %250, %228, %cst_212 {dimension_numbers = #tpu.dot_dimension_numbers<[1], [0], [0], [1], [0, 0, 1, 1], [], []>} : vector<8x128xf32>, vector<128x128xf32>, vector<8x128xf32> -> vector<8x128xf32>
    %257 = arith.addf %255, %256 : vector<8x128xf32>
    %258 = math.tanh %257 : vector<8x128xf32>
    %c3_213 = arith.constant 3 : index
    %c0_214 = arith.constant 0 : index
    %c0_215 = arith.constant 0 : index
    %259 = vector.load %arg14[%c3_213, %c0_214, %c0_215] : memref<8x8x128xf32, #tpu.memory_space<vmem>>, vector<1x8x128xf32>
    %260 = vector.shape_cast %259 : vector<1x8x128xf32> to vector<8x128xf32>
    %261 = vector.shape_cast %258 : vector<8x128xf32> to vector<1x8x128xf32>
    tpu.vector_store %arg14[%c3_213, %c0_214, %c0_215], %261 {strides = array<i32>} : memref<8x8x128xf32, #tpu.memory_space<vmem>>, vector<1x8x128xf32>,
    %c4_216 = arith.constant 4 : index
    %c0_217 = arith.constant 0 : index
    %c0_218 = arith.constant 0 : index
    %262 = vector.load %arg14[%c4_216, %c0_217, %c0_218] : memref<8x8x128xf32, #tpu.memory_space<vmem>>, vector<1x8x128xf32>
    %263 = vector.shape_cast %262 : vector<1x8x128xf32> to vector<8x128xf32>
    %cst_219 = arith.constant dense<0.000000e+00> : vector<8x128xf32>
    %264 = tpu.matmul %258, %228, %cst_219 {dimension_numbers = #tpu.dot_dimension_numbers<[1], [0], [0], [1], [0, 0, 1, 1], [], []>} : vector<8x128xf32>, vector<128x128xf32>, vector<8x128xf32> -> vector<8x128xf32>
    %265 = arith.addf %263, %264 : vector<8x128xf32>
    %266 = math.tanh %265 : vector<8x128xf32>
    %c4_220 = arith.constant 4 : index
    %c0_221 = arith.constant 0 : index
    %c0_222 = arith.constant 0 : index
    %267 = vector.load %arg14[%c4_220, %c0_221, %c0_222] : memref<8x8x128xf32, #tpu.memory_space<vmem>>, vector<1x8x128xf32>
    %268 = vector.shape_cast %267 : vector<1x8x128xf32> to vector<8x128xf32>
    %269 = vector.shape_cast %266 : vector<8x128xf32> to vector<1x8x128xf32>
    tpu.vector_store %arg14[%c4_220, %c0_221, %c0_222], %269 {strides = array<i32>} : memref<8x8x128xf32, #tpu.memory_space<vmem>>, vector<1x8x128xf32>,
    %c5_223 = arith.constant 5 : index
    %c0_224 = arith.constant 0 : index
    %c0_225 = arith.constant 0 : index
    %270 = vector.load %arg14[%c5_223, %c0_224, %c0_225] : memref<8x8x128xf32, #tpu.memory_space<vmem>>, vector<1x8x128xf32>
    %271 = vector.shape_cast %270 : vector<1x8x128xf32> to vector<8x128xf32>
    %cst_226 = arith.constant dense<0.000000e+00> : vector<8x128xf32>
    %272 = tpu.matmul %266, %228, %cst_226 {dimension_numbers = #tpu.dot_dimension_numbers<[1], [0], [0], [1], [0, 0, 1, 1], [], []>} : vector<8x128xf32>, vector<128x128xf32>, vector<8x128xf32> -> vector<8x128xf32>
    %273 = arith.addf %271, %272 : vector<8x128xf32>
    %274 = math.tanh %273 : vector<8x128xf32>
    %c5_227 = arith.constant 5 : index
    %c0_228 = arith.constant 0 : index
    %c0_229 = arith.constant 0 : index
    %275 = vector.load %arg14[%c5_227, %c0_228, %c0_229] : memref<8x8x128xf32, #tpu.memory_space<vmem>>, vector<1x8x128xf32>
    %276 = vector.shape_cast %275 : vector<1x8x128xf32> to vector<8x128xf32>
    %277 = vector.shape_cast %274 : vector<8x128xf32> to vector<1x8x128xf32>
    tpu.vector_store %arg14[%c5_227, %c0_228, %c0_229], %277 {strides = array<i32>} : memref<8x8x128xf32, #tpu.memory_space<vmem>>, vector<1x8x128xf32>,
    %c6_230 = arith.constant 6 : index
    %c0_231 = arith.constant 0 : index
    %c0_232 = arith.constant 0 : index
    %278 = vector.load %arg14[%c6_230, %c0_231, %c0_232] : memref<8x8x128xf32, #tpu.memory_space<vmem>>, vector<1x8x128xf32>
    %279 = vector.shape_cast %278 : vector<1x8x128xf32> to vector<8x128xf32>
    %cst_233 = arith.constant dense<0.000000e+00> : vector<8x128xf32>
    %280 = tpu.matmul %274, %228, %cst_233 {dimension_numbers = #tpu.dot_dimension_numbers<[1], [0], [0], [1], [0, 0, 1, 1], [], []>} : vector<8x128xf32>, vector<128x128xf32>, vector<8x128xf32> -> vector<8x128xf32>
    %281 = arith.addf %279, %280 : vector<8x128xf32>
    %282 = math.tanh %281 : vector<8x128xf32>
    %c6_234 = arith.constant 6 : index
    %c0_235 = arith.constant 0 : index
    %c0_236 = arith.constant 0 : index
    %283 = vector.load %arg14[%c6_234, %c0_235, %c0_236] : memref<8x8x128xf32, #tpu.memory_space<vmem>>, vector<1x8x128xf32>
    %284 = vector.shape_cast %283 : vector<1x8x128xf32> to vector<8x128xf32>
    %285 = vector.shape_cast %282 : vector<8x128xf32> to vector<1x8x128xf32>
    tpu.vector_store %arg14[%c6_234, %c0_235, %c0_236], %285 {strides = array<i32>} : memref<8x8x128xf32, #tpu.memory_space<vmem>>, vector<1x8x128xf32>,
    %c7_237 = arith.constant 7 : index
    %c0_238 = arith.constant 0 : index
    %c0_239 = arith.constant 0 : index
    %286 = vector.load %arg14[%c7_237, %c0_238, %c0_239] : memref<8x8x128xf32, #tpu.memory_space<vmem>>, vector<1x8x128xf32>
    %287 = vector.shape_cast %286 : vector<1x8x128xf32> to vector<8x128xf32>
    %cst_240 = arith.constant dense<0.000000e+00> : vector<8x128xf32>
    %288 = tpu.matmul %282, %228, %cst_240 {dimension_numbers = #tpu.dot_dimension_numbers<[1], [0], [0], [1], [0, 0, 1, 1], [], []>} : vector<8x128xf32>, vector<128x128xf32>, vector<8x128xf32> -> vector<8x128xf32>
    %289 = arith.addf %287, %288 : vector<8x128xf32>
    %290 = math.tanh %289 : vector<8x128xf32>
    %c7_241 = arith.constant 7 : index
    %c0_242 = arith.constant 0 : index
    %c0_243 = arith.constant 0 : index
    %291 = vector.load %arg14[%c7_241, %c0_242, %c0_243] : memref<8x8x128xf32, #tpu.memory_space<vmem>>, vector<1x8x128xf32>
    %292 = vector.shape_cast %291 : vector<1x8x128xf32> to vector<8x128xf32>
    %293 = vector.shape_cast %290 : vector<8x128xf32> to vector<1x8x128xf32>
    tpu.vector_store %arg14[%c7_241, %c0_242, %c0_243], %293 {strides = array<i32>} : memref<8x8x128xf32, #tpu.memory_space<vmem>>, vector<1x8x128xf32>,
    %c0_244 = arith.constant 0 : index
    %c0_245 = arith.constant 0 : index
    %c0_246 = arith.constant 0 : index
    %294 = vector.load %arg14[%c0_244, %c0_245, %c0_246] : memref<8x8x128xf32, #tpu.memory_space<vmem>>, vector<8x8x128xf32>
    %295 = vector.shape_cast %294 : vector<8x8x128xf32> to vector<64x128xf32>
    %c1_247 = arith.constant 1 : index
    %c0_248 = arith.constant 0 : index
    %c0_249 = arith.constant 0 : index
    %296 = vector.load %arg4[%c1_247, %c0_248, %c0_249] : memref<3x128x128xf32, #tpu.memory_space<vmem>>, vector<1x128x128xf32>
    %297 = vector.shape_cast %296 : vector<1x128x128xf32> to vector<128x128xf32>
    %cst_250 = arith.constant dense<0.000000e+00> : vector<64x128xf32>
    %298 = tpu.matmul %295, %297, %cst_250 {dimension_numbers = #tpu.dot_dimension_numbers<[1], [0], [0], [1], [0, 0, 1, 1], [], []>} : vector<64x128xf32>, vector<128x128xf32>, vector<64x128xf32> -> vector<64x128xf32>
    %c2_251 = arith.constant 2 : index
    %c0_252 = arith.constant 0 : index
    %c0_253 = arith.constant 0 : index
    %299 = vector.load %arg7[%c2_251, %c0_252, %c0_253] : memref<4x1x128xf32, #tpu.memory_space<vmem>>, vector<1x1x128xf32>
    %300 = vector.shape_cast %299 : vector<1x1x128xf32> to vector<1x128xf32>
    %301 = vector.broadcast %300 : vector<1x128xf32> to vector<64x128xf32>
    %302 = arith.addf %298, %301 : vector<64x128xf32>
    %c1_254 = arith.constant 1 : index
    %c0_255 = arith.constant 0 : index
    %c0_256 = arith.constant 0 : index
    %303 = vector.load %arg5[%c1_254, %c0_255, %c0_256] : memref<3x128x128xf32, #tpu.memory_space<vmem>>, vector<1x128x128xf32>
    %304 = vector.shape_cast %303 : vector<1x128x128xf32> to vector<128x128xf32>
    %cst_257 = arith.constant dense<0.000000e+00> : vector<64x128xf32>
    %305 = tpu.matmul %295, %304, %cst_257 {dimension_numbers = #tpu.dot_dimension_numbers<[1], [0], [0], [1], [0, 0, 1, 1], [], []>} : vector<64x128xf32>, vector<128x128xf32>, vector<64x128xf32> -> vector<64x128xf32>
    %306 = vector.extract_strided_slice %302 {offsets = [0, 0], sizes = [8, 128], strides = [1, 1]} : vector<64x128xf32> to vector<8x128xf32>
    %307 = vector.extract_strided_slice %305 {offsets = [56, 0], sizes = [8, 128], strides = [1, 1]} : vector<64x128xf32> to vector<8x128xf32>
    %308 = arith.addf %306, %307 : vector<8x128xf32>
    %c0_258 = arith.constant 0 : index
    %c0_259 = arith.constant 0 : index
    %c0_260 = arith.constant 0 : index
    %309 = vector.load %arg14[%c0_258, %c0_259, %c0_260] : memref<8x8x128xf32, #tpu.memory_space<vmem>>, vector<1x8x128xf32>
    %310 = vector.shape_cast %309 : vector<1x8x128xf32> to vector<8x128xf32>
    %311 = vector.shape_cast %308 : vector<8x128xf32> to vector<1x8x128xf32>
    tpu.vector_store %arg14[%c0_258, %c0_259, %c0_260], %311 {strides = array<i32>} : memref<8x8x128xf32, #tpu.memory_space<vmem>>, vector<1x8x128xf32>,
    %312 = vector.extract_strided_slice %302 {offsets = [8, 0], sizes = [8, 128], strides = [1, 1]} : vector<64x128xf32> to vector<8x128xf32>
    %313 = vector.extract_strided_slice %305 {offsets = [48, 0], sizes = [8, 128], strides = [1, 1]} : vector<64x128xf32> to vector<8x128xf32>
    %314 = arith.addf %312, %313 : vector<8x128xf32>
    %c1_261 = arith.constant 1 : index
    %c0_262 = arith.constant 0 : index
    %c0_263 = arith.constant 0 : index
    %315 = vector.load %arg14[%c1_261, %c0_262, %c0_263] : memref<8x8x128xf32, #tpu.memory_space<vmem>>, vector<1x8x128xf32>
    %316 = vector.shape_cast %315 : vector<1x8x128xf32> to vector<8x128xf32>
    %317 = vector.shape_cast %314 : vector<8x128xf32> to vector<1x8x128xf32>
    tpu.vector_store %arg14[%c1_261, %c0_262, %c0_263], %317 {strides = array<i32>} : memref<8x8x128xf32, #tpu.memory_space<vmem>>, vector<1x8x128xf32>,
    %318 = vector.extract_strided_slice %302 {offsets = [16, 0], sizes = [8, 128], strides = [1, 1]} : vector<64x128xf32> to vector<8x128xf32>
    %319 = vector.extract_strided_slice %305 {offsets = [40, 0], sizes = [8, 128], strides = [1, 1]} : vector<64x128xf32> to vector<8x128xf32>
    %320 = arith.addf %318, %319 : vector<8x128xf32>
    %c2_264 = arith.constant 2 : index
    %c0_265 = arith.constant 0 : index
    %c0_266 = arith.constant 0 : index
    %321 = vector.load %arg14[%c2_264, %c0_265, %c0_266] : memref<8x8x128xf32, #tpu.memory_space<vmem>>, vector<1x8x128xf32>
    %322 = vector.shape_cast %321 : vector<1x8x128xf32> to vector<8x128xf32>
    %323 = vector.shape_cast %320 : vector<8x128xf32> to vector<1x8x128xf32>
    tpu.vector_store %arg14[%c2_264, %c0_265, %c0_266], %323 {strides = array<i32>} : memref<8x8x128xf32, #tpu.memory_space<vmem>>, vector<1x8x128xf32>,
    %324 = vector.extract_strided_slice %302 {offsets = [24, 0], sizes = [8, 128], strides = [1, 1]} : vector<64x128xf32> to vector<8x128xf32>
    %325 = vector.extract_strided_slice %305 {offsets = [32, 0], sizes = [8, 128], strides = [1, 1]} : vector<64x128xf32> to vector<8x128xf32>
    %326 = arith.addf %324, %325 : vector<8x128xf32>
    %c3_267 = arith.constant 3 : index
    %c0_268 = arith.constant 0 : index
    %c0_269 = arith.constant 0 : index
    %327 = vector.load %arg14[%c3_267, %c0_268, %c0_269] : memref<8x8x128xf32, #tpu.memory_space<vmem>>, vector<1x8x128xf32>
    %328 = vector.shape_cast %327 : vector<1x8x128xf32> to vector<8x128xf32>
    %329 = vector.shape_cast %326 : vector<8x128xf32> to vector<1x8x128xf32>
    tpu.vector_store %arg14[%c3_267, %c0_268, %c0_269], %329 {strides = array<i32>} : memref<8x8x128xf32, #tpu.memory_space<vmem>>, vector<1x8x128xf32>,
    %330 = vector.extract_strided_slice %302 {offsets = [32, 0], sizes = [8, 128], strides = [1, 1]} : vector<64x128xf32> to vector<8x128xf32>
    %331 = vector.extract_strided_slice %305 {offsets = [24, 0], sizes = [8, 128], strides = [1, 1]} : vector<64x128xf32> to vector<8x128xf32>
    %332 = arith.addf %330, %331 : vector<8x128xf32>
    %c4_270 = arith.constant 4 : index
    %c0_271 = arith.constant 0 : index
    %c0_272 = arith.constant 0 : index
    %333 = vector.load %arg14[%c4_270, %c0_271, %c0_272] : memref<8x8x128xf32, #tpu.memory_space<vmem>>, vector<1x8x128xf32>
    %334 = vector.shape_cast %333 : vector<1x8x128xf32> to vector<8x128xf32>
    %335 = vector.shape_cast %332 : vector<8x128xf32> to vector<1x8x128xf32>
    tpu.vector_store %arg14[%c4_270, %c0_271, %c0_272], %335 {strides = array<i32>} : memref<8x8x128xf32, #tpu.memory_space<vmem>>, vector<1x8x128xf32>,
    %336 = vector.extract_strided_slice %302 {offsets = [40, 0], sizes = [8, 128], strides = [1, 1]} : vector<64x128xf32> to vector<8x128xf32>
    %337 = vector.extract_strided_slice %305 {offsets = [16, 0], sizes = [8, 128], strides = [1, 1]} : vector<64x128xf32> to vector<8x128xf32>
    %338 = arith.addf %336, %337 : vector<8x128xf32>
    %c5_273 = arith.constant 5 : index
    %c0_274 = arith.constant 0 : index
    %c0_275 = arith.constant 0 : index
    %339 = vector.load %arg14[%c5_273, %c0_274, %c0_275] : memref<8x8x128xf32, #tpu.memory_space<vmem>>, vector<1x8x128xf32>
    %340 = vector.shape_cast %339 : vector<1x8x128xf32> to vector<8x128xf32>
    %341 = vector.shape_cast %338 : vector<8x128xf32> to vector<1x8x128xf32>
    tpu.vector_store %arg14[%c5_273, %c0_274, %c0_275], %341 {strides = array<i32>} : memref<8x8x128xf32, #tpu.memory_space<vmem>>, vector<1x8x128xf32>,
    %342 = vector.extract_strided_slice %302 {offsets = [48, 0], sizes = [8, 128], strides = [1, 1]} : vector<64x128xf32> to vector<8x128xf32>
    %343 = vector.extract_strided_slice %305 {offsets = [8, 0], sizes = [8, 128], strides = [1, 1]} : vector<64x128xf32> to vector<8x128xf32>
    %344 = arith.addf %342, %343 : vector<8x128xf32>
    %c6_276 = arith.constant 6 : index
    %c0_277 = arith.constant 0 : index
    %c0_278 = arith.constant 0 : index
    %345 = vector.load %arg14[%c6_276, %c0_277, %c0_278] : memref<8x8x128xf32, #tpu.memory_space<vmem>>, vector<1x8x128xf32>
    %346 = vector.shape_cast %345 : vector<1x8x128xf32> to vector<8x128xf32>
    %347 = vector.shape_cast %344 : vector<8x128xf32> to vector<1x8x128xf32>
    tpu.vector_store %arg14[%c6_276, %c0_277, %c0_278], %347 {strides = array<i32>} : memref<8x8x128xf32, #tpu.memory_space<vmem>>, vector<1x8x128xf32>,
    %348 = vector.extract_strided_slice %302 {offsets = [56, 0], sizes = [8, 128], strides = [1, 1]} : vector<64x128xf32> to vector<8x128xf32>
    %349 = vector.extract_strided_slice %305 {offsets = [0, 0], sizes = [8, 128], strides = [1, 1]} : vector<64x128xf32> to vector<8x128xf32>
    %350 = arith.addf %348, %349 : vector<8x128xf32>
    %c7_279 = arith.constant 7 : index
    %c0_280 = arith.constant 0 : index
    %c0_281 = arith.constant 0 : index
    %351 = vector.load %arg14[%c7_279, %c0_280, %c0_281] : memref<8x8x128xf32, #tpu.memory_space<vmem>>, vector<1x8x128xf32>
    %352 = vector.shape_cast %351 : vector<1x8x128xf32> to vector<8x128xf32>
    %353 = vector.shape_cast %350 : vector<8x128xf32> to vector<1x8x128xf32>
    tpu.vector_store %arg14[%c7_279, %c0_280, %c0_281], %353 {strides = array<i32>} : memref<8x8x128xf32, #tpu.memory_space<vmem>>, vector<1x8x128xf32>,
    %c2_282 = arith.constant 2 : index
    %c0_283 = arith.constant 0 : index
    %c0_284 = arith.constant 0 : index
    %354 = vector.load %arg6[%c2_282, %c0_283, %c0_284] : memref<4x128x128xf32, #tpu.memory_space<vmem>>, vector<1x128x128xf32>
    %355 = vector.shape_cast %354 : vector<1x128x128xf32> to vector<128x128xf32>
    %cst_285 = arith.constant 0.000000e+00 : f32
    %356 = vector.broadcast %cst_285 : f32 to vector<8x128xf32>
    %c0_286 = arith.constant 0 : index
    %c0_287 = arith.constant 0 : index
    %c0_288 = arith.constant 0 : index
    %357 = vector.load %arg14[%c0_286, %c0_287, %c0_288] : memref<8x8x128xf32, #tpu.memory_space<vmem>>, vector<1x8x128xf32>
    %358 = vector.shape_cast %357 : vector<1x8x128xf32> to vector<8x128xf32>
    %cst_289 = arith.constant dense<0.000000e+00> : vector<8x128xf32>
    %359 = tpu.matmul %356, %355, %cst_289 {dimension_numbers = #tpu.dot_dimension_numbers<[1], [0], [0], [1], [0, 0, 1, 1], [], []>} : vector<8x128xf32>, vector<128x128xf32>, vector<8x128xf32> -> vector<8x128xf32>
    %360 = arith.addf %358, %359 : vector<8x128xf32>
    %361 = math.tanh %360 : vector<8x128xf32>
    %c0_290 = arith.constant 0 : index
    %c0_291 = arith.constant 0 : index
    %c0_292 = arith.constant 0 : index
    %362 = vector.load %arg14[%c0_290, %c0_291, %c0_292] : memref<8x8x128xf32, #tpu.memory_space<vmem>>, vector<1x8x128xf32>
    %363 = vector.shape_cast %362 : vector<1x8x128xf32> to vector<8x128xf32>
    %364 = vector.shape_cast %361 : vector<8x128xf32> to vector<1x8x128xf32>
    tpu.vector_store %arg14[%c0_290, %c0_291, %c0_292], %364 {strides = array<i32>} : memref<8x8x128xf32, #tpu.memory_space<vmem>>, vector<1x8x128xf32>,
    %c1_293 = arith.constant 1 : index
    %c0_294 = arith.constant 0 : index
    %c0_295 = arith.constant 0 : index
    %365 = vector.load %arg14[%c1_293, %c0_294, %c0_295] : memref<8x8x128xf32, #tpu.memory_space<vmem>>, vector<1x8x128xf32>
    %366 = vector.shape_cast %365 : vector<1x8x128xf32> to vector<8x128xf32>
    %cst_296 = arith.constant dense<0.000000e+00> : vector<8x128xf32>
    %367 = tpu.matmul %361, %355, %cst_296 {dimension_numbers = #tpu.dot_dimension_numbers<[1], [0], [0], [1], [0, 0, 1, 1], [], []>} : vector<8x128xf32>, vector<128x128xf32>, vector<8x128xf32> -> vector<8x128xf32>
    %368 = arith.addf %366, %367 : vector<8x128xf32>
    %369 = math.tanh %368 : vector<8x128xf32>
    %c1_297 = arith.constant 1 : index
    %c0_298 = arith.constant 0 : index
    %c0_299 = arith.constant 0 : index
    %370 = vector.load %arg14[%c1_297, %c0_298, %c0_299] : memref<8x8x128xf32, #tpu.memory_space<vmem>>, vector<1x8x128xf32>
    %371 = vector.shape_cast %370 : vector<1x8x128xf32> to vector<8x128xf32>
    %372 = vector.shape_cast %369 : vector<8x128xf32> to vector<1x8x128xf32>
    tpu.vector_store %arg14[%c1_297, %c0_298, %c0_299], %372 {strides = array<i32>} : memref<8x8x128xf32, #tpu.memory_space<vmem>>, vector<1x8x128xf32>,
    %c2_300 = arith.constant 2 : index
    %c0_301 = arith.constant 0 : index
    %c0_302 = arith.constant 0 : index
    %373 = vector.load %arg14[%c2_300, %c0_301, %c0_302] : memref<8x8x128xf32, #tpu.memory_space<vmem>>, vector<1x8x128xf32>
    %374 = vector.shape_cast %373 : vector<1x8x128xf32> to vector<8x128xf32>
    %cst_303 = arith.constant dense<0.000000e+00> : vector<8x128xf32>
    %375 = tpu.matmul %369, %355, %cst_303 {dimension_numbers = #tpu.dot_dimension_numbers<[1], [0], [0], [1], [0, 0, 1, 1], [], []>} : vector<8x128xf32>, vector<128x128xf32>, vector<8x128xf32> -> vector<8x128xf32>
    %376 = arith.addf %374, %375 : vector<8x128xf32>
    %377 = math.tanh %376 : vector<8x128xf32>
    %c2_304 = arith.constant 2 : index
    %c0_305 = arith.constant 0 : index
    %c0_306 = arith.constant 0 : index
    %378 = vector.load %arg14[%c2_304, %c0_305, %c0_306] : memref<8x8x128xf32, #tpu.memory_space<vmem>>, vector<1x8x128xf32>
    %379 = vector.shape_cast %378 : vector<1x8x128xf32> to vector<8x128xf32>
    %380 = vector.shape_cast %377 : vector<8x128xf32> to vector<1x8x128xf32>
    tpu.vector_store %arg14[%c2_304, %c0_305, %c0_306], %380 {strides = array<i32>} : memref<8x8x128xf32, #tpu.memory_space<vmem>>, vector<1x8x128xf32>,
    %c3_307 = arith.constant 3 : index
    %c0_308 = arith.constant 0 : index
    %c0_309 = arith.constant 0 : index
    %381 = vector.load %arg14[%c3_307, %c0_308, %c0_309] : memref<8x8x128xf32, #tpu.memory_space<vmem>>, vector<1x8x128xf32>
    %382 = vector.shape_cast %381 : vector<1x8x128xf32> to vector<8x128xf32>
    %cst_310 = arith.constant dense<0.000000e+00> : vector<8x128xf32>
    %383 = tpu.matmul %377, %355, %cst_310 {dimension_numbers = #tpu.dot_dimension_numbers<[1], [0], [0], [1], [0, 0, 1, 1], [], []>} : vector<8x128xf32>, vector<128x128xf32>, vector<8x128xf32> -> vector<8x128xf32>
    %384 = arith.addf %382, %383 : vector<8x128xf32>
    %385 = math.tanh %384 : vector<8x128xf32>
    %c3_311 = arith.constant 3 : index
    %c0_312 = arith.constant 0 : index
    %c0_313 = arith.constant 0 : index
    %386 = vector.load %arg14[%c3_311, %c0_312, %c0_313] : memref<8x8x128xf32, #tpu.memory_space<vmem>>, vector<1x8x128xf32>
    %387 = vector.shape_cast %386 : vector<1x8x128xf32> to vector<8x128xf32>
    %388 = vector.shape_cast %385 : vector<8x128xf32> to vector<1x8x128xf32>
    tpu.vector_store %arg14[%c3_311, %c0_312, %c0_313], %388 {strides = array<i32>} : memref<8x8x128xf32, #tpu.memory_space<vmem>>, vector<1x8x128xf32>,
    %c4_314 = arith.constant 4 : index
    %c0_315 = arith.constant 0 : index
    %c0_316 = arith.constant 0 : index
    %389 = vector.load %arg14[%c4_314, %c0_315, %c0_316] : memref<8x8x128xf32, #tpu.memory_space<vmem>>, vector<1x8x128xf32>
    %390 = vector.shape_cast %389 : vector<1x8x128xf32> to vector<8x128xf32>
    %cst_317 = arith.constant dense<0.000000e+00> : vector<8x128xf32>
    %391 = tpu.matmul %385, %355, %cst_317 {dimension_numbers = #tpu.dot_dimension_numbers<[1], [0], [0], [1], [0, 0, 1, 1], [], []>} : vector<8x128xf32>, vector<128x128xf32>, vector<8x128xf32> -> vector<8x128xf32>
    %392 = arith.addf %390, %391 : vector<8x128xf32>
    %393 = math.tanh %392 : vector<8x128xf32>
    %c4_318 = arith.constant 4 : index
    %c0_319 = arith.constant 0 : index
    %c0_320 = arith.constant 0 : index
    %394 = vector.load %arg14[%c4_318, %c0_319, %c0_320] : memref<8x8x128xf32, #tpu.memory_space<vmem>>, vector<1x8x128xf32>
    %395 = vector.shape_cast %394 : vector<1x8x128xf32> to vector<8x128xf32>
    %396 = vector.shape_cast %393 : vector<8x128xf32> to vector<1x8x128xf32>
    tpu.vector_store %arg14[%c4_318, %c0_319, %c0_320], %396 {strides = array<i32>} : memref<8x8x128xf32, #tpu.memory_space<vmem>>, vector<1x8x128xf32>,
    %c5_321 = arith.constant 5 : index
    %c0_322 = arith.constant 0 : index
    %c0_323 = arith.constant 0 : index
    %397 = vector.load %arg14[%c5_321, %c0_322, %c0_323] : memref<8x8x128xf32, #tpu.memory_space<vmem>>, vector<1x8x128xf32>
    %398 = vector.shape_cast %397 : vector<1x8x128xf32> to vector<8x128xf32>
    %cst_324 = arith.constant dense<0.000000e+00> : vector<8x128xf32>
    %399 = tpu.matmul %393, %355, %cst_324 {dimension_numbers = #tpu.dot_dimension_numbers<[1], [0], [0], [1], [0, 0, 1, 1], [], []>} : vector<8x128xf32>, vector<128x128xf32>, vector<8x128xf32> -> vector<8x128xf32>
    %400 = arith.addf %398, %399 : vector<8x128xf32>
    %401 = math.tanh %400 : vector<8x128xf32>
    %c5_325 = arith.constant 5 : index
    %c0_326 = arith.constant 0 : index
    %c0_327 = arith.constant 0 : index
    %402 = vector.load %arg14[%c5_325, %c0_326, %c0_327] : memref<8x8x128xf32, #tpu.memory_space<vmem>>, vector<1x8x128xf32>
    %403 = vector.shape_cast %402 : vector<1x8x128xf32> to vector<8x128xf32>
    %404 = vector.shape_cast %401 : vector<8x128xf32> to vector<1x8x128xf32>
    tpu.vector_store %arg14[%c5_325, %c0_326, %c0_327], %404 {strides = array<i32>} : memref<8x8x128xf32, #tpu.memory_space<vmem>>, vector<1x8x128xf32>,
    %c6_328 = arith.constant 6 : index
    %c0_329 = arith.constant 0 : index
    %c0_330 = arith.constant 0 : index
    %405 = vector.load %arg14[%c6_328, %c0_329, %c0_330] : memref<8x8x128xf32, #tpu.memory_space<vmem>>, vector<1x8x128xf32>
    %406 = vector.shape_cast %405 : vector<1x8x128xf32> to vector<8x128xf32>
    %cst_331 = arith.constant dense<0.000000e+00> : vector<8x128xf32>
    %407 = tpu.matmul %401, %355, %cst_331 {dimension_numbers = #tpu.dot_dimension_numbers<[1], [0], [0], [1], [0, 0, 1, 1], [], []>} : vector<8x128xf32>, vector<128x128xf32>, vector<8x128xf32> -> vector<8x128xf32>
    %408 = arith.addf %406, %407 : vector<8x128xf32>
    %409 = math.tanh %408 : vector<8x128xf32>
    %c6_332 = arith.constant 6 : index
    %c0_333 = arith.constant 0 : index
    %c0_334 = arith.constant 0 : index
    %410 = vector.load %arg14[%c6_332, %c0_333, %c0_334] : memref<8x8x128xf32, #tpu.memory_space<vmem>>, vector<1x8x128xf32>
    %411 = vector.shape_cast %410 : vector<1x8x128xf32> to vector<8x128xf32>
    %412 = vector.shape_cast %409 : vector<8x128xf32> to vector<1x8x128xf32>
    tpu.vector_store %arg14[%c6_332, %c0_333, %c0_334], %412 {strides = array<i32>} : memref<8x8x128xf32, #tpu.memory_space<vmem>>, vector<1x8x128xf32>,
    %c7_335 = arith.constant 7 : index
    %c0_336 = arith.constant 0 : index
    %c0_337 = arith.constant 0 : index
    %413 = vector.load %arg14[%c7_335, %c0_336, %c0_337] : memref<8x8x128xf32, #tpu.memory_space<vmem>>, vector<1x8x128xf32>
    %414 = vector.shape_cast %413 : vector<1x8x128xf32> to vector<8x128xf32>
    %cst_338 = arith.constant dense<0.000000e+00> : vector<8x128xf32>
    %415 = tpu.matmul %409, %355, %cst_338 {dimension_numbers = #tpu.dot_dimension_numbers<[1], [0], [0], [1], [0, 0, 1, 1], [], []>} : vector<8x128xf32>, vector<128x128xf32>, vector<8x128xf32> -> vector<8x128xf32>
    %416 = arith.addf %414, %415 : vector<8x128xf32>
    %417 = math.tanh %416 : vector<8x128xf32>
    %c7_339 = arith.constant 7 : index
    %c0_340 = arith.constant 0 : index
    %c0_341 = arith.constant 0 : index
    %418 = vector.load %arg14[%c7_339, %c0_340, %c0_341] : memref<8x8x128xf32, #tpu.memory_space<vmem>>, vector<1x8x128xf32>
    %419 = vector.shape_cast %418 : vector<1x8x128xf32> to vector<8x128xf32>
    %420 = vector.shape_cast %417 : vector<8x128xf32> to vector<1x8x128xf32>
    tpu.vector_store %arg14[%c7_339, %c0_340, %c0_341], %420 {strides = array<i32>} : memref<8x8x128xf32, #tpu.memory_space<vmem>>, vector<1x8x128xf32>,
    %c0_342 = arith.constant 0 : index
    %c0_343 = arith.constant 0 : index
    %c0_344 = arith.constant 0 : index
    %421 = vector.load %arg14[%c0_342, %c0_343, %c0_344] : memref<8x8x128xf32, #tpu.memory_space<vmem>>, vector<8x8x128xf32>
    %422 = vector.shape_cast %421 : vector<8x8x128xf32> to vector<64x128xf32>
    %c2_345 = arith.constant 2 : index
    %c0_346 = arith.constant 0 : index
    %c0_347 = arith.constant 0 : index
    %423 = vector.load %arg4[%c2_345, %c0_346, %c0_347] : memref<3x128x128xf32, #tpu.memory_space<vmem>>, vector<1x128x128xf32>
    %424 = vector.shape_cast %423 : vector<1x128x128xf32> to vector<128x128xf32>
    %cst_348 = arith.constant dense<0.000000e+00> : vector<64x128xf32>
    %425 = tpu.matmul %422, %424, %cst_348 {dimension_numbers = #tpu.dot_dimension_numbers<[1], [0], [0], [1], [0, 0, 1, 1], [], []>} : vector<64x128xf32>, vector<128x128xf32>, vector<64x128xf32> -> vector<64x128xf32>
    %c3_349 = arith.constant 3 : index
    %c0_350 = arith.constant 0 : index
    %c0_351 = arith.constant 0 : index
    %426 = vector.load %arg7[%c3_349, %c0_350, %c0_351] : memref<4x1x128xf32, #tpu.memory_space<vmem>>, vector<1x1x128xf32>
    %427 = vector.shape_cast %426 : vector<1x1x128xf32> to vector<1x128xf32>
    %428 = vector.broadcast %427 : vector<1x128xf32> to vector<64x128xf32>
    %429 = arith.addf %425, %428 : vector<64x128xf32>
    %c2_352 = arith.constant 2 : index
    %c0_353 = arith.constant 0 : index
    %c0_354 = arith.constant 0 : index
    %430 = vector.load %arg5[%c2_352, %c0_353, %c0_354] : memref<3x128x128xf32, #tpu.memory_space<vmem>>, vector<1x128x128xf32>
    %431 = vector.shape_cast %430 : vector<1x128x128xf32> to vector<128x128xf32>
    %cst_355 = arith.constant dense<0.000000e+00> : vector<64x128xf32>
    %432 = tpu.matmul %422, %431, %cst_355 {dimension_numbers = #tpu.dot_dimension_numbers<[1], [0], [0], [1], [0, 0, 1, 1], [], []>} : vector<64x128xf32>, vector<128x128xf32>, vector<64x128xf32> -> vector<64x128xf32>
    %433 = vector.extract_strided_slice %429 {offsets = [0, 0], sizes = [8, 128], strides = [1, 1]} : vector<64x128xf32> to vector<8x128xf32>
    %434 = vector.extract_strided_slice %432 {offsets = [56, 0], sizes = [8, 128], strides = [1, 1]} : vector<64x128xf32> to vector<8x128xf32>
    %435 = arith.addf %433, %434 : vector<8x128xf32>
    %c0_356 = arith.constant 0 : index
    %c0_357 = arith.constant 0 : index
    %c0_358 = arith.constant 0 : index
    %436 = vector.load %arg14[%c0_356, %c0_357, %c0_358] : memref<8x8x128xf32, #tpu.memory_space<vmem>>, vector<1x8x128xf32>
    %437 = vector.shape_cast %436 : vector<1x8x128xf32> to vector<8x128xf32>
    %438 = vector.shape_cast %435 : vector<8x128xf32> to vector<1x8x128xf32>
    tpu.vector_store %arg14[%c0_356, %c0_357, %c0_358], %438 {strides = array<i32>} : memref<8x8x128xf32, #tpu.memory_space<vmem>>, vector<1x8x128xf32>,
    %439 = vector.extract_strided_slice %429 {offsets = [8, 0], sizes = [8, 128], strides = [1, 1]} : vector<64x128xf32> to vector<8x128xf32>
    %440 = vector.extract_strided_slice %432 {offsets = [48, 0], sizes = [8, 128], strides = [1, 1]} : vector<64x128xf32> to vector<8x128xf32>
    %441 = arith.addf %439, %440 : vector<8x128xf32>
    %c1_359 = arith.constant 1 : index
    %c0_360 = arith.constant 0 : index
    %c0_361 = arith.constant 0 : index
    %442 = vector.load %arg14[%c1_359, %c0_360, %c0_361] : memref<8x8x128xf32, #tpu.memory_space<vmem>>, vector<1x8x128xf32>
    %443 = vector.shape_cast %442 : vector<1x8x128xf32> to vector<8x128xf32>
    %444 = vector.shape_cast %441 : vector<8x128xf32> to vector<1x8x128xf32>
    tpu.vector_store %arg14[%c1_359, %c0_360, %c0_361], %444 {strides = array<i32>} : memref<8x8x128xf32, #tpu.memory_space<vmem>>, vector<1x8x128xf32>,
    %445 = vector.extract_strided_slice %429 {offsets = [16, 0], sizes = [8, 128], strides = [1, 1]} : vector<64x128xf32> to vector<8x128xf32>
    %446 = vector.extract_strided_slice %432 {offsets = [40, 0], sizes = [8, 128], strides = [1, 1]} : vector<64x128xf32> to vector<8x128xf32>
    %447 = arith.addf %445, %446 : vector<8x128xf32>
    %c2_362 = arith.constant 2 : index
    %c0_363 = arith.constant 0 : index
    %c0_364 = arith.constant 0 : index
    %448 = vector.load %arg14[%c2_362, %c0_363, %c0_364] : memref<8x8x128xf32, #tpu.memory_space<vmem>>, vector<1x8x128xf32>
    %449 = vector.shape_cast %448 : vector<1x8x128xf32> to vector<8x128xf32>
    %450 = vector.shape_cast %447 : vector<8x128xf32> to vector<1x8x128xf32>
    tpu.vector_store %arg14[%c2_362, %c0_363, %c0_364], %450 {strides = array<i32>} : memref<8x8x128xf32, #tpu.memory_space<vmem>>, vector<1x8x128xf32>,
    %451 = vector.extract_strided_slice %429 {offsets = [24, 0], sizes = [8, 128], strides = [1, 1]} : vector<64x128xf32> to vector<8x128xf32>
    %452 = vector.extract_strided_slice %432 {offsets = [32, 0], sizes = [8, 128], strides = [1, 1]} : vector<64x128xf32> to vector<8x128xf32>
    %453 = arith.addf %451, %452 : vector<8x128xf32>
    %c3_365 = arith.constant 3 : index
    %c0_366 = arith.constant 0 : index
    %c0_367 = arith.constant 0 : index
    %454 = vector.load %arg14[%c3_365, %c0_366, %c0_367] : memref<8x8x128xf32, #tpu.memory_space<vmem>>, vector<1x8x128xf32>
    %455 = vector.shape_cast %454 : vector<1x8x128xf32> to vector<8x128xf32>
    %456 = vector.shape_cast %453 : vector<8x128xf32> to vector<1x8x128xf32>
    tpu.vector_store %arg14[%c3_365, %c0_366, %c0_367], %456 {strides = array<i32>} : memref<8x8x128xf32, #tpu.memory_space<vmem>>, vector<1x8x128xf32>,
    %457 = vector.extract_strided_slice %429 {offsets = [32, 0], sizes = [8, 128], strides = [1, 1]} : vector<64x128xf32> to vector<8x128xf32>
    %458 = vector.extract_strided_slice %432 {offsets = [24, 0], sizes = [8, 128], strides = [1, 1]} : vector<64x128xf32> to vector<8x128xf32>
    %459 = arith.addf %457, %458 : vector<8x128xf32>
    %c4_368 = arith.constant 4 : index
    %c0_369 = arith.constant 0 : index
    %c0_370 = arith.constant 0 : index
    %460 = vector.load %arg14[%c4_368, %c0_369, %c0_370] : memref<8x8x128xf32, #tpu.memory_space<vmem>>, vector<1x8x128xf32>
    %461 = vector.shape_cast %460 : vector<1x8x128xf32> to vector<8x128xf32>
    %462 = vector.shape_cast %459 : vector<8x128xf32> to vector<1x8x128xf32>
    tpu.vector_store %arg14[%c4_368, %c0_369, %c0_370], %462 {strides = array<i32>} : memref<8x8x128xf32, #tpu.memory_space<vmem>>, vector<1x8x128xf32>,
    %463 = vector.extract_strided_slice %429 {offsets = [40, 0], sizes = [8, 128], strides = [1, 1]} : vector<64x128xf32> to vector<8x128xf32>
    %464 = vector.extract_strided_slice %432 {offsets = [16, 0], sizes = [8, 128], strides = [1, 1]} : vector<64x128xf32> to vector<8x128xf32>
    %465 = arith.addf %463, %464 : vector<8x128xf32>
    %c5_371 = arith.constant 5 : index
    %c0_372 = arith.constant 0 : index
    %c0_373 = arith.constant 0 : index
    %466 = vector.load %arg14[%c5_371, %c0_372, %c0_373] : memref<8x8x128xf32, #tpu.memory_space<vmem>>, vector<1x8x128xf32>
    %467 = vector.shape_cast %466 : vector<1x8x128xf32> to vector<8x128xf32>
    %468 = vector.shape_cast %465 : vector<8x128xf32> to vector<1x8x128xf32>
    tpu.vector_store %arg14[%c5_371, %c0_372, %c0_373], %468 {strides = array<i32>} : memref<8x8x128xf32, #tpu.memory_space<vmem>>, vector<1x8x128xf32>,
    %469 = vector.extract_strided_slice %429 {offsets = [48, 0], sizes = [8, 128], strides = [1, 1]} : vector<64x128xf32> to vector<8x128xf32>
    %470 = vector.extract_strided_slice %432 {offsets = [8, 0], sizes = [8, 128], strides = [1, 1]} : vector<64x128xf32> to vector<8x128xf32>
    %471 = arith.addf %469, %470 : vector<8x128xf32>
    %c6_374 = arith.constant 6 : index
    %c0_375 = arith.constant 0 : index
    %c0_376 = arith.constant 0 : index
    %472 = vector.load %arg14[%c6_374, %c0_375, %c0_376] : memref<8x8x128xf32, #tpu.memory_space<vmem>>, vector<1x8x128xf32>
    %473 = vector.shape_cast %472 : vector<1x8x128xf32> to vector<8x128xf32>
    %474 = vector.shape_cast %471 : vector<8x128xf32> to vector<1x8x128xf32>
    tpu.vector_store %arg14[%c6_374, %c0_375, %c0_376], %474 {strides = array<i32>} : memref<8x8x128xf32, #tpu.memory_space<vmem>>, vector<1x8x128xf32>,
    %475 = vector.extract_strided_slice %429 {offsets = [56, 0], sizes = [8, 128], strides = [1, 1]} : vector<64x128xf32> to vector<8x128xf32>
    %476 = vector.extract_strided_slice %432 {offsets = [0, 0], sizes = [8, 128], strides = [1, 1]} : vector<64x128xf32> to vector<8x128xf32>
    %477 = arith.addf %475, %476 : vector<8x128xf32>
    %c7_377 = arith.constant 7 : index
    %c0_378 = arith.constant 0 : index
    %c0_379 = arith.constant 0 : index
    %478 = vector.load %arg14[%c7_377, %c0_378, %c0_379] : memref<8x8x128xf32, #tpu.memory_space<vmem>>, vector<1x8x128xf32>
    %479 = vector.shape_cast %478 : vector<1x8x128xf32> to vector<8x128xf32>
    %480 = vector.shape_cast %477 : vector<8x128xf32> to vector<1x8x128xf32>
    tpu.vector_store %arg14[%c7_377, %c0_378, %c0_379], %480 {strides = array<i32>} : memref<8x8x128xf32, #tpu.memory_space<vmem>>, vector<1x8x128xf32>,
    %c3_380 = arith.constant 3 : index
    %c0_381 = arith.constant 0 : index
    %c0_382 = arith.constant 0 : index
    %481 = vector.load %arg6[%c3_380, %c0_381, %c0_382] : memref<4x128x128xf32, #tpu.memory_space<vmem>>, vector<1x128x128xf32>
    %482 = vector.shape_cast %481 : vector<1x128x128xf32> to vector<128x128xf32>
    %cst_383 = arith.constant 0.000000e+00 : f32
    %483 = vector.broadcast %cst_383 : f32 to vector<8x128xf32>
    %c0_384 = arith.constant 0 : index
    %c0_385 = arith.constant 0 : index
    %c0_386 = arith.constant 0 : index
    %484 = vector.load %arg14[%c0_384, %c0_385, %c0_386] : memref<8x8x128xf32, #tpu.memory_space<vmem>>, vector<1x8x128xf32>
    %485 = vector.shape_cast %484 : vector<1x8x128xf32> to vector<8x128xf32>
    %cst_387 = arith.constant dense<0.000000e+00> : vector<8x128xf32>
    %486 = tpu.matmul %483, %482, %cst_387 {dimension_numbers = #tpu.dot_dimension_numbers<[1], [0], [0], [1], [0, 0, 1, 1], [], []>} : vector<8x128xf32>, vector<128x128xf32>, vector<8x128xf32> -> vector<8x128xf32>
    %487 = arith.addf %485, %486 : vector<8x128xf32>
    %488 = math.tanh %487 : vector<8x128xf32>
    %c0_388 = arith.constant 0 : index
    %c0_389 = arith.constant 0 : index
    %c0_390 = arith.constant 0 : index
    %489 = vector.load %arg14[%c0_388, %c0_389, %c0_390] : memref<8x8x128xf32, #tpu.memory_space<vmem>>, vector<1x8x128xf32>
    %490 = vector.shape_cast %489 : vector<1x8x128xf32> to vector<8x128xf32>
    %491 = vector.shape_cast %488 : vector<8x128xf32> to vector<1x8x128xf32>
    tpu.vector_store %arg14[%c0_388, %c0_389, %c0_390], %491 {strides = array<i32>} : memref<8x8x128xf32, #tpu.memory_space<vmem>>, vector<1x8x128xf32>,
    %c1_391 = arith.constant 1 : index
    %c0_392 = arith.constant 0 : index
    %c0_393 = arith.constant 0 : index
    %492 = vector.load %arg14[%c1_391, %c0_392, %c0_393] : memref<8x8x128xf32, #tpu.memory_space<vmem>>, vector<1x8x128xf32>
    %493 = vector.shape_cast %492 : vector<1x8x128xf32> to vector<8x128xf32>
    %cst_394 = arith.constant dense<0.000000e+00> : vector<8x128xf32>
    %494 = tpu.matmul %488, %482, %cst_394 {dimension_numbers = #tpu.dot_dimension_numbers<[1], [0], [0], [1], [0, 0, 1, 1], [], []>} : vector<8x128xf32>, vector<128x128xf32>, vector<8x128xf32> -> vector<8x128xf32>
    %495 = arith.addf %493, %494 : vector<8x128xf32>
    %496 = math.tanh %495 : vector<8x128xf32>
    %c1_395 = arith.constant 1 : index
    %c0_396 = arith.constant 0 : index
    %c0_397 = arith.constant 0 : index
    %497 = vector.load %arg14[%c1_395, %c0_396, %c0_397] : memref<8x8x128xf32, #tpu.memory_space<vmem>>, vector<1x8x128xf32>
    %498 = vector.shape_cast %497 : vector<1x8x128xf32> to vector<8x128xf32>
    %499 = vector.shape_cast %496 : vector<8x128xf32> to vector<1x8x128xf32>
    tpu.vector_store %arg14[%c1_395, %c0_396, %c0_397], %499 {strides = array<i32>} : memref<8x8x128xf32, #tpu.memory_space<vmem>>, vector<1x8x128xf32>,
    %c2_398 = arith.constant 2 : index
    %c0_399 = arith.constant 0 : index
    %c0_400 = arith.constant 0 : index
    %500 = vector.load %arg14[%c2_398, %c0_399, %c0_400] : memref<8x8x128xf32, #tpu.memory_space<vmem>>, vector<1x8x128xf32>
    %501 = vector.shape_cast %500 : vector<1x8x128xf32> to vector<8x128xf32>
    %cst_401 = arith.constant dense<0.000000e+00> : vector<8x128xf32>
    %502 = tpu.matmul %496, %482, %cst_401 {dimension_numbers = #tpu.dot_dimension_numbers<[1], [0], [0], [1], [0, 0, 1, 1], [], []>} : vector<8x128xf32>, vector<128x128xf32>, vector<8x128xf32> -> vector<8x128xf32>
    %503 = arith.addf %501, %502 : vector<8x128xf32>
    %504 = math.tanh %503 : vector<8x128xf32>
    %c2_402 = arith.constant 2 : index
    %c0_403 = arith.constant 0 : index
    %c0_404 = arith.constant 0 : index
    %505 = vector.load %arg14[%c2_402, %c0_403, %c0_404] : memref<8x8x128xf32, #tpu.memory_space<vmem>>, vector<1x8x128xf32>
    %506 = vector.shape_cast %505 : vector<1x8x128xf32> to vector<8x128xf32>
    %507 = vector.shape_cast %504 : vector<8x128xf32> to vector<1x8x128xf32>
    tpu.vector_store %arg14[%c2_402, %c0_403, %c0_404], %507 {strides = array<i32>} : memref<8x8x128xf32, #tpu.memory_space<vmem>>, vector<1x8x128xf32>,
    %c3_405 = arith.constant 3 : index
    %c0_406 = arith.constant 0 : index
    %c0_407 = arith.constant 0 : index
    %508 = vector.load %arg14[%c3_405, %c0_406, %c0_407] : memref<8x8x128xf32, #tpu.memory_space<vmem>>, vector<1x8x128xf32>
    %509 = vector.shape_cast %508 : vector<1x8x128xf32> to vector<8x128xf32>
    %cst_408 = arith.constant dense<0.000000e+00> : vector<8x128xf32>
    %510 = tpu.matmul %504, %482, %cst_408 {dimension_numbers = #tpu.dot_dimension_numbers<[1], [0], [0], [1], [0, 0, 1, 1], [], []>} : vector<8x128xf32>, vector<128x128xf32>, vector<8x128xf32> -> vector<8x128xf32>
    %511 = arith.addf %509, %510 : vector<8x128xf32>
    %512 = math.tanh %511 : vector<8x128xf32>
    %c3_409 = arith.constant 3 : index
    %c0_410 = arith.constant 0 : index
    %c0_411 = arith.constant 0 : index
    %513 = vector.load %arg14[%c3_409, %c0_410, %c0_411] : memref<8x8x128xf32, #tpu.memory_space<vmem>>, vector<1x8x128xf32>
    %514 = vector.shape_cast %513 : vector<1x8x128xf32> to vector<8x128xf32>
    %515 = vector.shape_cast %512 : vector<8x128xf32> to vector<1x8x128xf32>
    tpu.vector_store %arg14[%c3_409, %c0_410, %c0_411], %515 {strides = array<i32>} : memref<8x8x128xf32, #tpu.memory_space<vmem>>, vector<1x8x128xf32>,
    %c4_412 = arith.constant 4 : index
    %c0_413 = arith.constant 0 : index
    %c0_414 = arith.constant 0 : index
    %516 = vector.load %arg14[%c4_412, %c0_413, %c0_414] : memref<8x8x128xf32, #tpu.memory_space<vmem>>, vector<1x8x128xf32>
    %517 = vector.shape_cast %516 : vector<1x8x128xf32> to vector<8x128xf32>
    %cst_415 = arith.constant dense<0.000000e+00> : vector<8x128xf32>
    %518 = tpu.matmul %512, %482, %cst_415 {dimension_numbers = #tpu.dot_dimension_numbers<[1], [0], [0], [1], [0, 0, 1, 1], [], []>} : vector<8x128xf32>, vector<128x128xf32>, vector<8x128xf32> -> vector<8x128xf32>
    %519 = arith.addf %517, %518 : vector<8x128xf32>
    %520 = math.tanh %519 : vector<8x128xf32>
    %c4_416 = arith.constant 4 : index
    %c0_417 = arith.constant 0 : index
    %c0_418 = arith.constant 0 : index
    %521 = vector.load %arg14[%c4_416, %c0_417, %c0_418] : memref<8x8x128xf32, #tpu.memory_space<vmem>>, vector<1x8x128xf32>
    %522 = vector.shape_cast %521 : vector<1x8x128xf32> to vector<8x128xf32>
    %523 = vector.shape_cast %520 : vector<8x128xf32> to vector<1x8x128xf32>
    tpu.vector_store %arg14[%c4_416, %c0_417, %c0_418], %523 {strides = array<i32>} : memref<8x8x128xf32, #tpu.memory_space<vmem>>, vector<1x8x128xf32>,
    %c5_419 = arith.constant 5 : index
    %c0_420 = arith.constant 0 : index
    %c0_421 = arith.constant 0 : index
    %524 = vector.load %arg14[%c5_419, %c0_420, %c0_421] : memref<8x8x128xf32, #tpu.memory_space<vmem>>, vector<1x8x128xf32>
    %525 = vector.shape_cast %524 : vector<1x8x128xf32> to vector<8x128xf32>
    %cst_422 = arith.constant dense<0.000000e+00> : vector<8x128xf32>
    %526 = tpu.matmul %520, %482, %cst_422 {dimension_numbers = #tpu.dot_dimension_numbers<[1], [0], [0], [1], [0, 0, 1, 1], [], []>} : vector<8x128xf32>, vector<128x128xf32>, vector<8x128xf32> -> vector<8x128xf32>
    %527 = arith.addf %525, %526 : vector<8x128xf32>
    %528 = math.tanh %527 : vector<8x128xf32>
    %c5_423 = arith.constant 5 : index
    %c0_424 = arith.constant 0 : index
    %c0_425 = arith.constant 0 : index
    %529 = vector.load %arg14[%c5_423, %c0_424, %c0_425] : memref<8x8x128xf32, #tpu.memory_space<vmem>>, vector<1x8x128xf32>
    %530 = vector.shape_cast %529 : vector<1x8x128xf32> to vector<8x128xf32>
    %531 = vector.shape_cast %528 : vector<8x128xf32> to vector<1x8x128xf32>
    tpu.vector_store %arg14[%c5_423, %c0_424, %c0_425], %531 {strides = array<i32>} : memref<8x8x128xf32, #tpu.memory_space<vmem>>, vector<1x8x128xf32>,
    %c6_426 = arith.constant 6 : index
    %c0_427 = arith.constant 0 : index
    %c0_428 = arith.constant 0 : index
    %532 = vector.load %arg14[%c6_426, %c0_427, %c0_428] : memref<8x8x128xf32, #tpu.memory_space<vmem>>, vector<1x8x128xf32>
    %533 = vector.shape_cast %532 : vector<1x8x128xf32> to vector<8x128xf32>
    %cst_429 = arith.constant dense<0.000000e+00> : vector<8x128xf32>
    %534 = tpu.matmul %528, %482, %cst_429 {dimension_numbers = #tpu.dot_dimension_numbers<[1], [0], [0], [1], [0, 0, 1, 1], [], []>} : vector<8x128xf32>, vector<128x128xf32>, vector<8x128xf32> -> vector<8x128xf32>
    %535 = arith.addf %533, %534 : vector<8x128xf32>
    %536 = math.tanh %535 : vector<8x128xf32>
    %c6_430 = arith.constant 6 : index
    %c0_431 = arith.constant 0 : index
    %c0_432 = arith.constant 0 : index
    %537 = vector.load %arg14[%c6_430, %c0_431, %c0_432] : memref<8x8x128xf32, #tpu.memory_space<vmem>>, vector<1x8x128xf32>
    %538 = vector.shape_cast %537 : vector<1x8x128xf32> to vector<8x128xf32>
    %539 = vector.shape_cast %536 : vector<8x128xf32> to vector<1x8x128xf32>
    tpu.vector_store %arg14[%c6_430, %c0_431, %c0_432], %539 {strides = array<i32>} : memref<8x8x128xf32, #tpu.memory_space<vmem>>, vector<1x8x128xf32>,
    %c7_433 = arith.constant 7 : index
    %c0_434 = arith.constant 0 : index
    %c0_435 = arith.constant 0 : index
    %540 = vector.load %arg14[%c7_433, %c0_434, %c0_435] : memref<8x8x128xf32, #tpu.memory_space<vmem>>, vector<1x8x128xf32>
    %541 = vector.shape_cast %540 : vector<1x8x128xf32> to vector<8x128xf32>
    %cst_436 = arith.constant dense<0.000000e+00> : vector<8x128xf32>
    %542 = tpu.matmul %536, %482, %cst_436 {dimension_numbers = #tpu.dot_dimension_numbers<[1], [0], [0], [1], [0, 0, 1, 1], [], []>} : vector<8x128xf32>, vector<128x128xf32>, vector<8x128xf32> -> vector<8x128xf32>
    %543 = arith.addf %541, %542 : vector<8x128xf32>
    %544 = math.tanh %543 : vector<8x128xf32>
    %c7_437 = arith.constant 7 : index
    %c0_438 = arith.constant 0 : index
    %c0_439 = arith.constant 0 : index
    %545 = vector.load %arg14[%c7_437, %c0_438, %c0_439] : memref<8x8x128xf32, #tpu.memory_space<vmem>>, vector<1x8x128xf32>
    %546 = vector.shape_cast %545 : vector<1x8x128xf32> to vector<8x128xf32>
    %547 = vector.shape_cast %544 : vector<8x128xf32> to vector<1x8x128xf32>
    tpu.vector_store %arg14[%c7_437, %c0_438, %c0_439], %547 {strides = array<i32>} : memref<8x8x128xf32, #tpu.memory_space<vmem>>, vector<1x8x128xf32>,
    %c7_440 = arith.constant 7 : index
    %c0_441 = arith.constant 0 : index
    %c0_442 = arith.constant 0 : index
    %548 = vector.load %arg14[%c7_440, %c0_441, %c0_442] : memref<8x8x128xf32, #tpu.memory_space<vmem>>, vector<1x8x128xf32>
    %549 = vector.shape_cast %548 : vector<1x8x128xf32> to vector<8x128xf32>
    %c0_443 = arith.constant 0 : index
    %c0_444 = arith.constant 0 : index
    %550 = vector.load %arg8[%c0_443, %c0_444] : memref<128x128xf32, #tpu.memory_space<vmem>>, vector<128x128xf32>
    %cst_445 = arith.constant dense<0.000000e+00> : vector<8x128xf32>
    %551 = tpu.matmul %549, %550, %cst_445 {dimension_numbers = #tpu.dot_dimension_numbers<[1], [0], [0], [1], [0, 0, 1, 1], [], []>} : vector<8x128xf32>, vector<128x128xf32>, vector<8x128xf32> -> vector<8x128xf32>
    %c0_446 = arith.constant 0 : index
    %c0_447 = arith.constant 0 : index
    %c0_448 = arith.constant 0 : index
    %552 = vector.load %arg14[%c0_446, %c0_447, %c0_448] : memref<8x8x128xf32, #tpu.memory_space<vmem>>, vector<1x8x128xf32>
    %553 = vector.shape_cast %552 : vector<1x8x128xf32> to vector<8x128xf32>
    %c0_449 = arith.constant 0 : index
    %c0_450 = arith.constant 0 : index
    %554 = vector.load %arg9[%c0_449, %c0_450] : memref<128x128xf32, #tpu.memory_space<vmem>>, vector<128x128xf32>
    %cst_451 = arith.constant dense<0.000000e+00> : vector<8x128xf32>
    %555 = tpu.matmul %553, %554, %cst_451 {dimension_numbers = #tpu.dot_dimension_numbers<[1], [0], [0], [1], [0, 0, 1, 1], [], []>} : vector<8x128xf32>, vector<128x128xf32>, vector<8x128xf32> -> vector<8x128xf32>
    %556 = arith.addf %551, %555 : vector<8x128xf32>
    %c0_452 = arith.constant 0 : index
    %c0_453 = arith.constant 0 : index
    %557 = vector.load %arg10[%c0_452, %c0_453] : memref<1x128xf32, #tpu.memory_space<vmem>>, vector<1x128xf32>
    %558 = vector.broadcast %557 : vector<1x128xf32> to vector<8x128xf32>
    %559 = arith.addf %556, %558 : vector<8x128xf32>
    %cst_454 = arith.constant 0.000000e+00 : f32
    %560 = vector.broadcast %cst_454 : f32 to vector<8x128xf32>
    %561 = arith.maximumf %559, %560 : vector<8x128xf32>
    %c0_455 = arith.constant 0 : index
    %c0_456 = arith.constant 0 : index
    %562 = vector.load %arg11[%c0_455, %c0_456] : memref<128x128xf32, #tpu.memory_space<vmem>>, vector<128x128xf32>
    %cst_457 = arith.constant dense<0.000000e+00> : vector<8x128xf32>
    %563 = tpu.matmul %561, %562, %cst_457 {dimension_numbers = #tpu.dot_dimension_numbers<[1], [0], [0], [1], [0, 0, 1, 1], [], []>} : vector<8x128xf32>, vector<128x128xf32>, vector<8x128xf32> -> vector<8x128xf32>
    %c0_458 = arith.constant 0 : index
    %c0_459 = arith.constant 0 : index
    %564 = vector.load %arg12[%c0_458, %c0_459] : memref<1x128xf32, #tpu.memory_space<vmem>>, vector<1x128xf32>
    %565 = vector.broadcast %564 : vector<1x128xf32> to vector<8x128xf32>
    %566 = arith.addf %563, %565 : vector<8x128xf32>
    %c0_460 = arith.constant 0 : index
    %c0_461 = arith.constant 0 : index
    %567 = vector.load %arg13[%c0_460, %c0_461] : memref<8x128xf32, #tpu.memory_space<vmem>>, vector<8x128xf32>
    tpu.vector_store %arg13[%c0_460, %c0_461], %566 {strides = array<i32>} : memref<8x128xf32, #tpu.memory_space<vmem>>, vector<8x128xf32>,
    return
  }
  func.func @transform_0(%arg0: i32) -> (i32, i32, i32) {
    %c0_i32 = arith.constant 0 : i32
    %c0_i32_0 = arith.constant 0 : i32
    %c0_i32_1 = arith.constant 0 : i32
    return %c0_i32, %arg0, %c0_i32_0 : i32, i32, i32
  }
  func.func @transform_1(%arg0: i32) -> (i32, i32) {
    %c0_i32 = arith.constant 0 : i32
    %c0_i32_0 = arith.constant 0 : i32
    %c0_i32_1 = arith.constant 0 : i32
    return %c0_i32, %c0_i32_0 : i32, i32
  }
  func.func @transform_2(%arg0: i32) -> (i32, i32) {
    %c0_i32 = arith.constant 0 : i32
    %c0_i32_0 = arith.constant 0 : i32
    %c0_i32_1 = arith.constant 0 : i32
    return %c0_i32, %c0_i32_0 : i32, i32
  }
  func.func @transform_3(%arg0: i32) -> (i32, i32, i32) {
    %c0_i32 = arith.constant 0 : i32
    %c0_i32_0 = arith.constant 0 : i32
    %c0_i32_1 = arith.constant 0 : i32
    %c0_i32_2 = arith.constant 0 : i32
    return %c0_i32, %c0_i32_0, %c0_i32_1 : i32, i32, i32
  }
  func.func @transform_4(%arg0: i32) -> (i32, i32, i32) {
    %c0_i32 = arith.constant 0 : i32
    %c0_i32_0 = arith.constant 0 : i32
    %c0_i32_1 = arith.constant 0 : i32
    %c0_i32_2 = arith.constant 0 : i32
    return %c0_i32, %c0_i32_0, %c0_i32_1 : i32, i32, i32
  }
  func.func @transform_5(%arg0: i32) -> (i32, i32, i32) {
    %c0_i32 = arith.constant 0 : i32
    %c0_i32_0 = arith.constant 0 : i32
    %c0_i32_1 = arith.constant 0 : i32
    %c0_i32_2 = arith.constant 0 : i32
    return %c0_i32, %c0_i32_0, %c0_i32_1 : i32, i32, i32
  }
  func.func @transform_6(%arg0: i32) -> (i32, i32, i32) {
    %c0_i32 = arith.constant 0 : i32
    %c0_i32_0 = arith.constant 0 : i32
    %c0_i32_1 = arith.constant 0 : i32
    %c0_i32_2 = arith.constant 0 : i32
    return %c0_i32, %c0_i32_0, %c0_i32_1 : i32, i32, i32
  }
  func.func @transform_7(%arg0: i32) -> (i32, i32) {
    %c0_i32 = arith.constant 0 : i32
    %c0_i32_0 = arith.constant 0 : i32
    %c0_i32_1 = arith.constant 0 : i32
    return %c0_i32, %c0_i32_0 : i32, i32
  }
  func.func @transform_8(%arg0: i32) -> (i32, i32) {
    %c0_i32 = arith.constant 0 : i32
    %c0_i32_0 = arith.constant 0 : i32
    %c0_i32_1 = arith.constant 0 : i32
    return %c0_i32, %c0_i32_0 : i32, i32
  }
  func.func @transform_9(%arg0: i32) -> (i32, i32) {
    %c0_i32 = arith.constant 0 : i32
    %c0_i32_0 = arith.constant 0 : i32
    %c0_i32_1 = arith.constant 0 : i32
    return %c0_i32, %c0_i32_0 : i32, i32
  }
  func.func @transform_10(%arg0: i32) -> (i32, i32) {
    %c0_i32 = arith.constant 0 : i32
    %c0_i32_0 = arith.constant 0 : i32
    %c0_i32_1 = arith.constant 0 : i32
    return %c0_i32, %c0_i32_0 : i32, i32
  }
  func.func @transform_11(%arg0: i32) -> (i32, i32) {
    %c0_i32 = arith.constant 0 : i32
    %c0_i32_0 = arith.constant 0 : i32
    %c0_i32_1 = arith.constant 0 : i32
    return %c0_i32, %c0_i32_0 : i32, i32
  }
  func.func @transform_12(%arg0: i32) -> (i32, i32) {
    %c0_i32 = arith.constant 0 : i32
    %c0_i32_0 = arith.constant 0 : i32
    return %arg0, %c0_i32 : i32, i32
  }
}

</mosaic_0001>

<bundles_post_ra>
// kernel: tpu_custom_call.1
= control target key start
LH: loop header
LB: loop body
LE: loop exit
PB: predicated region body
PF: predicated region fallthrough
CT: control target
= control target key end

     0   :  { %17 = vsyncpa [#allocation4], 0  ;;  %s9915_s0 = inlined_call_operand.hbm [shape: f32[8,8,8], index: 0, kind: input, shape index: {}]   ;;  %s9916_s1 = inlined_call_operand.hbm [shape: f32[8,128], index: 1, kind: input, shape index: {}]   ;;  %s9917_s2 = inlined_call_operand.hbm [shape: f32[8,128], index: 2, kind: input, shape index: {}]   ;;  %s9918_s3 = inlined_call_operand.hbm [shape: f32[3,128,128], index: 3, kind: input, shape index: {}]   ;;  %s9919_s4 = inlined_call_operand.hbm [shape: f32[3,128,128], index: 4, kind: input, shape index: {}]   ;;  %s9920_s5 = inlined_call_operand.hbm [shape: f32[4,128,128], index: 5, kind: input, shape index: {}]   ;;  %s9921_s6 = inlined_call_operand.vmem [shape: f32[4,1,128], index: 6, kind: input, shape index: {}]   ;;  %s9922_s7 = inlined_call_operand.hbm [shape: f32[128,128], index: 7, kind: input, shape index: {}]   ;;  %s9923_s8 = inlined_call_operand.hbm [shape: f32[128,128], index: 8, kind: input, shape index: {}]   ;;  %s9924_s9 = inlined_call_operand.vmem [shape: f32[1,128], index: 9, kind: input, shape index: {}]   ;;  %s9925_s10 = inlined_call_operand.hbm [shape: f32[128,128], index: 10, kind: input, shape index: {}]   ;;  %s9926_s11 = inlined_call_operand.vmem [shape: f32[1,128], index: 11, kind: input, shape index: {}]   ;;  %s9927_s12 = inlined_call_operand.hbm [shape: f32[8,128], index: 12, kind: output, shape index: {}]  }
   0x1   :  { %18 = vsyncpa [#allocation7], 0 }
   0x2   :  { %19 = vsyncpa [#allocation10], 0 }
   0x3   :  { %20 = vsyncpa [#allocation13], 0 }
   0x4   :  { %21 = vsyncpa [#allocation16], 0 }
   0x5   :  { %22 = vsyncpa [#allocation5], 0  ;;  %s8687_s21 = smov [#allocation6]   ;;  %s8455_s25 = scalar_lea.hbm %s9916_s1, 128 }
   0x6   :  { %s41_s22 = sshll.u32 %s8687_s21, 4  ;;  %p8456_p0 = scmp.ne.s32.totalorder %s9916_s1, %s8455_s25  ;;  %s42_s22 = int_to_ptr.vmem [resolvable:$true] %s41_s22 }
   0x7   :  { %p8459_p1 = scmp.lt.u32.totalorder %s8455_s25, %s9916_s1 }
   0x9   :  { %p8461_p2 = pnand %p8459_p1, %p8456_p0 }
   0xb   :  { %8464 = shalt.err (!%p8461_p2)
}
   0xc   :  { %s8465_s30 = scalar_lea.vmem %s42_s22, 128  ;;  %p8470_p4 = scmp.lt.s32.totalorder %s42_s22, %s42_s22 }
   0xd   :  { %p8466_p3 = scmp.ne.s32.totalorder %s42_s22, %s8465_s30  ;;  %p8471_p5 = scmp.lt.s32.totalorder %s8465_s30, %s8465_s30 }
   0xf   :  { %p8472_p6 = por %p8471_p5, %p8470_p4 }
  0x11   :  { %p8473_p7 = pnand %p8472_p6, %p8466_p3 }
  0x13   :  { %8476 = shalt.err (!%p8473_p7)
}
  0x14   :  { %44 = dma.hbm_to_vmem [thread:$0]  %s9916_s1, 128, %s42_s22, [#allocation7]  }
  0x15   :  { %s8688_s15 = smov [#allocation9]   ;;  %s8689_s17 = smov [#allocation12]  }
  0x16   :  { %s60_s16 = sshll.u32 %s8688_s15, 4  ;;  %s84_s18 = sshll.u32 %s8689_s17, 4  ;;  %s61_s16 = int_to_ptr.vmem [resolvable:$true] %s60_s16  ;;  %s85_s18 = int_to_ptr.vmem [resolvable:$true] %s84_s18 }
  0x17   :  { %s8477_s21 = scalar_lea.hbm %s9918_s3, 6144 }
  0x18   :  { %p8478_p8 = scmp.ne.s32.totalorder %s9918_s3, %s8477_s21  ;;  %p8481_p9 = scmp.lt.u32.totalorder %s8477_s21, %s9918_s3 }
  0x1a   :  { %p8483_p10 = pnand %p8481_p9, %p8478_p8 }
  0x1c   :  { %8486 = shalt.err (!%p8483_p10)
}
  0x1d   :  { %s8487_s1 = scalar_lea.vmem %s61_s16, 6144  ;;  %p8492_p12 = scmp.lt.s32.totalorder %s61_s16, %s61_s16 }
  0x1e   :  { %p8488_p11 = scmp.ne.s32.totalorder %s61_s16, %s8487_s1  ;;  %p8493_p13 = scmp.lt.s32.totalorder %s8487_s1, %s8487_s1 }
  0x20   :  { %p8494_p0 = por %p8493_p13, %p8492_p12 }
  0x22   :  { %p8495_p1 = pnand %p8494_p0, %p8488_p11 }
  0x24   :  { %8498 = shalt.err (!%p8495_p1)
}
  0x25   :  { %s8690_s22 = smov 128   ;;  %s8691_s27 = smov 8  }
  0x26   :  { %66 = dma.hbm_to_vmem [thread:$0]  %s9918_s3, 6144, %s61_s16, [#allocation10], %s8690_s22, %s8690_s22, %s8691_s27  }
  0x27   :  { %s8499_s14 = scalar_lea.hbm %s9920_s5, 8192 }
  0x28   :  { %p8500_p2 = scmp.ne.s32.totalorder %s9920_s5, %s8499_s14  ;;  %p8503_p3 = scmp.lt.u32.totalorder %s8499_s14, %s9920_s5 }
  0x2a   :  { %p8505_p4 = pnand %p8503_p3, %p8500_p2 }
  0x2c   :  { %8508 = shalt.err (!%p8505_p4)
}
  0x2d   :  { %s8509_s21 = scalar_lea.vmem %s85_s18, 8192  ;;  %p8514_p6 = scmp.lt.s32.totalorder %s85_s18, %s85_s18 }
  0x2e   :  { %p8510_p5 = scmp.ne.s32.totalorder %s85_s18, %s8509_s21  ;;  %p8515_p7 = scmp.lt.s32.totalorder %s8509_s21, %s8509_s21 }
  0x30   :  { %p8516_p8 = por %p8515_p7, %p8514_p6 }
  0x32   :  { %p8517_p9 = pnand %p8516_p8, %p8510_p5 }
  0x34   :  { %8520 = shalt.err (!%p8517_p9)
}
  0x35   :  { %90 = dma.hbm_to_vmem [thread:$0]  %s9920_s5, 8192, %s85_s18, [#allocation13], %s8690_s22, %s8690_s22, %s8691_s27  }
  0x36   :  { %s8692_s23 = smov [#allocation15]   ;;  %s8693_s25 = smov [#allocation3]  }
  0x37   :  { %s110_s24 = sshll.u32 %s8692_s23, 4  ;;  %s28_s26 = sshll.u32 %s8693_s25, 4  ;;  %s111_s24 = int_to_ptr.vmem [resolvable:$true] %s110_s24  ;;  %s29_s26 = int_to_ptr.vmem [resolvable:$true] %s28_s26 }
  0x38   :  { %s8521_s29 = scalar_lea.hbm %s9923_s8, 2048 }
  0x39   :  { %p8522_p10 = scmp.ne.s32.totalorder %s9923_s8, %s8521_s29  ;;  %p8525_p11 = scmp.lt.u32.totalorder %s8521_s29, %s9923_s8 }
  0x3b   :  { %p8527_p12 = pnand %p8525_p11, %p8522_p10 }
  0x3d   :  { %8530 = shalt.err (!%p8527_p12)
}
  0x3e   :  { %s8531_s5 = scalar_lea.vmem %s111_s24, 2048  ;;  %p8536_p0 = scmp.lt.s32.totalorder %s111_s24, %s111_s24 }
  0x3f   :  { %p8532_p13 = scmp.ne.s32.totalorder %s111_s24, %s8531_s5  ;;  %p8537_p1 = scmp.lt.s32.totalorder %s8531_s5, %s8531_s5 }
  0x41   :  { %p8538_p2 = por %p8537_p1, %p8536_p0 }
  0x43   :  { %p8539_p3 = pnand %p8538_p2, %p8532_p13 }
  0x45   :  { %8542 = shalt.err (!%p8539_p3)
}
  0x46   :  { %116 = dma.hbm_to_vmem [thread:$0]  %s9923_s8, 2048, %s111_s24, [#allocation16], %s8690_s22, %s8690_s22, %s8691_s27  }
  0x47   :  { %s8543_s21 = scalar_lea.hbm %s9915_s0, 1024 }
  0x48   :  { %p8544_p4 = scmp.ne.s32.totalorder %s9915_s0, %s8543_s21  ;;  %p8547_p5 = scmp.lt.u32.totalorder %s8543_s21, %s9915_s0 }
  0x4a   :  { %p8549_p6 = pnand %p8547_p5, %p8544_p4 }
  0x4c   :  { %8552 = shalt.err (!%p8549_p6)
}
  0x4d   :  { %s8553_s1 = scalar_lea.vmem %s29_s26, 1024  ;;  %p8558_p8 = scmp.lt.s32.totalorder %s29_s26, %s29_s26 }
  0x4e   :  { %p8554_p7 = scmp.ne.s32.totalorder %s29_s26, %s8553_s1  ;;  %p8559_p9 = scmp.lt.s32.totalorder %s8553_s1, %s8553_s1 }
  0x50   :  { %p8560_p10 = por %p8559_p9, %p8558_p8 }
  0x52   :  { %p8561_p11 = pnand %p8560_p10, %p8554_p7 }
  0x54   :  { %8564 = shalt.err (!%p8561_p11)
}
  0x55   :  { %34 = dma.hbm_to_vmem [thread:$0]  %s9915_s0, 1024, %s29_s26, [#allocation4], %s8690_s22, %s8690_s22, %s8691_s27  }
  0x56   :  { %s8694_s28 = smov [#allocation8]   ;;  %s8695_s30 = smov [#allocation11]  }
  0x57   :  { %s51_s29 = sshll.u32 %s8694_s28, 4  ;;  %s72_s13 = sshll.u32 %s8695_s30, 4  ;;  %s52_s29 = int_to_ptr.vmem [resolvable:$true] %s51_s29  ;;  %s73_s13 = int_to_ptr.vmem [resolvable:$true] %s72_s13 }
  0x58   :  { %s8565_s5 = scalar_lea.hbm %s9917_s2, 128 }
  0x59   :  { %p8566_p12 = scmp.ne.s32.totalorder %s9917_s2, %s8565_s5  ;;  %p8569_p13 = scmp.lt.u32.totalorder %s8565_s5, %s9917_s2 }
  0x5b   :  { %p8571_p0 = pnand %p8569_p13, %p8566_p12 }
  0x5d   :  { %8574 = shalt.err (!%p8571_p0)
}
  0x5e   :  { %s8575_s0 = scalar_lea.vmem %s52_s29, 128  ;;  %p8580_p2 = scmp.lt.s32.totalorder %s52_s29, %s52_s29 }
  0x5f   :  { %p8576_p1 = scmp.ne.s32.totalorder %s52_s29, %s8575_s0  ;;  %p8581_p3 = scmp.lt.s32.totalorder %s8575_s0, %s8575_s0 }
  0x61   :  { %p8582_p4 = por %p8581_p3, %p8580_p2 }
  0x63   :  { %p8583_p5 = pnand %p8582_p4, %p8576_p1 }
  0x65   :  { %8586 = shalt.err (!%p8583_p5)
}
  0x66   :  { %54 = dma.hbm_to_vmem [thread:$0]  %s9917_s2, 128, %s52_s29, [#allocation7]  }
  0x67   :  { %s8587_s23 = scalar_lea.hbm %s9919_s4, 6144 }
  0x68   :  { %p8588_p6 = scmp.ne.s32.totalorder %s9919_s4, %s8587_s23  ;;  %p8591_p7 = scmp.lt.u32.totalorder %s8587_s23, %s9919_s4 }
  0x6a   :  { %p8593_p8 = pnand %p8591_p7, %p8588_p6 }
  0x6c   :  { %8596 = shalt.err (!%p8593_p8)
}
  0x6d   :  { %s8597_s28 = scalar_lea.vmem %s73_s13, 6144  ;;  %p8602_p10 = scmp.lt.s32.totalorder %s73_s13, %s73_s13 }
  0x6e   :  { %p8598_p9 = scmp.ne.s32.totalorder %s73_s13, %s8597_s28  ;;  %p8603_p11 = scmp.lt.s32.totalorder %s8597_s28, %s8597_s28 }
  0x70   :  { %p8604_p12 = por %p8603_p11, %p8602_p10 }
  0x72   :  { %p8605_p13 = pnand %p8604_p12, %p8598_p9 }
  0x74   :  { %8608 = shalt.err (!%p8605_p13)
}
  0x75   :  { %78 = dma.hbm_to_vmem [thread:$0]  %s9919_s4, 6144, %s73_s13, [#allocation10], %s8690_s22, %s8690_s22, %s8691_s27  }
  0x76   :  { %s8696_s30 = smov [#allocation14]   ;;  %s8697_s15 = smov [#allocation17]  }
  0x77   :  { %s98_s14 = sshll.u32 %s8696_s30, 4  ;;  %s124_s5 = sshll.u32 %s8697_s15, 4  ;;  %s99_s14 = int_to_ptr.vmem [resolvable:$true] %s98_s14  ;;  %s125_s5 = int_to_ptr.vmem [resolvable:$true] %s124_s5 }
  0x78   :  { %s8609_s19 = scalar_lea.hbm %s9922_s7, 2048 }
  0x79   :  { %p8610_p0 = scmp.ne.s32.totalorder %s9922_s7, %s8609_s19  ;;  %p8613_p1 = scmp.lt.u32.totalorder %s8609_s19, %s9922_s7 }
  0x7b   :  { %p8615_p2 = pnand %p8613_p1, %p8610_p0 }
  0x7d   :  { %8618 = shalt.err (!%p8615_p2)
}
  0x7e   :  { %s8619_s4 = scalar_lea.vmem %s99_s14, 2048  ;;  %p8624_p4 = scmp.lt.s32.totalorder %s99_s14, %s99_s14 }
  0x7f   :  { %p8620_p3 = scmp.ne.s32.totalorder %s99_s14, %s8619_s4  ;;  %p8625_p5 = scmp.lt.s32.totalorder %s8619_s4, %s8619_s4 }
  0x81   :  { %p8626_p6 = por %p8625_p5, %p8624_p4 }
  0x83   :  { %p8627_p7 = pnand %p8626_p6, %p8620_p3 }
  0x85   :  { %8630 = shalt.err (!%p8627_p7)
}
  0x86   :  { %104 = dma.hbm_to_vmem [thread:$0]  %s9922_s7, 2048, %s99_s14, [#allocation13], %s8690_s22, %s8690_s22, %s8691_s27  }
  0x87   :  { %s8631_s25 = scalar_lea.hbm %s9925_s10, 2048 }
  0x88   :  { %p8632_p8 = scmp.ne.s32.totalorder %s9925_s10, %s8631_s25  ;;  %p8635_p9 = scmp.lt.u32.totalorder %s8631_s25, %s9925_s10 }
  0x8a   :  { %p8637_p10 = pnand %p8635_p9, %p8632_p8 }
  0x8c   :  { %8640 = shalt.err (!%p8637_p10)
}
  0x8d   :  { %s8641_s2 = scalar_lea.vmem %s125_s5, 2048  ;;  %p8646_p12 = scmp.lt.s32.totalorder %s125_s5, %s125_s5 }
  0x8e   :  { %p8642_p11 = scmp.ne.s32.totalorder %s125_s5, %s8641_s2  ;;  %p8647_p13 = scmp.lt.s32.totalorder %s8641_s2, %s8641_s2 }
  0x90   :  { %p8648_p0 = por %p8647_p13, %p8646_p12 }
  0x92   :  { %p8649_p1 = pnand %p8648_p0, %p8642_p11 }
  0x94   :  { %8652 = shalt.err (!%p8649_p1)
}
  0x95   :  { %130 = dma.hbm_to_vmem [thread:$0]  %s9925_s10, 2048, %s125_s5, [#allocation16], %s8690_s22, %s8690_s22, %s8691_s27  }
  0x96   :  { %8675 = dma.done.wait [#allocation4], 1024  }
  0x97   :  { %8676 = vsyncadd [#allocation4], 4294966272 }
  0x98   :  { %8677 = dma.done.wait [#allocation7], 256  }
  0x99   :  { %8678 = vsyncadd [#allocation7], 4294967040 }
  0x9a   :  { %8679 = dma.done.wait [#allocation10], 12288  }
  0x9b   :  { %8680 = vsyncadd [#allocation10], 4294955008 }
  0x9c   :  { %8681 = dma.done.wait [#allocation13], 10240  }
  0x9d   :  { %8682 = vsyncadd [#allocation13], 4294957056 }
  0x9e   :  { %8683 = dma.done.wait [#allocation16], 4096  }
  0x9f   :  { %8684 = vsyncadd [#allocation16], 4294963200  ;;  %v8698_v0 = vmov 0.0   ;;  %vm8699_vm0 = vmmov 0   ;;  %vm166_vm1 = vcmask 64512   ;;  %v8902_v1 = vld [vmem:[#allocation8] sm:$0xff] }
  0xa0   :  { %5777 = vmatprep.subr.mxu0 %v8698_v0  ;;  %5779 = vmatprep.mubr.msk.f32.mxu0 %vm8699_vm0, %v8698_v0  ;;  %v8904_v2 = vld [vmem:[#allocation3 + $0x18] sm:$0xff]  ;;  %v8906_v3 = vld [vmem:[#allocation6] sm:$0xff]  ;;  %v1083_v7 = vld [vmem:[#allocation3 + $0x8] sm:$0xff]  ;;  %v8700_v8 = vmov 0.0|0.0   ;;  %s8701_s0 = smov [#allocation18]  }
  0xa1   :  { %5737 = vmatprep.subr.mxu1 %v8698_v0  ;;  %5739 = vmatprep.mubr.msk.f32.mxu1 %vm8699_vm0, %v8698_v0  ;;  %v8917_v4 = vld [vmem:[#allocation3 + $0x38] sm:$0xff]  ;;  %v8925_v5 = vld [vmem:[#allocation3 + $0x20] sm:$0xff]  ;;  %v1082_v9 = vld [vmem:[#allocation3 + $0x30] sm:$0xff]  ;;  %s4928_s26 = sshll.u32 %s8701_s0, 4  ;;  %s4929_s26 = int_to_ptr.vmem [resolvable:$true] %s4928_s26 }
  0xa2   :  { %5778 = vmatpush3.msra.mxu0 %v8902_v1  ;;  %5738 = vmatpush3.msra.mxu1 %v8902_v1  ;;  %v8930_v6 = vld [vmem:[#allocation3] sm:$0xff]  ;;  %v1384_v10 = vld [vmem:[#allocation12] sm:$0xff]  ;;  %v1385_v11 = vld [vmem:[#allocation12 + $0x8] sm:$0xff]  ;;  %s8653_s21 = scalar_lea.vmem %s4929_s26, 128  ;;  %p8658_p3 = scmp.lt.s32.totalorder %s4929_s26, %s4929_s26 }
  0xa3   :  { %5780 = vmatmul.mubr.msk.f32.vlgmr.msra.gmra.mrb[0].mxu0 %vm166_vm1, %v8904_v2  ;;  %5782 = vmatprep.subr.mxu0 %v8698_v0  ;;  %v8951_v12 = vpack.c.bf16 %v1385_v11, %v1384_v10  ;;  %v1386_v13 = vld [vmem:[#allocation12 + $0x10] sm:$0xff]  ;;  %v1387_v14 = vld [vmem:[#allocation12 + $0x18] sm:$0xff]  ;;  %v1388_v16 = vld [vmem:[#allocation12 + $0x20] sm:$0xff]  ;;  %p8654_p2 = scmp.ne.s32.totalorder %s4929_s26, %s8653_s21  ;;  %p8659_p4 = scmp.lt.s32.totalorder %s8653_s21, %s8653_s21 }
  0xa4   :  { %5783 = vmatpush3.msra.mxu0 %v8906_v3  ;;  %5784 = vmatprep.mubr.msk.f32.mxu0 %vm8699_vm0, %v8698_v0  ;;  %v8956_v15 = vpack.c.bf16 %v1387_v14, %v1386_v13  ;;  %v1389_v17 = vld [vmem:[#allocation12 + $0x28] sm:$0xff]  ;;  %v477_v18 = vld [vmem:[#allocation3 + $0x28] sm:$0xff]  ;;  %v1390_v20 = vld [vmem:[#allocation12 + $0x30] sm:$0xff] }
  0xa5   :  { %5797 = vmatprep.subr.mxu0 %v8698_v0  ;;  %5742 = vmatprep.subr.mxu1 %v8698_v0  ;;  %v8966_v19 = vpack.c.bf16 %v1389_v17, %v1388_v16  ;;  %v1391_v21 = vld [vmem:[#allocation12 + $0x38] sm:$0xff]  ;;  %v1392_v23 = vld [vmem:[#allocation12 + $0x40] sm:$0xff]  ;;  %v1393_v24 = vld [vmem:[#allocation12 + $0x48] sm:$0xff]  ;;  %p8660_p5 = por %p8659_p4, %p8658_p3 }
  0xa6   :  { %5740 = vmatmul.mubr.msk.f32.vlgmr.msra.gmra.mrb[0].mxu1 %vm166_vm1, %v8917_v4  ;;  %v8975_v22 = vpack.c.bf16 %v1391_v21, %v1390_v20  ;;  %v475_v25 = vld [vmem:[#allocation3 + $0x10] sm:$0xff]  ;;  %v8980_v26 = vpack.c.bf16 %v1393_v24, %v1392_v23  ;;  %v1394_v27 = vld [vmem:[#allocation12 + $0x50] sm:$0xff]  ;;  %v1395_v28 = vld [vmem:[#allocation12 + $0x58] sm:$0xff] }
  0xa7   :  { %5743 = vmatpush3.msra.mxu1 %v8906_v3  ;;  %5744 = vmatprep.mubr.msk.f32.mxu1 %vm8699_vm0, %v8698_v0  ;;  %v8988_v29 = vpack.c.bf16 %v1395_v28, %v1394_v27  ;;  %v1396_v30 = vld [vmem:[#allocation12 + $0x60] sm:$0xff]  ;;  %v1397_v31 = vld [vmem:[#allocation12 + $0x68] sm:$0xff]  ;;  %v1398_v33 = vld [vmem:[#allocation12 + $0x70] sm:$0xff]  ;;  %p8661_p6 = pnand %p8660_p5, %p8654_p2 }
  0xa8   :  { %5747 = vmatprep.subr.mxu1 %v8698_v0  ;;  %v8998_v32 = vpack.c.bf16 %v1397_v31, %v1396_v30  ;;  %v1399_v34 = vld [vmem:[#allocation12 + $0x78] sm:$0xff]  ;;  %v9072_v40 = vld [vmem:[%s9921_s6] ss:$0 sm:$0xff]  ;;  %v2000_v63 = vld [vmem:[#allocation9] sm:$0xff] }
  0xa9   :  { %v9003_v35 = vpack.c.bf16 %v1399_v34, %v1398_v33  ;;  %v2004_v11 = vld [vmem:[#allocation9 + $0x20] sm:$0xff]  ;;  %v2006_v14 = vld [vmem:[#allocation9 + $0x30] sm:$0xff]  ;;  %v2011_v21 = vld [vmem:[#allocation9 + $0x58] sm:$0xff] }
  0xaa   :  { %v2008_v17 = vld [vmem:[#allocation9 + $0x40] sm:$0xff]  ;;  %v2010_v20 = vld [vmem:[#allocation9 + $0x50] sm:$0xff]  ;;  %v2013_v24 = vld [vmem:[#allocation9 + $0x68] sm:$0xff] }
  0xab   :  { %5785 = vmatmul.mubr.msk.f32.vlgmr.msra.gmra.mrb[0].mxu0 %vm166_vm1, %v8925_v5  ;;  %v2012_v23 = vld [vmem:[#allocation9 + $0x60] sm:$0xff]  ;;  %v2015_v27 = vld [vmem:[#allocation9 + $0x78] sm:$0xff]  ;;  %v2130_v30 = vld [vmem:[#allocation11 + $0x8] sm:$0xff] }
  0xac   :  { %5798 = vmatpush3.msra.mxu0 %v8902_v1  ;;  %5799 = vmatprep.mubr.msk.f32.mxu0 %vm8699_vm0, %v8698_v0  ;;  %v2268_v33 = vld [vmem:[#allocation12 + $0x88] sm:$0xff]  ;;  %v2269_v34 = vld [vmem:[#allocation12 + $0x90] sm:$0xff] }
  0xad   :  { %5802 = vmatprep.subr.mxu0 %v8698_v0 }
  0xae   :  { %5745 = vmatmul.mubr.msk.f32.vlgmr.msra.gmra.mrb[0].mxu1 %vm166_vm1, %v8930_v6 }
  0xaf   :  { %5800 = vmatmul.mubr.msk.f32.vlgmr.msra.gmra.mrb[2].mxu0 %vm166_vm1, %v1083_v7  ;;  %5748 = vmatpush3.msra.mxu1 %v8902_v1 }
  0xb0   :  { %5803 = vmatpush3.msra.mxu0 %v8906_v3  ;;  %5804 = vmatprep.mubr.msk.f32.mxu0 %vm8699_vm0, %v8698_v0 }
  0xb1   :  { %7306 = vmatprep.subr.bf16.mxu0 %v8700_v8  ;;  %5749 = vmatprep.mubr.msk.f32.mxu1 %vm8699_vm0, %v8698_v0 }
  0xb2   :  { %5750 = vmatmul.mubr.msk.f32.vlgmr.msra.gmra.mrb[2].mxu1 %vm166_vm1, %v1082_v9  ;;  %5752 = vmatprep.subr.mxu1 %v8698_v0 }
  0xb3   :  { %5753 = vmatpush3.msra.mxu1 %v8906_v3  ;;  %5754 = vmatprep.mubr.msk.f32.mxu1 %vm8699_vm0, %v8698_v0 }
  0xb4   :  { %5757 = vmatprep.subr.mxu1 %v8698_v0 }
  0xb7   :  { %5805 = vmatmul.mubr.msk.f32.vlgmr.msra.gmra.mrb[2].mxu0 %vm166_vm1, %v1082_v9 }
  0xb8   :  { %7308 = vmatpush3.bf16.msra.mxu0 %v8951_v12  ;;  %5849 = vmatprep.mubr.msk.f32.mxu0 %vm8699_vm0, %v8698_v0 }
  0xb9   :  { %7309 = vmatprep.subr.bf16.mxu0 %v8700_v8 }
  0xba   :  { %5755 = vmatmul.mubr.msk.f32.vlgmr.msra.gmra.mrb[2].mxu1 %vm166_vm1, %v1083_v7  ;;  %v2003_v7 = vld [vmem:[#allocation9 + $0x18] sm:$0xff] }
  0xbb   :  { %5758 = vmatpush3.msra.mxu1 %v8902_v1  ;;  %5759 = vmatprep.mubr.msk.f32.mxu1 %vm8699_vm0, %v8698_v0 }
  0xbc   :  { %7311 = vmatpush3.bf16.msra.mxu0 %v8956_v15  ;;  %5762 = vmatprep.subr.mxu1 %v8698_v0 }
  0xbd   :  { %7312 = vmatprep.subr.bf16.mxu0 %v8700_v8 }
  0xbe   :  { %5760 = vmatmul.mubr.msk.f32.vlgmr.msra.gmra.mrb[4].mxu1 %vm166_vm1, %v477_v18 }
  0xbf   :  { %5763 = vmatpush3.msra.mxu1 %v8906_v3  ;;  %5764 = vmatprep.mubr.msk.f32.mxu1 %vm8699_vm0, %v8698_v0 }
  0xc0   :  { %7314 = vmatpush3.bf16.msra.mxu0 %v8966_v19  ;;  %5767 = vmatprep.subr.mxu1 %v8698_v0 }
  0xc1   :  { %7315 = vmatprep.subr.bf16.mxu0 %v8700_v8 }
  0xc4   :  { %7317 = vmatpush3.bf16.msra.mxu0 %v8975_v22 }
  0xc5   :  { %7318 = vmatprep.subr.bf16.mxu0 %v8700_v8 }
  0xc6   :  { %5765 = vmatmul.mubr.msk.f32.vlgmr.msra.gmra.mrb[4].mxu1 %vm166_vm1, %v475_v25 }
  0xc7   :  { %5768 = vmatpush3.msra.mxu1 %v8902_v1  ;;  %5769 = vmatprep.mubr.msk.f32.mxu1 %vm8699_vm0, %v8698_v0 }
  0xc8   :  { %7320 = vmatpush3.bf16.msra.mxu0 %v8980_v26  ;;  %5772 = vmatprep.subr.mxu1 %v8698_v0 }
  0xc9   :  { %7321 = vmatprep.subr.bf16.mxu0 %v8700_v8 }
  0xca   :  { %5770 = vmatmul.mubr.msk.f32.vlgmr.msra.gmra.mrb[6].mxu1 %vm166_vm1, %v8925_v5 }
  0xcb   :  { %5773 = vmatpush3.msra.mxu1 %v8906_v3  ;;  %5774 = vmatprep.mubr.msk.f32.mxu1 %vm8699_vm0, %v8698_v0 }
  0xcc   :  { %7323 = vmatpush3.bf16.msra.mxu0 %v8988_v29  ;;  %5787 = vmatprep.subr.mxu1 %v8698_v0 }
  0xcd   :  { %7324 = vmatprep.subr.bf16.mxu0 %v8700_v8 }
  0xd0   :  { %7326 = vmatpush3.bf16.msra.mxu0 %v8998_v32 }
  0xd1   :  { %7327 = vmatprep.subr.bf16.mxu0 %v8700_v8 }
  0xd2   :  { %5775 = vmatmul.mubr.msk.f32.vlgmr.msra.gmra.mrb[6].mxu1 %vm166_vm1, %v8904_v2 }
  0xd3   :  { %5788 = vmatpush3.msra.mxu1 %v8902_v1  ;;  %5789 = vmatprep.mubr.msk.f32.mxu1 %vm8699_vm0, %v8698_v0 }
  0xd4   :  { %7329 = vmatpush3.bf16.msra.mxu0 %v9003_v35  ;;  %5792 = vmatprep.subr.mxu1 %v8698_v0 }
  0xd5   :  { %7354 = vmatprep.subr.bf16.mxu0 %v8700_v8 }
  0xd6   :  { %5790 = vmatmul.mubr.msk.f32.vlgmr.msra.gmra.mrb[8].mxu1 %vm166_vm1, %v475_v25  ;;  %v7522_v25 = vpack.c.bf16 %v2013_v24, %v2012_v23  ;;  %v2281_v23 = vld [vmem:[#allocation12 + $0xf0] sm:$0xff]  ;;  %v2282_v24 = vld [vmem:[#allocation12 + $0xf8] sm:$0xff] }
  0xd7   :  { %5850 = vmatmul.mubr.f32.vlgmr.msra.gmra.mrb[4].mxu0 %v8698_v0  ;;  %5793 = vmatpush3.msra.mxu1 %v8906_v3 }
  0xd8   :  { %5794 = vmatprep.mubr.msk.f32.mxu1 %vm8699_vm0, %v8698_v0  ;;  %5807 = vmatprep.subr.mxu1 %v8698_v0 }
  0xd9   :  { %7356 = vmatpush3.bf16.msra.mxu0 %v8951_v12  ;;  %5919 = vmatprep.mubr.msk.f32.mxu0 %vm8699_vm0, %v8698_v0 }
  0xda   :  { %7357 = vmatprep.subr.bf16.mxu0 %v8700_v8 }
  0xdd   :  { %7359 = vmatpush3.bf16.msra.mxu0 %v8956_v15 }
  0xde   :  { %5795 = vmatmul.mubr.msk.f32.vlgmr.msra.gmra.mrb[8].mxu1 %vm166_vm1, %v477_v18  ;;  %7360 = vmatprep.subr.bf16.mxu0 %v8700_v8  ;;  %v2009_v18 = vld [vmem:[#allocation9 + $0x48] sm:$0xff] }
  0xdf   :  { %5808 = vmatpush3.msra.mxu1 %v8902_v1  ;;  %5809 = vmatprep.mubr.msk.f32.mxu1 %vm8699_vm0, %v8698_v0  ;;  %v2001_v1 = vld [vmem:[#allocation9 + $0x8] sm:$0xff] }
  0xe0   :  { %5812 = vmatprep.subr.mxu1 %v8698_v0  ;;  %v7498_v2 = vpack.c.bf16 %v2001_v1, %v2000_v63  ;;  %v2137_v63 = vld [vmem:[#allocation11 + $0x40] sm:$0xff]  ;;  %v2138_v1 = vld [vmem:[#allocation11 + $0x48] sm:$0xff] }
  0xe1   :  { %7362 = vmatpush3.bf16.msra.mxu0 %v8966_v19 }
  0xe2   :  { %5810 = vmatmul.mubr.msk.f32.vlgmr.msra.gmra.mrb[10].mxu1 %vm166_vm1, %v8930_v6  ;;  %7363 = vmatprep.subr.bf16.mxu0 %v8700_v8  ;;  %v2002_v6 = vld [vmem:[#allocation9 + $0x10] sm:$0xff] }
  0xe3   :  { %5813 = vmatpush3.msra.mxu1 %v8906_v3  ;;  %5814 = vmatprep.mubr.msk.f32.mxu1 %vm8699_vm0, %v8698_v0  ;;  %v7502_v9 = vpack.c.bf16 %v2003_v7, %v2002_v6  ;;  %v2141_v6 = vld [vmem:[#allocation11 + $0x60] sm:$0xff]  ;;  %v2142_v7 = vld [vmem:[#allocation11 + $0x68] sm:$0xff] }
  0xe4   :  { %7330 = vmatprep.subr.bf16.mxu1 %v8700_v8 }
  0xe5   :  { %7365 = vmatpush3.bf16.msra.mxu0 %v8975_v22 }
  0xe6   :  { %7366 = vmatprep.subr.bf16.mxu0 %v8700_v8 }
  0xe9   :  { %7368 = vmatpush3.bf16.msra.mxu0 %v8980_v26 }
  0xea   :  { %5815 = vmatmul.mubr.msk.f32.vlgmr.msra.gmra.mrb[10].mxu1 %vm166_vm1, %v8917_v4  ;;  %7369 = vmatprep.subr.bf16.mxu0 %v8700_v8 }
  0xeb   :  { %7332 = vmatpush3.bf16.msra.mxu1 %v8951_v12  ;;  %5884 = vmatprep.mubr.msk.f32.mxu1 %vm8699_vm0, %v8698_v0 }
  0xec   :  { %7333 = vmatprep.subr.bf16.mxu1 %v8700_v8 }
  0xed   :  { %7371 = vmatpush3.bf16.msra.mxu0 %v8988_v29 }
  0xee   :  { %7372 = vmatprep.subr.bf16.mxu0 %v8700_v8 }
  0xef   :  { %7335 = vmatpush3.bf16.msra.mxu1 %v8956_v15 }
  0xf0   :  { %7336 = vmatprep.subr.bf16.mxu1 %v8700_v8 }
  0xf1   :  { %7374 = vmatpush3.bf16.msra.mxu0 %v8998_v32 }
  0xf2   :  { %7375 = vmatprep.subr.bf16.mxu0 %v8700_v8 }
  0xf3   :  { %7338 = vmatpush3.bf16.msra.mxu1 %v8966_v19 }
  0xf4   :  { %7339 = vmatprep.subr.bf16.mxu1 %v8700_v8 }
  0xf5   :  { %7377 = vmatpush3.bf16.msra.mxu0 %v9003_v35 }
  0xf6   :  { %7402 = vmatprep.subr.bf16.mxu0 %v8700_v8 }
  0xf7   :  { %7341 = vmatpush3.bf16.msra.mxu1 %v8975_v22 }
  0xf8   :  { %7342 = vmatprep.subr.bf16.mxu1 %v8700_v8 }
  0xfb   :  { %7344 = vmatpush3.bf16.msra.mxu1 %v8980_v26 }
  0xfc   :  { %7345 = vmatprep.subr.bf16.mxu1 %v8700_v8 }
  0xff   :  { %7347 = vmatpush3.bf16.msra.mxu1 %v8988_v29 }
 0x100   :  { %7348 = vmatprep.subr.bf16.mxu1 %v8700_v8 }
 0x103   :  { %7350 = vmatpush3.bf16.msra.mxu1 %v8998_v32 }
 0x104   :  { %7351 = vmatprep.subr.bf16.mxu1 %v8700_v8 }
 0x107   :  { %7353 = vmatpush3.bf16.msra.mxu1 %v9003_v35 }
 0x108   :  { %7378 = vmatprep.subr.bf16.mxu1 %v8700_v8 }
 0x181   :  { %v309_v36 = vpop.f32.mrb[0].mxu1 }
 0x182   :  { %v5746_v37 = vpop.f32.mrb[1].mxu1  ;;  %v8338_v41 = vadd.f32 %v9072_v40, %v309_v36  ;;  %v2270_v36 = vld [vmem:[#allocation12 + $0x98] sm:$0xff] }
 0x183   :  { %v9196_v37 = vpack.c.bf16 %v2270_v36, %v2269_v34 }
 0x199   :  { %v620_v38 = vpop.f32.mrb[4].mxu1 }
 0x19a   :  { %v5766_v39 = vpop.f32.mrb[5].mxu1  ;;  %v8341_v50 = vadd.f32 %v9072_v40, %v620_v38  ;;  %v2271_v38 = vld [vmem:[#allocation12 + $0xa0] sm:$0xff] }
 0x19b   :  { %v2272_v39 = vld [vmem:[#allocation12 + $0xa8] sm:$0xff] }
 0x1aa   :  { %v1467_v42 = vpop.f32.mrb[4].mxu0 }
 0x1ab   :  { %v8339_v43 = vadd.f32 %v8338_v41, %v1467_v42  ;;  %v5851_v44 = vpop.f32.mrb[5].mxu0  ;;  %v9200_v41 = vpack.c.bf16 %v2272_v39, %v2271_v38  ;;  %v2273_v42 = vld [vmem:[#allocation12 + $0xb0] sm:$0xff] }
 0x1ad   :  { %8391 = vtanh.f32 %v8339_v43  ;;  %v2274_v43 = vld [vmem:[#allocation12 + $0xb8] sm:$0xff] }
 0x1ae   :  { %v9204_v44 = vpack.c.bf16 %v2274_v43, %v2273_v42 }
 0x1b7   :  { %v9075_v45 = vpop.eup %8391 }
 0x1b8   :  { %5885 = vmatmul.mubr.f32.vlgmr.msra.gmra.mrb[2].mxu1 %v9075_v45 }
 0x1b9   :  { %7380 = vmatpush3.bf16.msra.mxu1 %v8951_v12  ;;  %5954 = vmatprep.mubr.msk.f32.mxu1 %vm8699_vm0, %v8698_v0 }
 0x1ba   :  { %7381 = vmatprep.subr.bf16.mxu1 %v8700_v8 }
 0x1bd   :  { %7383 = vmatpush3.bf16.msra.mxu1 %v8956_v15 }
 0x1be   :  { %7384 = vmatprep.subr.bf16.mxu1 %v8700_v8 }
 0x1c1   :  { %7386 = vmatpush3.bf16.msra.mxu1 %v8966_v19 }
 0x1c2   :  { %7387 = vmatprep.subr.bf16.mxu1 %v8700_v8 }
 0x1c5   :  { %7389 = vmatpush3.bf16.msra.mxu1 %v8975_v22 }
 0x1c6   :  { %7390 = vmatprep.subr.bf16.mxu1 %v8700_v8 }
 0x1c9   :  { %7392 = vmatpush3.bf16.msra.mxu1 %v8980_v26 }
 0x1ca   :  { %7393 = vmatprep.subr.bf16.mxu1 %v8700_v8 }
 0x1cd   :  { %7395 = vmatpush3.bf16.msra.mxu1 %v8988_v29 }
 0x1ce   :  { %7396 = vmatprep.subr.bf16.mxu1 %v8700_v8 }
 0x1d1   :  { %7398 = vmatpush3.bf16.msra.mxu1 %v8998_v32 }
 0x1d2   :  { %7399 = vmatprep.subr.bf16.mxu1 %v8700_v8 }
 0x1d5   :  { %7401 = vmatpush3.bf16.msra.mxu1 %v9003_v35 }
 0x1d6   :  { %7426 = vmatprep.subr.bf16.mxu1 %v8700_v8 }
 0x28b   :  { %v1541_v46 = vpop.f32.mrb[2].mxu1 }
 0x28c   :  { %v8340_v47 = vadd.f32 %v9072_v40, %v1541_v46  ;;  %v5886_v48 = vpop.f32.mrb[3].mxu1 }
 0x28e   :  { %8393 = vtanh.f32 %v8340_v47 }
 0x298   :  { %v9097_v49 = vpop.eup %8393 }
 0x299   :  { %5920 = vmatmul.mubr.f32.vlgmr.msra.gmra.mrb[6].mxu0 %v9097_v49 }
 0x29a   :  { %7404 = vmatpush3.bf16.msra.mxu0 %v8951_v12  ;;  %5989 = vmatprep.mubr.msk.f32.mxu0 %vm8699_vm0, %v8698_v0 }
 0x29b   :  { %7405 = vmatprep.subr.bf16.mxu0 %v8700_v8 }
 0x29e   :  { %7407 = vmatpush3.bf16.msra.mxu0 %v8956_v15 }
 0x29f   :  { %7408 = vmatprep.subr.bf16.mxu0 %v8700_v8 }
 0x2a2   :  { %7410 = vmatpush3.bf16.msra.mxu0 %v8966_v19 }
 0x2a3   :  { %7411 = vmatprep.subr.bf16.mxu0 %v8700_v8 }
 0x2a6   :  { %7413 = vmatpush3.bf16.msra.mxu0 %v8975_v22 }
 0x2a7   :  { %7414 = vmatprep.subr.bf16.mxu0 %v8700_v8 }
 0x2aa   :  { %7416 = vmatpush3.bf16.msra.mxu0 %v8980_v26 }
 0x2ab   :  { %7417 = vmatprep.subr.bf16.mxu0 %v8700_v8 }
 0x2ae   :  { %7419 = vmatpush3.bf16.msra.mxu0 %v8988_v29 }
 0x2af   :  { %7420 = vmatprep.subr.bf16.mxu0 %v8700_v8 }
 0x2b2   :  { %7422 = vmatpush3.bf16.msra.mxu0 %v8998_v32 }
 0x2b3   :  { %7423 = vmatprep.subr.bf16.mxu0 %v8700_v8 }
 0x2b6   :  { %7425 = vmatpush3.bf16.msra.mxu0 %v9003_v35 }
 0x2b7   :  { %7450 = vmatprep.subr.bf16.mxu0 %v8700_v8 }
 0x36c   :  { %v1615_v51 = vpop.f32.mrb[6].mxu0 }
 0x36d   :  { %v8342_v52 = vadd.f32 %v8341_v50, %v1615_v51  ;;  %v5921_v53 = vpop.f32.mrb[7].mxu0  ;;  %v2131_v50 = vld [vmem:[#allocation11 + $0x10] sm:$0xff]  ;;  %v2132_v51 = vld [vmem:[#allocation11 + $0x18] sm:$0xff] }
 0x36f   :  { %8395 = vtanh.f32 %v8342_v52  ;;  %v7534_v52 = vpack.c.bf16 %v2132_v51, %v2131_v50 }
 0x379   :  { %v9119_v54 = vpop.eup %8395 }
 0x37a   :  { %5955 = vmatmul.mubr.f32.vlgmr.msra.gmra.mrb[6].mxu1 %v9119_v54 }
 0x37b   :  { %7428 = vmatpush3.bf16.msra.mxu1 %v8951_v12  ;;  %6024 = vmatprep.mubr.msk.f32.mxu1 %vm8699_vm0, %v8698_v0 }
 0x37c   :  { %7429 = vmatprep.subr.bf16.mxu1 %v8700_v8 }
 0x37f   :  { %7431 = vmatpush3.bf16.msra.mxu1 %v8956_v15 }
 0x380   :  { %7432 = vmatprep.subr.bf16.mxu1 %v8700_v8 }
 0x383   :  { %7434 = vmatpush3.bf16.msra.mxu1 %v8966_v19 }
 0x384   :  { %7435 = vmatprep.subr.bf16.mxu1 %v8700_v8 }
 0x387   :  { %7437 = vmatpush3.bf16.msra.mxu1 %v8975_v22 }
 0x388   :  { %7438 = vmatprep.subr.bf16.mxu1 %v8700_v8 }
 0x38b   :  { %7440 = vmatpush3.bf16.msra.mxu1 %v8980_v26 }
 0x38c   :  { %7441 = vmatprep.subr.bf16.mxu1 %v8700_v8 }
 0x38f   :  { %7443 = vmatpush3.bf16.msra.mxu1 %v8988_v29 }
 0x390   :  { %7444 = vmatprep.subr.bf16.mxu1 %v8700_v8 }
 0x393   :  { %7446 = vmatpush3.bf16.msra.mxu1 %v8998_v32 }
 0x394   :  { %7447 = vmatprep.subr.bf16.mxu1 %v8700_v8 }
 0x397   :  { %7449 = vmatpush3.bf16.msra.mxu1 %v9003_v35 }
 0x398   :  { %7474 = vmatprep.subr.bf16.mxu1 %v8700_v8 }
 0x44d   :  { %v1689_v55 = vpop.f32.mrb[6].mxu1 }
 0x44e   :  { %v8343_v56 = vadd.f32 %v9072_v40, %v1689_v55  ;;  %v5956_v57 = vpop.f32.mrb[7].mxu1  ;;  %v2133_v55 = vld [vmem:[#allocation11 + $0x20] sm:$0xff] }
 0x450   :  { %8397 = vtanh.f32 %v8343_v56  ;;  %v2134_v56 = vld [vmem:[#allocation11 + $0x28] sm:$0xff] }
 0x451   :  { %v7538_v57 = vpack.c.bf16 %v2134_v56, %v2133_v55 }
 0x45a   :  { %v9141_v58 = vpop.eup %8397 }
 0x45b   :  { %5990 = vmatmul.mubr.f32.vlgmr.msra.gmra.mrb[0].mxu0 %v9141_v58 }
 0x45c   :  { %7452 = vmatpush3.bf16.msra.mxu0 %v8951_v12  ;;  %6059 = vmatprep.mubr.msk.f32.mxu0 %vm8699_vm0, %v8698_v0 }
 0x45d   :  { %7453 = vmatprep.subr.bf16.mxu0 %v8700_v8 }
 0x460   :  { %7455 = vmatpush3.bf16.msra.mxu0 %v8956_v15 }
 0x461   :  { %7456 = vmatprep.subr.bf16.mxu0 %v8700_v8 }
 0x464   :  { %7458 = vmatpush3.bf16.msra.mxu0 %v8966_v19 }
 0x465   :  { %7459 = vmatprep.subr.bf16.mxu0 %v8700_v8 }
 0x468   :  { %7461 = vmatpush3.bf16.msra.mxu0 %v8975_v22 }
 0x469   :  { %7462 = vmatprep.subr.bf16.mxu0 %v8700_v8 }
 0x46c   :  { %7464 = vmatpush3.bf16.msra.mxu0 %v8980_v26 }
 0x46d   :  { %7465 = vmatprep.subr.bf16.mxu0 %v8700_v8 }
 0x470   :  { %7467 = vmatpush3.bf16.msra.mxu0 %v8988_v29 }
 0x471   :  { %7468 = vmatprep.subr.bf16.mxu0 %v8700_v8 }
 0x474   :  { %7470 = vmatpush3.bf16.msra.mxu0 %v8998_v32 }
 0x475   :  { %7471 = vmatprep.subr.bf16.mxu0 %v8700_v8 }
 0x478   :  { %7473 = vmatpush3.bf16.msra.mxu0 %v9003_v35 }
 0x479   :  { %7499 = vmatprep.subr.bf16.mxu0 %v7498_v2 }
 0x52e   :  { %v1763_v59 = vpop.f32.mrb[0].mxu0 }
 0x52f   :  { %v8344_v60 = vadd.f32 %v9072_v40, %v1763_v59  ;;  %v5991_v61 = vpop.f32.mrb[1].mxu0  ;;  %v2135_v59 = vld [vmem:[#allocation11 + $0x30] sm:$0xff] }
 0x531   :  { %8399 = vtanh.f32 %v8344_v60  ;;  %v2136_v60 = vld [vmem:[#allocation11 + $0x38] sm:$0xff] }
 0x532   :  { %v7542_v61 = vpack.c.bf16 %v2136_v60, %v2135_v59 }
 0x53b   :  { %v9162_v62 = vpop.eup %8399 }
 0x53c   :  { %6025 = vmatmul.mubr.f32.vlgmr.msra.gmra.mrb[8].mxu1 %v9162_v62 }
 0x53d   :  { %7476 = vmatpush3.bf16.msra.mxu1 %v8951_v12  ;;  %6094 = vmatprep.mubr.msk.f32.mxu1 %vm8699_vm0, %v8698_v0  ;;  %v2005_v12 = vld [vmem:[#allocation9 + $0x28] sm:$0xff] }
 0x53e   :  { %7477 = vmatprep.subr.bf16.mxu1 %v8700_v8  ;;  %v7506_v13 = vpack.c.bf16 %v2005_v12, %v2004_v11  ;;  %v2143_v12 = vld [vmem:[#allocation11 + $0x70] sm:$0xff] }
 0x541   :  { %7479 = vmatpush3.bf16.msra.mxu1 %v8956_v15  ;;  %v2007_v15 = vld [vmem:[#allocation9 + $0x38] sm:$0xff] }
 0x542   :  { %7480 = vmatprep.subr.bf16.mxu1 %v8700_v8  ;;  %v7510_v16 = vpack.c.bf16 %v2007_v15, %v2006_v14 }
 0x545   :  { %7482 = vmatpush3.bf16.msra.mxu1 %v8966_v19  ;;  %v7514_v19 = vpack.c.bf16 %v2009_v18, %v2008_v17 }
 0x546   :  { %7483 = vmatprep.subr.bf16.mxu1 %v8700_v8 }
 0x549   :  { %7485 = vmatpush3.bf16.msra.mxu1 %v8975_v22  ;;  %v7518_v22 = vpack.c.bf16 %v2011_v21, %v2010_v20  ;;  %v2280_v21 = vld [vmem:[#allocation12 + $0xe8] sm:$0xff] }
 0x54a   :  { %7486 = vmatprep.subr.bf16.mxu1 %v8700_v8 }
 0x54d   :  { %7488 = vmatpush3.bf16.msra.mxu1 %v8980_v26  ;;  %v2014_v26 = vld [vmem:[#allocation9 + $0x70] sm:$0xff] }
 0x54e   :  { %7489 = vmatprep.subr.bf16.mxu1 %v8700_v8  ;;  %v7526_v28 = vpack.c.bf16 %v2015_v27, %v2014_v26 }
 0x551   :  { %7491 = vmatpush3.bf16.msra.mxu1 %v8988_v29  ;;  %v2129_v29 = vld [vmem:[#allocation11] sm:$0xff] }
 0x552   :  { %7492 = vmatprep.subr.bf16.mxu1 %v8700_v8  ;;  %v7530_v31 = vpack.c.bf16 %v2130_v30, %v2129_v29 }
 0x555   :  { %7494 = vmatpush3.bf16.msra.mxu1 %v8998_v32  ;;  %v2267_v32 = vld [vmem:[#allocation12 + $0x80] sm:$0xff] }
 0x556   :  { %7495 = vmatprep.subr.bf16.mxu1 %v8700_v8 }
 0x559   :  { %7497 = vmatpush3.bf16.msra.mxu1 %v9003_v35  ;;  %v9193_v35 = vpack.c.bf16 %v2268_v33, %v2267_v32 }
 0x55a   :  { %7531 = vmatprep.subr.bf16.mxu1 %v7530_v31 }
 0x60f   :  { %v1837_v3 = vpop.f32.mrb[8].mxu1 }
 0x610   :  { %v8345_v4 = vadd.f32 %v9072_v40, %v1837_v3  ;;  %v6026_v5 = vpop.f32.mrb[9].mxu1  ;;  %v2139_v3 = vld [vmem:[#allocation11 + $0x50] sm:$0xff] }
 0x612   :  { %8401 = vtanh.f32 %v8345_v4  ;;  %v2140_v4 = vld [vmem:[#allocation11 + $0x58] sm:$0xff] }
 0x613   :  { %v7550_v5 = vpack.c.bf16 %v2140_v4, %v2139_v3 }
 0x61c   :  { %v9183_v10 = vpop.eup %8401 }
 0x61d   :  { %6060 = vmatmul.mubr.f32.vlgmr.msra.gmra.mrb[2].mxu0 %v9183_v10 }
 0x61e   :  { %7501 = vmatpush3.bf16.msra.mxu0 %v7498_v2  ;;  %6129 = vmatprep.mubr.f32.mxu0 %v9075_v45  ;;  %v7546_v2 = vpack.c.bf16 %v2138_v1, %v2137_v63 }
 0x61f   :  { %7503 = vmatprep.subr.bf16.mxu0 %v7502_v9 }
 0x622   :  { %7505 = vmatpush3.bf16.msra.mxu0 %v7502_v9  ;;  %v7554_v9 = vpack.c.bf16 %v2142_v7, %v2141_v6 }
 0x623   :  { %7507 = vmatprep.subr.bf16.mxu0 %v7506_v13 }
 0x626   :  { %7509 = vmatpush3.bf16.msra.mxu0 %v7506_v13  ;;  %v2144_v13 = vld [vmem:[#allocation11 + $0x78] sm:$0xff] }
 0x627   :  { %7511 = vmatprep.subr.bf16.mxu0 %v7510_v16  ;;  %v7558_v15 = vpack.c.bf16 %v2144_v13, %v2143_v12 }
 0x62a   :  { %7513 = vmatpush3.bf16.msra.mxu0 %v7510_v16 }
 0x62b   :  { %7515 = vmatprep.subr.bf16.mxu0 %v7514_v19 }
 0x62e   :  { %7517 = vmatpush3.bf16.msra.mxu0 %v7514_v19  ;;  %v2278_v19 = vld [vmem:[#allocation12 + $0xd8] sm:$0xff] }
 0x62f   :  { %7519 = vmatprep.subr.bf16.mxu0 %v7518_v22 }
 0x632   :  { %7521 = vmatpush3.bf16.msra.mxu0 %v7518_v22 }
 0x633   :  { %7523 = vmatprep.subr.bf16.mxu0 %v7522_v25 }
 0x636   :  { %7525 = vmatpush3.bf16.msra.mxu0 %v7522_v25  ;;  %v9255_v25 = vpack.c.bf16 %v2282_v24, %v2281_v23  ;;  %v2886_v23 = vld [vmem:[#allocation9 + $0x90] sm:$0xff]  ;;  %v2887_v24 = vld [vmem:[#allocation9 + $0x98] sm:$0xff] }
 0x637   :  { %7527 = vmatprep.subr.bf16.mxu0 %v7526_v28 }
 0x63a   :  { %7529 = vmatpush3.bf16.msra.mxu0 %v7526_v28 }
 0x63b   :  { %7562 = vmatprep.subr.bf16.mxu0 %v8700_v8 }
 0x63d   :  { %6130 = vmatmul.mubr.f32.vlgmr.msra.gmra.mrb[8].mxu0 %v9097_v49 }
 0x63e   :  { %6132 = vmatprep.mubr.f32.mxu0 %v9119_v54  ;;  %7564 = vmatpush3.bf16.msra.mxu0 %v9193_v35 }
 0x63f   :  { %7565 = vmatprep.subr.bf16.mxu0 %v8700_v8 }
 0x641   :  { %6133 = vmatmul.mubr.f32.gmra.mrb[10].mxu0 %v9141_v58 }
 0x642   :  { %6135 = vmatprep.mubr.f32.mxu0 %v9162_v62  ;;  %7567 = vmatpush3.bf16.msra.mxu0 %v9196_v37 }
 0x643   :  { %7568 = vmatprep.subr.bf16.mxu0 %v8700_v8 }
 0x645   :  { %6136 = vmatmul.mubr.f32.gmra.mrb[12].mxu0 %v9183_v10 }
 0x646   :  { %7570 = vmatpush3.bf16.msra.mxu0 %v9200_v41 }
 0x647   :  { %7571 = vmatprep.subr.bf16.mxu0 %v8700_v8 }
 0x64a   :  { %7573 = vmatpush3.bf16.msra.mxu0 %v9204_v44 }
 0x64b   :  { %7574 = vmatprep.subr.bf16.mxu0 %v8700_v8 }
 0x6f0   :  { %v1911_v46 = vpop.f32.mrb[2].mxu0 }
 0x6f1   :  { %v8346_v47 = vadd.f32 %v9072_v40, %v1911_v46  ;;  %v6061_v48 = vpop.f32.mrb[3].mxu0 }
 0x6f3   :  { %8403 = vtanh.f32 %v8346_v47 }
 0x6fd   :  { %v8404_v53 = vpop.eup %8403 }
 0x6fe   :  { %6095 = vmatmul.mubr.f32.vlgmr.msra.gmra.mrb[10].mxu1 %v8404_v53  ;;  %6138 = vmatprep.mubr.f32.mxu0 %v8404_v53 }
 0x6ff   :  { %7533 = vmatpush3.bf16.msra.mxu1 %v7530_v31  ;;  %6173 = vmatprep.mubr.f32.mxu1 %v9075_v45  ;;  %v4959_v31 = vld [vmem:[%s9921_s6 + $0x1] ss:$0 sm:$0xff] }
 0x700   :  { %7535 = vmatprep.subr.bf16.mxu1 %v7534_v52 }
 0x703   :  { %7537 = vmatpush3.bf16.msra.mxu1 %v7534_v52 }
 0x704   :  { %7539 = vmatprep.subr.bf16.mxu1 %v7538_v57 }
 0x707   :  { %7541 = vmatpush3.bf16.msra.mxu1 %v7538_v57 }
 0x708   :  { %7543 = vmatprep.subr.bf16.mxu1 %v7542_v61 }
 0x70b   :  { %7545 = vmatpush3.bf16.msra.mxu1 %v7542_v61 }
 0x70c   :  { %7547 = vmatprep.subr.bf16.mxu1 %v7546_v2 }
 0x70f   :  { %7549 = vmatpush3.bf16.msra.mxu1 %v7546_v2 }
 0x710   :  { %v9211_v45 = vpop.f32.mrb[8].mxu0  ;;  %7551 = vmatprep.subr.bf16.mxu1 %v7550_v5 }
 0x711   :  { %v9213_v11 = vpop.f32.mrb[9].mxu0  ;;  %v2096_v52 = vadd.f32 %v9211_v45, %v4959_v31 }
 0x712   :  { %v2091_v51 = vadd.f32 %v4959_v31, %v9213_v11 }
 0x713   :  { %7553 = vmatpush3.bf16.msra.mxu1 %v7550_v5 }
 0x714   :  { %v9215_v14 = vpop.f32.mrb[10].mxu0  ;;  %7555 = vmatprep.subr.bf16.mxu1 %v7554_v9 }
 0x715   :  { %v9217_v16 = vpop.f32.mrb[11].mxu0  ;;  %v2106_v43 = vadd.f32 %v9215_v14, %v4959_v31 }
 0x716   :  { %v2101_v42 = vadd.f32 %v4959_v31, %v9217_v16 }
 0x717   :  { %7557 = vmatpush3.bf16.msra.mxu1 %v7554_v9 }
 0x718   :  { %v9219_v17 = vpop.f32.mrb[12].mxu0  ;;  %7559 = vmatprep.subr.bf16.mxu1 %v7558_v15 }
 0x719   :  { %v9221_v18 = vpop.f32.mrb[13].mxu0  ;;  %v2116_v33 = vadd.f32 %v9219_v17, %v4959_v31 }
 0x71a   :  { %v2111_v32 = vadd.f32 %v4959_v31, %v9221_v18 }
 0x71b   :  { %7561 = vmatpush3.bf16.msra.mxu1 %v7558_v15 }
 0x71c   :  { %7586 = vmatprep.subr.bf16.mxu1 %v8700_v8 }
 0x71e   :  { %6174 = vmatmul.mubr.f32.vlgmr.msra.gmra.mrb[12].mxu1 %v9097_v49  ;;  %v2275_v49 = vld [vmem:[#allocation12 + $0xc0] sm:$0xff] }
 0x71f   :  { %6176 = vmatprep.mubr.f32.mxu1 %v9119_v54  ;;  %7588 = vmatpush3.bf16.msra.mxu1 %v9193_v35  ;;  %v2276_v54 = vld [vmem:[#allocation12 + $0xc8] sm:$0xff] }
 0x720   :  { %7589 = vmatprep.subr.bf16.mxu1 %v8700_v8 }
 0x722   :  { %6177 = vmatmul.mubr.f32.gmra.mrb[14].mxu1 %v9141_v58  ;;  %v9237_v58 = vpack.c.bf16 %v2276_v54, %v2275_v49 }
 0x723   :  { %6179 = vmatprep.mubr.f32.mxu1 %v9162_v62  ;;  %7591 = vmatpush3.bf16.msra.mxu1 %v9196_v37  ;;  %v2277_v62 = vld [vmem:[#allocation12 + $0xd0] sm:$0xff] }
 0x724   :  { %7592 = vmatprep.subr.bf16.mxu1 %v8700_v8  ;;  %7576 = vmatpush3.bf16.msra.mxu0 %v9237_v58  ;;  %v9240_v20 = vpack.c.bf16 %v2278_v19, %v2277_v62 }
 0x725   :  { %7577 = vmatprep.subr.bf16.mxu0 %v8700_v8 }
 0x726   :  { %6180 = vmatmul.mubr.f32.gmra.mrb[16].mxu1 %v9183_v10  ;;  %v2279_v10 = vld [vmem:[#allocation12 + $0xe0] sm:$0xff] }
 0x727   :  { %6182 = vmatprep.mubr.f32.mxu1 %v8404_v53  ;;  %7594 = vmatpush3.bf16.msra.mxu1 %v9200_v41  ;;  %v9246_v22 = vpack.c.bf16 %v2280_v21, %v2279_v10 }
 0x728   :  { %7595 = vmatprep.subr.bf16.mxu1 %v8700_v8  ;;  %7579 = vmatpush3.bf16.msra.mxu0 %v9240_v20 }
 0x729   :  { %7580 = vmatprep.subr.bf16.mxu0 %v8700_v8 }
 0x72b   :  { %7597 = vmatpush3.bf16.msra.mxu1 %v9204_v44 }
 0x72c   :  { %7598 = vmatprep.subr.bf16.mxu1 %v8700_v8  ;;  %7582 = vmatpush3.bf16.msra.mxu0 %v9246_v22 }
 0x72d   :  { %7583 = vmatprep.subr.bf16.mxu0 %v8700_v8 }
 0x72f   :  { %7600 = vmatpush3.bf16.msra.mxu1 %v9237_v58 }
 0x730   :  { %7601 = vmatprep.subr.bf16.mxu1 %v8700_v8  ;;  %7585 = vmatpush3.bf16.msra.mxu0 %v9255_v25 }
 0x731   :  { %7610 = vmatprep.subr.bf16.mxu0 %v8700_v8 }
 0x733   :  { %7603 = vmatpush3.bf16.msra.mxu1 %v9240_v20 }
 0x734   :  { %7604 = vmatprep.subr.bf16.mxu1 %v8700_v8 }
 0x737   :  { %7606 = vmatpush3.bf16.msra.mxu1 %v9246_v22 }
 0x738   :  { %7607 = vmatprep.subr.bf16.mxu1 %v8700_v8 }
 0x73b   :  { %7609 = vmatpush3.bf16.msra.mxu1 %v9255_v25 }
 0x73c   :  { %7634 = vmatprep.subr.bf16.mxu1 %v8700_v8 }
 0x7d1   :  { %v1985_v26 = vpop.f32.mrb[10].mxu1 }
 0x7d2   :  { %v8347_v27 = vadd.f32 %v9072_v40, %v1985_v26  ;;  %v6096_v28 = vpop.f32.mrb[11].mxu1 }
 0x7d3   :  { %v2890_v28 = vld [vmem:[#allocation9 + $0xb0] sm:$0xff] }
 0x7d4   :  { %8405 = vtanh.f32 %v8347_v27  ;;  %v2888_v27 = vld [vmem:[#allocation9 + $0xa0] sm:$0xff] }
 0x7de   :  { %v8406_v29 = vpop.eup %8405 }
 0x7df   :  { %6139 = vmatmul.mubr.f32.gmra.mrb[14].mxu0 %v8406_v29  ;;  %6183 = vmatmul.mubr.f32.gmra.mrb[18].mxu1 %v8406_v29  ;;  %v2891_v29 = vld [vmem:[#allocation9 + $0xb8] sm:$0xff] }
 0x7e0   :  { %6217 = vmatprep.mubr.msk.f32.mxu0 %vm8699_vm0, %v8698_v0  ;;  %6252 = vmatprep.mubr.msk.f32.mxu1 %vm8699_vm0, %v8698_v0 }
 0x7e3   :  { %6218 = vmatmul.mubr.f32.vlgmr.msra.gmra.mrb[16].mxu0 %v8698_v0 }
 0x7e4   :  { %7612 = vmatpush3.bf16.msra.mxu0 %v9193_v35  ;;  %6287 = vmatprep.mubr.msk.f32.mxu0 %vm8699_vm0, %v8698_v0 }
 0x7e5   :  { %7613 = vmatprep.subr.bf16.mxu0 %v8700_v8 }
 0x7e8   :  { %7615 = vmatpush3.bf16.msra.mxu0 %v9196_v37 }
 0x7e9   :  { %7616 = vmatprep.subr.bf16.mxu0 %v8700_v8 }
 0x7ec   :  { %7618 = vmatpush3.bf16.msra.mxu0 %v9200_v41 }
 0x7ed   :  { %7619 = vmatprep.subr.bf16.mxu0 %v8700_v8 }
 0x7f0   :  { %7621 = vmatpush3.bf16.msra.mxu0 %v9204_v44 }
 0x7f1   :  { %v6175_v40 = vpop.f32.mrb[12].mxu1  ;;  %7622 = vmatprep.subr.bf16.mxu0 %v8700_v8 }
 0x7f2   :  { %v2211_v30 = vpop.f32.mrb[13].mxu1 }
 0x7f4   :  { %7624 = vmatpush3.bf16.msra.mxu0 %v9237_v58 }
 0x7f5   :  { %v6178_v34 = vpop.f32.mrb[14].mxu1  ;;  %7625 = vmatprep.subr.bf16.mxu0 %v8700_v8 }
 0x7f6   :  { %v9284_v36 = vadd.f32 %v6178_v34, %v2111_v32  ;;  %v2221_v38 = vpop.f32.mrb[15].mxu1  ;;  %v2895_v34 = vld [vmem:[#allocation9 + $0xd8] sm:$0xff] }
 0x7f7   :  { %v9286_v39 = vadd.f32 %v2221_v38, %v2116_v33  ;;  %v2894_v33 = vld [vmem:[#allocation9 + $0xd0] sm:$0xff]  ;;  %v2896_v38 = vld [vmem:[#allocation9 + $0xe0] sm:$0xff] }
 0x7f8   :  { %7627 = vmatpush3.bf16.msra.mxu0 %v9240_v20 }
 0x7f9   :  { %v6181_v46 = vpop.f32.mrb[16].mxu1  ;;  %7628 = vmatprep.subr.bf16.mxu0 %v8700_v8 }
 0x7fa   :  { %v9292_v47 = vadd.f32 %v6181_v46, %v2101_v42  ;;  %v2231_v48 = vpop.f32.mrb[17].mxu1  ;;  %v2899_v46 = vld [vmem:[#allocation9 + $0xf8] sm:$0xff] }
 0x7fb   :  { %v9294_v50 = vadd.f32 %v2231_v48, %v2106_v43  ;;  %v2898_v43 = vld [vmem:[#allocation9 + $0xf0] sm:$0xff]  ;;  %v3014_v48 = vld [vmem:[#allocation11 + $0x80] sm:$0xff] }
 0x7fc   :  { %7630 = vmatpush3.bf16.msra.mxu0 %v9246_v22 }
 0x7fd   :  { %7631 = vmatprep.subr.bf16.mxu0 %v8700_v8 }
 0x800   :  { %7633 = vmatpush3.bf16.msra.mxu0 %v9255_v25 }
 0x801   :  { %7658 = vmatprep.subr.bf16.mxu0 %v8700_v8 }
 0x8b2   :  { %v6140_v53 = vpop.f32.mrb[14].mxu0  ;;  %v6184_v55 = vpop.f32.mrb[18].mxu1 }
 0x8b3   :  { %v2126_v56 = vadd.f32 %v6140_v53, %v4959_v31  ;;  %v2250_v57 = vadd.f32 %v6184_v55, %v2091_v51  ;;  %v2120_v59 = vpop.f32.mrb[15].mxu0  ;;  %v2241_v60 = vpop.f32.mrb[19].mxu1  ;;  %v3153_v53 = vld [vmem:[#allocation12 + $0x108] sm:$0xff]  ;;  %v3154_v55 = vld [vmem:[#allocation12 + $0x110] sm:$0xff] }
 0x8b4   :  { %v2121_v61 = vadd.f32 %v4959_v31, %v2120_v59  ;;  %v2252_v63 = vadd.f32 %v2241_v60, %v2096_v52  ;;  %v2893_v31 = vld [vmem:[#allocation9 + $0xc8] sm:$0xff]  ;;  %v3152_v52 = vld [vmem:[#allocation12 + $0x100] sm:$0xff] }
 0x8b5   :  { %v9302_v1 = vadd.f32 %v2211_v30, %v2126_v56  ;;  %v2892_v30 = vld [vmem:[#allocation9 + $0xc0] sm:$0xff]  ;;  %v9423_v56 = vpack.c.bf16 %v3153_v53, %v3152_v52 }
 0x8b6   :  { %v2350_v2 = vpop.f32.mrb[16].mxu0  ;;  %v9304_v3 = vadd.f32 %v6175_v40, %v2121_v61  ;;  %v7766_v40 = vpack.c.bf16 %v2891_v29, %v2890_v28  ;;  %v7770_v32 = vpack.c.bf16 %v2893_v31, %v2892_v30  ;;  %v3156_v60 = vld [vmem:[#allocation12 + $0x120] sm:$0xff]  ;;  %v3157_v61 = vld [vmem:[#allocation12 + $0x128] sm:$0xff] }
 0x8b7   :  { %v2354_v4 = vadd.f32 %v2350_v2, %v2250_v57  ;;  %v6219_v5 = vpop.f32.mrb[17].mxu0  ;;  %v3155_v57 = vld [vmem:[#allocation12 + $0x118] sm:$0xff]  ;;  %v3158_v2 = vld [vmem:[#allocation12 + $0x130] sm:$0xff] }
 0x8b8   :  { %v9426_v59 = vpack.c.bf16 %v3155_v57, %v3154_v55 }
 0x8b9   :  { %8407 = vtanh.f32 %v2354_v4  ;;  %v3159_v4 = vld [vmem:[#allocation12 + $0x138] sm:$0xff] }
 0x8ba   :  { %v9434_v5 = vpack.c.bf16 %v3159_v4, %v3158_v2 }
 0x8c3   :  { %v9306_v6 = vpop.eup %8407 }
 0x8c4   :  { %6253 = vmatmul.mubr.f32.vlgmr.msra.gmra.mrb[20].mxu1 %v9306_v6 }
 0x8c5   :  { %7636 = vmatpush3.bf16.msra.mxu1 %v9193_v35  ;;  %6322 = vmatprep.mubr.msk.f32.mxu1 %vm8699_vm0, %v8698_v0 }
 0x8c6   :  { %7637 = vmatprep.subr.bf16.mxu1 %v8700_v8 }
 0x8c9   :  { %7639 = vmatpush3.bf16.msra.mxu1 %v9196_v37 }
 0x8ca   :  { %7640 = vmatprep.subr.bf16.mxu1 %v8700_v8 }
 0x8cd   :  { %7642 = vmatpush3.bf16.msra.mxu1 %v9200_v41 }
 0x8ce   :  { %7643 = vmatprep.subr.bf16.mxu1 %v8700_v8 }
 0x8d1   :  { %7645 = vmatpush3.bf16.msra.mxu1 %v9204_v44 }
 0x8d2   :  { %7646 = vmatprep.subr.bf16.mxu1 %v8700_v8 }
 0x8d5   :  { %7648 = vmatpush3.bf16.msra.mxu1 %v9237_v58 }
 0x8d6   :  { %7649 = vmatprep.subr.bf16.mxu1 %v8700_v8 }
 0x8d9   :  { %7651 = vmatpush3.bf16.msra.mxu1 %v9240_v20 }
 0x8da   :  { %7652 = vmatprep.subr.bf16.mxu1 %v8700_v8 }
 0x8dd   :  { %7654 = vmatpush3.bf16.msra.mxu1 %v9246_v22 }
 0x8de   :  { %7655 = vmatprep.subr.bf16.mxu1 %v8700_v8 }
 0x8e1   :  { %7657 = vmatpush3.bf16.msra.mxu1 %v9255_v25 }
 0x8e2   :  { %7682 = vmatprep.subr.bf16.mxu1 %v8700_v8 }
 0x997   :  { %v2424_v7 = vpop.f32.mrb[20].mxu1 }
 0x998   :  { %v2428_v45 = vadd.f32 %v2424_v7, %v2252_v63  ;;  %v6254_v9 = vpop.f32.mrb[21].mxu1  ;;  %v9430_v63 = vpack.c.bf16 %v3157_v61, %v3156_v60 }
 0x99a   :  { %8409 = vtanh.f32 %v2428_v45 }
 0x9a4   :  { %v9327_v11 = vpop.eup %8409 }
 0x9a5   :  { %6288 = vmatmul.mubr.f32.vlgmr.msra.gmra.mrb[18].mxu0 %v9327_v11 }
 0x9a6   :  { %7660 = vmatpush3.bf16.msra.mxu0 %v9193_v35  ;;  %6357 = vmatprep.mubr.msk.f32.mxu0 %vm8699_vm0, %v8698_v0 }
 0x9a7   :  { %7661 = vmatprep.subr.bf16.mxu0 %v8700_v8 }
 0x9aa   :  { %7663 = vmatpush3.bf16.msra.mxu0 %v9196_v37 }
 0x9ab   :  { %7664 = vmatprep.subr.bf16.mxu0 %v8700_v8 }
 0x9ae   :  { %7666 = vmatpush3.bf16.msra.mxu0 %v9200_v41 }
 0x9af   :  { %7667 = vmatprep.subr.bf16.mxu0 %v8700_v8 }
 0x9b2   :  { %7669 = vmatpush3.bf16.msra.mxu0 %v9204_v44 }
 0x9b3   :  { %7670 = vmatprep.subr.bf16.mxu0 %v8700_v8 }
 0x9b6   :  { %7672 = vmatpush3.bf16.msra.mxu0 %v9237_v58 }
 0x9b7   :  { %7673 = vmatprep.subr.bf16.mxu0 %v8700_v8 }
 0x9ba   :  { %7675 = vmatpush3.bf16.msra.mxu0 %v9240_v20 }
 0x9bb   :  { %7676 = vmatprep.subr.bf16.mxu0 %v8700_v8 }
 0x9be   :  { %7678 = vmatpush3.bf16.msra.mxu0 %v9246_v22 }
 0x9bf   :  { %7679 = vmatprep.subr.bf16.mxu0 %v8700_v8 }
 0x9c2   :  { %7681 = vmatpush3.bf16.msra.mxu0 %v9255_v25 }
 0x9c3   :  { %7706 = vmatprep.subr.bf16.mxu0 %v8700_v8 }
 0xa78   :  { %v2498_v12 = vpop.f32.mrb[18].mxu0 }
 0xa79   :  { %v2502_v13 = vadd.f32 %v2498_v12, %v9292_v47  ;;  %v6289_v14 = vpop.f32.mrb[19].mxu0  ;;  %v7782_v47 = vpack.c.bf16 %v2899_v46, %v2898_v43  ;;  %v3016_v12 = vld [vmem:[#allocation11 + $0x90] sm:$0xff] }
 0xa7b   :  { %8411 = vtanh.f32 %v2502_v13  ;;  %v3017_v13 = vld [vmem:[#allocation11 + $0x98] sm:$0xff] }
 0xa7c   :  { %v7790_v14 = vpack.c.bf16 %v3017_v13, %v3016_v12 }
 0xa85   :  { %v9349_v15 = vpop.eup %8411 }
 0xa86   :  { %6323 = vmatmul.mubr.f32.vlgmr.msra.gmra.mrb[22].mxu1 %v9349_v15 }
 0xa87   :  { %7684 = vmatpush3.bf16.msra.mxu1 %v9193_v35  ;;  %6392 = vmatprep.mubr.msk.f32.mxu1 %vm8699_vm0, %v8698_v0 }
 0xa88   :  { %7685 = vmatprep.subr.bf16.mxu1 %v8700_v8 }
 0xa8b   :  { %7687 = vmatpush3.bf16.msra.mxu1 %v9196_v37 }
 0xa8c   :  { %7688 = vmatprep.subr.bf16.mxu1 %v8700_v8 }
 0xa8f   :  { %7690 = vmatpush3.bf16.msra.mxu1 %v9200_v41 }
 0xa90   :  { %7691 = vmatprep.subr.bf16.mxu1 %v8700_v8 }
 0xa93   :  { %7693 = vmatpush3.bf16.msra.mxu1 %v9204_v44 }
 0xa94   :  { %7694 = vmatprep.subr.bf16.mxu1 %v8700_v8 }
 0xa97   :  { %7696 = vmatpush3.bf16.msra.mxu1 %v9237_v58 }
 0xa98   :  { %7697 = vmatprep.subr.bf16.mxu1 %v8700_v8 }
 0xa9b   :  { %7699 = vmatpush3.bf16.msra.mxu1 %v9240_v20 }
 0xa9c   :  { %7700 = vmatprep.subr.bf16.mxu1 %v8700_v8 }
 0xa9f   :  { %7702 = vmatpush3.bf16.msra.mxu1 %v9246_v22 }
 0xaa0   :  { %7703 = vmatprep.subr.bf16.mxu1 %v8700_v8 }
 0xaa3   :  { %7705 = vmatpush3.bf16.msra.mxu1 %v9255_v25 }
 0xaa4   :  { %7730 = vmatprep.subr.bf16.mxu1 %v8700_v8 }
 0xb59   :  { %v2572_v16 = vpop.f32.mrb[22].mxu1 }
 0xb5a   :  { %v2576_v17 = vadd.f32 %v2572_v16, %v9294_v50  ;;  %v6324_v18 = vpop.f32.mrb[23].mxu1  ;;  %v3015_v50 = vld [vmem:[#allocation11 + $0x88] sm:$0xff] }
 0xb5b   :  { %v7786_v51 = vpack.c.bf16 %v3015_v50, %v3014_v48  ;;  %v3019_v18 = vld [vmem:[#allocation11 + $0xa8] sm:$0xff] }
 0xb5c   :  { %8413 = vtanh.f32 %v2576_v17  ;;  %v3018_v17 = vld [vmem:[#allocation11 + $0xa0] sm:$0xff] }
 0xb66   :  { %v9371_v49 = vpop.eup %8413 }
 0xb67   :  { %6358 = vmatmul.mubr.f32.vlgmr.msra.gmra.mrb[20].mxu0 %v9371_v49 }
 0xb68   :  { %7708 = vmatpush3.bf16.msra.mxu0 %v9193_v35  ;;  %6427 = vmatprep.mubr.msk.f32.mxu0 %vm8699_vm0, %v8698_v0 }
 0xb69   :  { %7709 = vmatprep.subr.bf16.mxu0 %v8700_v8 }
 0xb6c   :  { %7711 = vmatpush3.bf16.msra.mxu0 %v9196_v37 }
 0xb6d   :  { %7712 = vmatprep.subr.bf16.mxu0 %v8700_v8 }
 0xb70   :  { %7714 = vmatpush3.bf16.msra.mxu0 %v9200_v41 }
 0xb71   :  { %7715 = vmatprep.subr.bf16.mxu0 %v8700_v8 }
 0xb74   :  { %7717 = vmatpush3.bf16.msra.mxu0 %v9204_v44 }
 0xb75   :  { %7718 = vmatprep.subr.bf16.mxu0 %v8700_v8 }
 0xb78   :  { %7720 = vmatpush3.bf16.msra.mxu0 %v9237_v58 }
 0xb79   :  { %7721 = vmatprep.subr.bf16.mxu0 %v8700_v8 }
 0xb7c   :  { %7723 = vmatpush3.bf16.msra.mxu0 %v9240_v20 }
 0xb7d   :  { %7724 = vmatprep.subr.bf16.mxu0 %v8700_v8 }
 0xb80   :  { %7726 = vmatpush3.bf16.msra.mxu0 %v9246_v22 }
 0xb81   :  { %7727 = vmatprep.subr.bf16.mxu0 %v8700_v8 }
 0xb84   :  { %7729 = vmatpush3.bf16.msra.mxu0 %v9255_v25 }
 0xc3a   :  { %v2646_v54 = vpop.f32.mrb[20].mxu0 }
 0xc3b   :  { %v2650_v62 = vadd.f32 %v2646_v54, %v9284_v36  ;;  %v6359_v19 = vpop.f32.mrb[21].mxu0  ;;  %v7774_v36 = vpack.c.bf16 %v2895_v34, %v2894_v33  ;;  %v7794_v54 = vpack.c.bf16 %v3019_v18, %v3018_v17  ;;  %v3165_v34 = vld [vmem:[#allocation12 + $0x168] sm:$0xff] }
 0xc3c   :  { %v3021_v19 = vld [vmem:[#allocation11 + $0xb8] sm:$0xff] }
 0xc3d   :  { %8415 = vtanh.f32 %v2650_v62  ;;  %v3020_v62 = vld [vmem:[#allocation11 + $0xb0] sm:$0xff] }
 0xc47   :  { %v9392_v10 = vpop.eup %8415 }
 0xc48   :  { %6393 = vmatmul.mubr.f32.vlgmr.msra.gmra.mrb[24].mxu1 %v9392_v10 }
 0xc49   :  { %7732 = vmatpush3.bf16.msra.mxu1 %v9193_v35  ;;  %6462 = vmatprep.mubr.msk.f32.mxu1 %vm8699_vm0, %v8698_v0  ;;  %v2884_v35 = vld [vmem:[#allocation9 + $0x80] sm:$0xff] }
 0xc4a   :  { %7733 = vmatprep.subr.bf16.mxu1 %v8700_v8 }
 0xc4d   :  { %7735 = vmatpush3.bf16.msra.mxu1 %v9196_v37  ;;  %v2885_v37 = vld [vmem:[#allocation9 + $0x88] sm:$0xff] }
 0xc4e   :  { %7736 = vmatprep.subr.bf16.mxu1 %v8700_v8 }
 0xc51   :  { %7738 = vmatpush3.bf16.msra.mxu1 %v9200_v41  ;;  %v7754_v41 = vpack.c.bf16 %v2885_v37, %v2884_v35  ;;  %v3022_v35 = vld [vmem:[#allocation11 + $0xc0] sm:$0xff]  ;;  %v3023_v37 = vld [vmem:[#allocation11 + $0xc8] sm:$0xff] }
 0xc52   :  { %7739 = vmatprep.subr.bf16.mxu1 %v8700_v8 }
 0xc53   :  { %7755 = vmatprep.subr.bf16.mxu0 %v7754_v41 }
 0xc55   :  { %7741 = vmatpush3.bf16.msra.mxu1 %v9204_v44 }
 0xc56   :  { %7742 = vmatprep.subr.bf16.mxu1 %v8700_v8 }
 0xc59   :  { %7744 = vmatpush3.bf16.msra.mxu1 %v9237_v58 }
 0xc5a   :  { %7745 = vmatprep.subr.bf16.mxu1 %v8700_v8 }
 0xc5d   :  { %7747 = vmatpush3.bf16.msra.mxu1 %v9240_v20  ;;  %v7758_v20 = vpack.c.bf16 %v2887_v24, %v2886_v23  ;;  %v3026_v23 = vld [vmem:[#allocation11 + $0xe0] sm:$0xff]  ;;  %v3027_v24 = vld [vmem:[#allocation11 + $0xe8] sm:$0xff] }
 0xc5e   :  { %7748 = vmatprep.subr.bf16.mxu1 %v8700_v8 }
 0xc61   :  { %7750 = vmatpush3.bf16.msra.mxu1 %v9246_v22  ;;  %v2889_v22 = vld [vmem:[#allocation9 + $0xa8] sm:$0xff] }
 0xc62   :  { %7751 = vmatprep.subr.bf16.mxu1 %v8700_v8 }
 0xc65   :  { %7753 = vmatpush3.bf16.msra.mxu1 %v9255_v25  ;;  %v7762_v25 = vpack.c.bf16 %v2889_v22, %v2888_v27  ;;  %v3028_v22 = vld [vmem:[#allocation11 + $0xf0] sm:$0xff] }
 0xc66   :  { %7787 = vmatprep.subr.bf16.mxu1 %v7786_v51 }
 0xd1b   :  { %v2720_v44 = vpop.f32.mrb[24].mxu1 }
 0xd1c   :  { %v2724_v21 = vadd.f32 %v2720_v44, %v9286_v39  ;;  %v6394_v58 = vpop.f32.mrb[25].mxu1  ;;  %v2897_v39 = vld [vmem:[#allocation9 + $0xe8] sm:$0xff]  ;;  %v3024_v44 = vld [vmem:[#allocation11 + $0xd0] sm:$0xff] }
 0xd1d   :  { %v7778_v42 = vpack.c.bf16 %v2897_v39, %v2896_v38  ;;  %v3166_v38 = vld [vmem:[#allocation12 + $0x170] sm:$0xff]  ;;  %v3167_v39 = vld [vmem:[#allocation12 + $0x178] sm:$0xff] }
 0xd1e   :  { %8417 = vtanh.f32 %v2724_v21  ;;  %v3025_v21 = vld [vmem:[#allocation11 + $0xd8] sm:$0xff] }
 0xd1f   :  { %v7806_v58 = vpack.c.bf16 %v3025_v21, %v3024_v44 }
 0xd28   :  { %v9413_v26 = vpop.eup %8417 }
 0xd29   :  { %6428 = vmatmul.mubr.f32.vlgmr.msra.gmra.mrb[22].mxu0 %v9413_v26 }
 0xd2a   :  { %7757 = vmatpush3.bf16.msra.mxu0 %v7754_v41  ;;  %6497 = vmatprep.mubr.f32.mxu0 %v9306_v6  ;;  %v7802_v41 = vpack.c.bf16 %v3023_v37, %v3022_v35 }
 0xd2b   :  { %7759 = vmatprep.subr.bf16.mxu0 %v7758_v20 }
 0xd2e   :  { %7761 = vmatpush3.bf16.msra.mxu0 %v7758_v20  ;;  %v7810_v20 = vpack.c.bf16 %v3027_v24, %v3026_v23 }
 0xd2f   :  { %7763 = vmatprep.subr.bf16.mxu0 %v7762_v25 }
 0xd32   :  { %7765 = vmatpush3.bf16.msra.mxu0 %v7762_v25  ;;  %v3029_v25 = vld [vmem:[#allocation11 + $0xf8] sm:$0xff] }
 0xd33   :  { %7767 = vmatprep.subr.bf16.mxu0 %v7766_v40  ;;  %v7814_v29 = vpack.c.bf16 %v3029_v25, %v3028_v22 }
 0xd36   :  { %7769 = vmatpush3.bf16.msra.mxu0 %v7766_v40 }
 0xd37   :  { %7771 = vmatprep.subr.bf16.mxu0 %v7770_v32 }
 0xd3a   :  { %7773 = vmatpush3.bf16.msra.mxu0 %v7770_v32  ;;  %v3163_v32 = vld [vmem:[#allocation12 + $0x158] sm:$0xff] }
 0xd3b   :  { %7775 = vmatprep.subr.bf16.mxu0 %v7774_v36 }
 0xd3e   :  { %7777 = vmatpush3.bf16.msra.mxu0 %v7774_v36 }
 0xd3f   :  { %7779 = vmatprep.subr.bf16.mxu0 %v7778_v42 }
 0xd42   :  { %7781 = vmatpush3.bf16.msra.mxu0 %v7778_v42  ;;  %v9485_v42 = vpack.c.bf16 %v3167_v39, %v3166_v38  ;;  %v3771_v38 = vld [vmem:[#allocation9 + $0x110] sm:$0xff]  ;;  %v3772_v39 = vld [vmem:[#allocation9 + $0x118] sm:$0xff] }
 0xd43   :  { %7783 = vmatprep.subr.bf16.mxu0 %v7782_v47 }
 0xd46   :  { %7785 = vmatpush3.bf16.msra.mxu0 %v7782_v47 }
 0xd47   :  { %7818 = vmatprep.subr.bf16.mxu0 %v8700_v8 }
 0xd49   :  { %6498 = vmatmul.mubr.f32.vlgmr.msra.gmra.mrb[24].mxu0 %v9327_v11 }
 0xd4a   :  { %6500 = vmatprep.mubr.f32.mxu0 %v9349_v15  ;;  %7820 = vmatpush3.bf16.msra.mxu0 %v9423_v56 }
 0xd4b   :  { %7821 = vmatprep.subr.bf16.mxu0 %v8700_v8 }
 0xd4d   :  { %6501 = vmatmul.mubr.f32.gmra.mrb[26].mxu0 %v9371_v49 }
 0xd4e   :  { %6503 = vmatprep.mubr.f32.mxu0 %v9392_v10  ;;  %7823 = vmatpush3.bf16.msra.mxu0 %v9426_v59 }
 0xd4f   :  { %7824 = vmatprep.subr.bf16.mxu0 %v8700_v8 }
 0xd51   :  { %6504 = vmatmul.mubr.f32.gmra.mrb[28].mxu0 %v9413_v26 }
 0xd52   :  { %7826 = vmatpush3.bf16.msra.mxu0 %v9430_v63 }
 0xd53   :  { %7827 = vmatprep.subr.bf16.mxu0 %v8700_v8 }
 0xd56   :  { %7829 = vmatpush3.bf16.msra.mxu0 %v9434_v5 }
 0xd57   :  { %7830 = vmatprep.subr.bf16.mxu0 %v8700_v8 }
 0xdfc   :  { %v2794_v7 = vpop.f32.mrb[22].mxu0 }
 0xdfd   :  { %v2798_v45 = vadd.f32 %v2794_v7, %v9304_v3  ;;  %v6429_v9 = vpop.f32.mrb[23].mxu0  ;;  %v7798_v3 = vpack.c.bf16 %v3021_v19, %v3020_v62 }
 0xdff   :  { %8419 = vtanh.f32 %v2798_v45 }
 0xe09   :  { %v8420_v16 = vpop.eup %8419 }
 0xe0a   :  { %6463 = vmatmul.mubr.f32.vlgmr.msra.gmra.mrb[26].mxu1 %v8420_v16  ;;  %6506 = vmatprep.mubr.f32.mxu0 %v8420_v16 }
 0xe0b   :  { %7789 = vmatpush3.bf16.msra.mxu1 %v7786_v51  ;;  %6541 = vmatprep.mubr.f32.mxu1 %v9306_v6  ;;  %v4961_v51 = vld [vmem:[%s9921_s6 + $0x2] ss:$0 sm:$0xff] }
 0xe0c   :  { %7791 = vmatprep.subr.bf16.mxu1 %v7790_v14 }
 0xe0f   :  { %7793 = vmatpush3.bf16.msra.mxu1 %v7790_v14 }
 0xe10   :  { %7795 = vmatprep.subr.bf16.mxu1 %v7794_v54 }
 0xe13   :  { %7797 = vmatpush3.bf16.msra.mxu1 %v7794_v54 }
 0xe14   :  { %7799 = vmatprep.subr.bf16.mxu1 %v7798_v3 }
 0xe17   :  { %7801 = vmatpush3.bf16.msra.mxu1 %v7798_v3 }
 0xe18   :  { %7803 = vmatprep.subr.bf16.mxu1 %v7802_v41 }
 0xe1b   :  { %7805 = vmatpush3.bf16.msra.mxu1 %v7802_v41 }
 0xe1c   :  { %v9441_v6 = vpop.f32.mrb[24].mxu0  ;;  %7807 = vmatprep.subr.bf16.mxu1 %v7806_v58 }
 0xe1d   :  { %v9443_v27 = vpop.f32.mrb[25].mxu0  ;;  %v2980_v14 = vadd.f32 %v9441_v6, %v4961_v51 }
 0xe1e   :  { %v2975_v13 = vadd.f32 %v4961_v51, %v9443_v27 }
 0xe1f   :  { %7809 = vmatpush3.bf16.msra.mxu1 %v7806_v58 }
 0xe20   :  { %v9445_v28 = vpop.f32.mrb[26].mxu0  ;;  %7811 = vmatprep.subr.bf16.mxu1 %v7810_v20 }
 0xe21   :  { %v9447_v40 = vpop.f32.mrb[27].mxu0  ;;  %v2990_v4 = vadd.f32 %v9445_v28, %v4961_v51 }
 0xe22   :  { %v2985_v2 = vadd.f32 %v4961_v51, %v9447_v40 }
 0xe23   :  { %7813 = vmatpush3.bf16.msra.mxu1 %v7810_v20 }
 0xe24   :  { %v9449_v30 = vpop.f32.mrb[28].mxu0  ;;  %7815 = vmatprep.subr.bf16.mxu1 %v7814_v29 }
 0xe25   :  { %v9451_v31 = vpop.f32.mrb[29].mxu0  ;;  %v3000_v53 = vadd.f32 %v9449_v30, %v4961_v51 }
 0xe26   :  { %v2995_v52 = vadd.f32 %v4961_v51, %v9451_v31 }
 0xe27   :  { %7817 = vmatpush3.bf16.msra.mxu1 %v7814_v29 }
 0xe28   :  { %7842 = vmatprep.subr.bf16.mxu1 %v8700_v8 }
 0xe2a   :  { %6542 = vmatmul.mubr.f32.vlgmr.msra.gmra.mrb[28].mxu1 %v9327_v11  ;;  %v3160_v11 = vld [vmem:[#allocation12 + $0x140] sm:$0xff] }
 0xe2b   :  { %6544 = vmatprep.mubr.f32.mxu1 %v9349_v15  ;;  %7844 = vmatpush3.bf16.msra.mxu1 %v9423_v56  ;;  %v3161_v15 = vld [vmem:[#allocation12 + $0x148] sm:$0xff] }
 0xe2c   :  { %7845 = vmatprep.subr.bf16.mxu1 %v8700_v8 }
 0xe2e   :  { %6545 = vmatmul.mubr.f32.gmra.mrb[30].mxu1 %v9371_v49  ;;  %v9467_v49 = vpack.c.bf16 %v3161_v15, %v3160_v11 }
 0xe2f   :  { %6547 = vmatprep.mubr.f32.mxu1 %v9392_v10  ;;  %7847 = vmatpush3.bf16.msra.mxu1 %v9426_v59  ;;  %v3162_v10 = vld [vmem:[#allocation12 + $0x150] sm:$0xff] }
 0xe30   :  { %7848 = vmatprep.subr.bf16.mxu1 %v8700_v8  ;;  %7832 = vmatpush3.bf16.msra.mxu0 %v9467_v49  ;;  %v9470_v33 = vpack.c.bf16 %v3163_v32, %v3162_v10 }
 0xe31   :  { %7833 = vmatprep.subr.bf16.mxu0 %v8700_v8 }
 0xe32   :  { %6548 = vmatmul.mubr.f32.gmra.mrb[32].mxu1 %v9413_v26  ;;  %v3164_v26 = vld [vmem:[#allocation12 + $0x160] sm:$0xff] }
 0xe33   :  { %6550 = vmatprep.mubr.f32.mxu1 %v8420_v16  ;;  %7850 = vmatpush3.bf16.msra.mxu1 %v9430_v63  ;;  %v9476_v36 = vpack.c.bf16 %v3165_v34, %v3164_v26 }
 0xe34   :  { %7851 = vmatprep.subr.bf16.mxu1 %v8700_v8  ;;  %7835 = vmatpush3.bf16.msra.mxu0 %v9470_v33 }
 0xe35   :  { %7836 = vmatprep.subr.bf16.mxu0 %v8700_v8 }
 0xe37   :  { %7853 = vmatpush3.bf16.msra.mxu1 %v9434_v5 }
 0xe38   :  { %7854 = vmatprep.subr.bf16.mxu1 %v8700_v8  ;;  %7838 = vmatpush3.bf16.msra.mxu0 %v9476_v36 }
 0xe39   :  { %7839 = vmatprep.subr.bf16.mxu0 %v8700_v8 }
 0xe3b   :  { %7856 = vmatpush3.bf16.msra.mxu1 %v9467_v49 }
 0xe3c   :  { %7857 = vmatprep.subr.bf16.mxu1 %v8700_v8  ;;  %7841 = vmatpush3.bf16.msra.mxu0 %v9485_v42 }
 0xe3d   :  { %7866 = vmatprep.subr.bf16.mxu0 %v8700_v8 }
 0xe3f   :  { %7859 = vmatpush3.bf16.msra.mxu1 %v9470_v33 }
 0xe40   :  { %7860 = vmatprep.subr.bf16.mxu1 %v8700_v8 }
 0xe43   :  { %7862 = vmatpush3.bf16.msra.mxu1 %v9476_v36 }
 0xe44   :  { %7863 = vmatprep.subr.bf16.mxu1 %v8700_v8 }
 0xe47   :  { %7865 = vmatpush3.bf16.msra.mxu1 %v9485_v42 }
 0xe48   :  { %7890 = vmatprep.subr.bf16.mxu1 %v8700_v8 }
 0xedd   :  { %v2868_v43 = vpop.f32.mrb[26].mxu1 }
 0xede   :  { %v2872_v46 = vadd.f32 %v2868_v43, %v9302_v1  ;;  %v6464_v47 = vpop.f32.mrb[27].mxu1 }
 0xedf   :  { %v3775_v47 = vld [vmem:[#allocation9 + $0x130] sm:$0xff] }
 0xee0   :  { %8421 = vtanh.f32 %v2872_v46  ;;  %v3773_v46 = vld [vmem:[#allocation9 + $0x120] sm:$0xff] }
 0xeea   :  { %v8422_v48 = vpop.eup %8421 }
 0xeeb   :  { %6507 = vmatmul.mubr.f32.gmra.mrb[30].mxu0 %v8422_v48  ;;  %6551 = vmatmul.mubr.f32.gmra.mrb[34].mxu1 %v8422_v48  ;;  %v3776_v48 = vld [vmem:[#allocation9 + $0x138] sm:$0xff] }
 0xeec   :  { %6585 = vmatprep.mubr.msk.f32.mxu0 %vm8699_vm0, %v8698_v0  ;;  %6620 = vmatprep.mubr.msk.f32.mxu1 %vm8699_vm0, %v8698_v0 }
 0xeef   :  { %6586 = vmatmul.mubr.f32.vlgmr.msra.gmra.mrb[32].mxu0 %v8698_v0 }
 0xef0   :  { %7868 = vmatpush3.bf16.msra.mxu0 %v9423_v56  ;;  %6655 = vmatprep.mubr.msk.f32.mxu0 %vm8699_vm0, %v8698_v0 }
 0xef1   :  { %7869 = vmatprep.subr.bf16.mxu0 %v8700_v8 }
 0xef4   :  { %7871 = vmatpush3.bf16.msra.mxu0 %v9426_v59 }
 0xef5   :  { %7872 = vmatprep.subr.bf16.mxu0 %v8700_v8 }
 0xef8   :  { %7874 = vmatpush3.bf16.msra.mxu0 %v9430_v63 }
 0xef9   :  { %7875 = vmatprep.subr.bf16.mxu0 %v8700_v8 }
 0xefc   :  { %7877 = vmatpush3.bf16.msra.mxu0 %v9434_v5 }
 0xefd   :  { %v6543_v1 = vpop.f32.mrb[28].mxu1  ;;  %7878 = vmatprep.subr.bf16.mxu0 %v8700_v8 }
 0xefe   :  { %v3096_v50 = vpop.f32.mrb[29].mxu1 }
 0xf00   :  { %7880 = vmatpush3.bf16.msra.mxu0 %v9467_v49 }
 0xf01   :  { %v6546_v55 = vpop.f32.mrb[30].mxu1  ;;  %7881 = vmatprep.subr.bf16.mxu0 %v8700_v8 }
 0xf02   :  { %v9514_v57 = vadd.f32 %v6546_v55, %v2995_v52  ;;  %v3106_v60 = vpop.f32.mrb[31].mxu1  ;;  %v3780_v55 = vld [vmem:[#allocation9 + $0x158] sm:$0xff] }
 0xf03   :  { %v9516_v61 = vadd.f32 %v3106_v60, %v3000_v53  ;;  %v3779_v53 = vld [vmem:[#allocation9 + $0x150] sm:$0xff]  ;;  %v3781_v60 = vld [vmem:[#allocation9 + $0x160] sm:$0xff] }
 0xf04   :  { %7883 = vmatpush3.bf16.msra.mxu0 %v9470_v33 }
 0xf05   :  { %v6549_v7 = vpop.f32.mrb[32].mxu1  ;;  %7884 = vmatprep.subr.bf16.mxu0 %v8700_v8 }
 0xf06   :  { %v9522_v45 = vadd.f32 %v6549_v7, %v2985_v2  ;;  %v3116_v9 = vpop.f32.mrb[33].mxu1  ;;  %v3784_v7 = vld [vmem:[#allocation9 + $0x178] sm:$0xff] }
 0xf07   :  { %v9524_v12 = vadd.f32 %v3116_v9, %v2990_v4  ;;  %v3783_v4 = vld [vmem:[#allocation9 + $0x170] sm:$0xff]  ;;  %v3899_v9 = vld [vmem:[#allocation11 + $0x100] sm:$0xff] }
 0xf08   :  { %7886 = vmatpush3.bf16.msra.mxu0 %v9476_v36 }
 0xf09   :  { %7887 = vmatprep.subr.bf16.mxu0 %v8700_v8 }
 0xf0c   :  { %7889 = vmatpush3.bf16.msra.mxu0 %v9485_v42 }
 0xf0d   :  { %7914 = vmatprep.subr.bf16.mxu0 %v8700_v8 }
 0xfbe   :  { %v6508_v16 = vpop.f32.mrb[30].mxu0  ;;  %v6552_v17 = vpop.f32.mrb[34].mxu1 }
 0xfbf   :  { %v3010_v18 = vadd.f32 %v6508_v16, %v4961_v51  ;;  %v3135_v54 = vadd.f32 %v6552_v17, %v2975_v13  ;;  %v3004_v62 = vpop.f32.mrb[31].mxu0  ;;  %v3126_v19 = vpop.f32.mrb[35].mxu1  ;;  %v4038_v16 = vld [vmem:[#allocation12 + $0x188] sm:$0xff]  ;;  %v4039_v17 = vld [vmem:[#allocation12 + $0x190] sm:$0xff] }
 0xfc0   :  { %v3005_v3 = vadd.f32 %v4961_v51, %v3004_v62  ;;  %v3137_v35 = vadd.f32 %v3126_v19, %v2980_v14  ;;  %v3778_v51 = vld [vmem:[#allocation9 + $0x148] sm:$0xff]  ;;  %v4037_v14 = vld [vmem:[#allocation12 + $0x180] sm:$0xff] }
 0xfc1   :  { %v9532_v37 = vadd.f32 %v3096_v50, %v3010_v18  ;;  %v3777_v50 = vld [vmem:[#allocation9 + $0x140] sm:$0xff]  ;;  %v9653_v18 = vpack.c.bf16 %v4038_v16, %v4037_v14 }
 0xfc2   :  { %v3235_v41 = vpop.f32.mrb[32].mxu0  ;;  %v9534_v44 = vadd.f32 %v6543_v1, %v3005_v3  ;;  %v8022_v1 = vpack.c.bf16 %v3776_v48, %v3775_v47  ;;  %v8026_v52 = vpack.c.bf16 %v3778_v51, %v3777_v50  ;;  %v4041_v19 = vld [vmem:[#allocation12 + $0x1a0] sm:$0xff]  ;;  %v4042_v3 = vld [vmem:[#allocation12 + $0x1a8] sm:$0xff] }
 0xfc3   :  { %v3239_v21 = vadd.f32 %v3235_v41, %v3135_v54  ;;  %v6587_v58 = vpop.f32.mrb[33].mxu0  ;;  %v4040_v54 = vld [vmem:[#allocation12 + $0x198] sm:$0xff]  ;;  %v4043_v41 = vld [vmem:[#allocation12 + $0x1b0] sm:$0xff] }
 0xfc4   :  { %v9656_v62 = vpack.c.bf16 %v4040_v54, %v4039_v17 }
 0xfc5   :  { %8423 = vtanh.f32 %v3239_v21  ;;  %v4044_v21 = vld [vmem:[#allocation12 + $0x1b8] sm:$0xff] }
 0xfc6   :  { %v9664_v58 = vpack.c.bf16 %v4044_v21, %v4043_v41 }
 0xfcf   :  { %v9536_v23 = vpop.eup %8423 }
 0xfd0   :  { %6621 = vmatmul.mubr.f32.vlgmr.msra.gmra.mrb[36].mxu1 %v9536_v23 }
 0xfd1   :  { %7892 = vmatpush3.bf16.msra.mxu1 %v9423_v56  ;;  %6690 = vmatprep.mubr.msk.f32.mxu1 %vm8699_vm0, %v8698_v0 }
 0xfd2   :  { %7893 = vmatprep.subr.bf16.mxu1 %v8700_v8 }
 0xfd5   :  { %7895 = vmatpush3.bf16.msra.mxu1 %v9426_v59 }
 0xfd6   :  { %7896 = vmatprep.subr.bf16.mxu1 %v8700_v8 }
 0xfd9   :  { %7898 = vmatpush3.bf16.msra.mxu1 %v9430_v63 }
 0xfda   :  { %7899 = vmatprep.subr.bf16.mxu1 %v8700_v8 }
 0xfdd   :  { %7901 = vmatpush3.bf16.msra.mxu1 %v9434_v5 }
 0xfde   :  { %7902 = vmatprep.subr.bf16.mxu1 %v8700_v8 }
 0xfe1   :  { %7904 = vmatpush3.bf16.msra.mxu1 %v9467_v49 }
 0xfe2   :  { %7905 = vmatprep.subr.bf16.mxu1 %v8700_v8 }
 0xfe5   :  { %7907 = vmatpush3.bf16.msra.mxu1 %v9470_v33 }
 0xfe6   :  { %7908 = vmatprep.subr.bf16.mxu1 %v8700_v8 }
 0xfe9   :  { %7910 = vmatpush3.bf16.msra.mxu1 %v9476_v36 }
 0xfea   :  { %7911 = vmatprep.subr.bf16.mxu1 %v8700_v8 }
 0xfed   :  { %7913 = vmatpush3.bf16.msra.mxu1 %v9485_v42 }
 0xfee   :  { %7938 = vmatprep.subr.bf16.mxu1 %v8700_v8 }
0x10a3   :  { %v3309_v24 = vpop.f32.mrb[36].mxu1 }
0x10a4   :  { %v3313_v6 = vadd.f32 %v3309_v24, %v3137_v35  ;;  %v6622_v20 = vpop.f32.mrb[37].mxu1  ;;  %v9660_v35 = vpack.c.bf16 %v4042_v3, %v4041_v19 }
0x10a6   :  { %8425 = vtanh.f32 %v3313_v6 }
0x10b0   :  { %v9557_v27 = vpop.eup %8425 }
0x10b1   :  { %6656 = vmatmul.mubr.f32.vlgmr.msra.gmra.mrb[34].mxu0 %v9557_v27 }
0x10b2   :  { %7916 = vmatpush3.bf16.msra.mxu0 %v9423_v56  ;;  %6725 = vmatprep.mubr.msk.f32.mxu0 %vm8699_vm0, %v8698_v0 }
0x10b3   :  { %7917 = vmatprep.subr.bf16.mxu0 %v8700_v8 }
0x10b6   :  { %7919 = vmatpush3.bf16.msra.mxu0 %v9426_v59 }
0x10b7   :  { %7920 = vmatprep.subr.bf16.mxu0 %v8700_v8 }
0x10ba   :  { %7922 = vmatpush3.bf16.msra.mxu0 %v9430_v63 }
0x10bb   :  { %7923 = vmatprep.subr.bf16.mxu0 %v8700_v8 }
0x10be   :  { %7925 = vmatpush3.bf16.msra.mxu0 %v9434_v5 }
0x10bf   :  { %7926 = vmatprep.subr.bf16.mxu0 %v8700_v8 }
0x10c2   :  { %7928 = vmatpush3.bf16.msra.mxu0 %v9467_v49 }
0x10c3   :  { %7929 = vmatprep.subr.bf16.mxu0 %v8700_v8 }
0x10c6   :  { %7931 = vmatpush3.bf16.msra.mxu0 %v9470_v33 }
0x10c7   :  { %7932 = vmatprep.subr.bf16.mxu0 %v8700_v8 }
0x10ca   :  { %7934 = vmatpush3.bf16.msra.mxu0 %v9476_v36 }
0x10cb   :  { %7935 = vmatprep.subr.bf16.mxu0 %v8700_v8 }
0x10ce   :  { %7937 = vmatpush3.bf16.msra.mxu0 %v9485_v42 }
0x10cf   :  { %7962 = vmatprep.subr.bf16.mxu0 %v8700_v8 }
0x1184   :  { %v3383_v22 = vpop.f32.mrb[34].mxu0 }
0x1185   :  { %v3387_v25 = vadd.f32 %v3383_v22, %v9522_v45  ;;  %v6657_v28 = vpop.f32.mrb[35].mxu0  ;;  %v8038_v45 = vpack.c.bf16 %v3784_v7, %v3783_v4  ;;  %v3901_v22 = vld [vmem:[#allocation11 + $0x110] sm:$0xff] }
0x1187   :  { %8427 = vtanh.f32 %v3387_v25  ;;  %v3902_v25 = vld [vmem:[#allocation11 + $0x118] sm:$0xff] }
0x1188   :  { %v8046_v28 = vpack.c.bf16 %v3902_v25, %v3901_v22 }
0x1191   :  { %v9579_v29 = vpop.eup %8427 }
0x1192   :  { %6691 = vmatmul.mubr.f32.vlgmr.msra.gmra.mrb[38].mxu1 %v9579_v29 }
0x1193   :  { %7940 = vmatpush3.bf16.msra.mxu1 %v9423_v56  ;;  %6760 = vmatprep.mubr.msk.f32.mxu1 %vm8699_vm0, %v8698_v0 }
0x1194   :  { %7941 = vmatprep.subr.bf16.mxu1 %v8700_v8 }
0x1197   :  { %7943 = vmatpush3.bf16.msra.mxu1 %v9426_v59 }
0x1198   :  { %7944 = vmatprep.subr.bf16.mxu1 %v8700_v8 }
0x119b   :  { %7946 = vmatpush3.bf16.msra.mxu1 %v9430_v63 }
0x119c   :  { %7947 = vmatprep.subr.bf16.mxu1 %v8700_v8 }
0x119f   :  { %7949 = vmatpush3.bf16.msra.mxu1 %v9434_v5 }
0x11a0   :  { %7950 = vmatprep.subr.bf16.mxu1 %v8700_v8 }
0x11a3   :  { %7952 = vmatpush3.bf16.msra.mxu1 %v9467_v49 }
0x11a4   :  { %7953 = vmatprep.subr.bf16.mxu1 %v8700_v8 }
0x11a7   :  { %7955 = vmatpush3.bf16.msra.mxu1 %v9470_v33 }
0x11a8   :  { %7956 = vmatprep.subr.bf16.mxu1 %v8700_v8 }
0x11ab   :  { %7958 = vmatpush3.bf16.msra.mxu1 %v9476_v36 }
0x11ac   :  { %7959 = vmatprep.subr.bf16.mxu1 %v8700_v8 }
0x11af   :  { %7961 = vmatpush3.bf16.msra.mxu1 %v9485_v42 }
0x11b0   :  { %7986 = vmatprep.subr.bf16.mxu1 %v8700_v8 }
0x1265   :  { %v3457_v40 = vpop.f32.mrb[38].mxu1 }
0x1266   :  { %v3461_v30 = vadd.f32 %v3457_v40, %v9524_v12  ;;  %v6692_v31 = vpop.f32.mrb[39].mxu1  ;;  %v3900_v12 = vld [vmem:[#allocation11 + $0x108] sm:$0xff] }
0x1267   :  { %v8042_v13 = vpack.c.bf16 %v3900_v12, %v3899_v9  ;;  %v3904_v31 = vld [vmem:[#allocation11 + $0x128] sm:$0xff] }
0x1268   :  { %8429 = vtanh.f32 %v3461_v30  ;;  %v3903_v30 = vld [vmem:[#allocation11 + $0x120] sm:$0xff] }
0x1272   :  { %v9601_v11 = vpop.eup %8429 }
0x1273   :  { %6726 = vmatmul.mubr.f32.vlgmr.msra.gmra.mrb[36].mxu0 %v9601_v11 }
0x1274   :  { %7964 = vmatpush3.bf16.msra.mxu0 %v9423_v56  ;;  %6795 = vmatprep.mubr.msk.f32.mxu0 %vm8699_vm0, %v8698_v0 }
0x1275   :  { %7965 = vmatprep.subr.bf16.mxu0 %v8700_v8 }
0x1278   :  { %7967 = vmatpush3.bf16.msra.mxu0 %v9426_v59 }
0x1279   :  { %7968 = vmatprep.subr.bf16.mxu0 %v8700_v8 }
0x127c   :  { %7970 = vmatpush3.bf16.msra.mxu0 %v9430_v63 }
0x127d   :  { %7971 = vmatprep.subr.bf16.mxu0 %v8700_v8 }
0x1280   :  { %7973 = vmatpush3.bf16.msra.mxu0 %v9434_v5 }
0x1281   :  { %7974 = vmatprep.subr.bf16.mxu0 %v8700_v8 }
0x1284   :  { %7976 = vmatpush3.bf16.msra.mxu0 %v9467_v49 }
0x1285   :  { %7977 = vmatprep.subr.bf16.mxu0 %v8700_v8 }
0x1288   :  { %7979 = vmatpush3.bf16.msra.mxu0 %v9470_v33 }
0x1289   :  { %7980 = vmatprep.subr.bf16.mxu0 %v8700_v8 }
0x128c   :  { %7982 = vmatpush3.bf16.msra.mxu0 %v9476_v36 }
0x128d   :  { %7983 = vmatprep.subr.bf16.mxu0 %v8700_v8 }
0x1290   :  { %7985 = vmatpush3.bf16.msra.mxu0 %v9485_v42 }
0x1346   :  { %v3531_v15 = vpop.f32.mrb[36].mxu0 }
0x1347   :  { %v3535_v10 = vadd.f32 %v3531_v15, %v9514_v57  ;;  %v6727_v32 = vpop.f32.mrb[37].mxu0  ;;  %v8030_v57 = vpack.c.bf16 %v3780_v55, %v3779_v53  ;;  %v8050_v15 = vpack.c.bf16 %v3904_v31, %v3903_v30  ;;  %v4050_v55 = vld [vmem:[#allocation12 + $0x1e8] sm:$0xff] }
0x1348   :  { %v3906_v32 = vld [vmem:[#allocation11 + $0x138] sm:$0xff] }
0x1349   :  { %8431 = vtanh.f32 %v3535_v10  ;;  %v3905_v10 = vld [vmem:[#allocation11 + $0x130] sm:$0xff] }
0x1353   :  { %v9622_v26 = vpop.eup %8431 }
0x1354   :  { %6761 = vmatmul.mubr.f32.vlgmr.msra.gmra.mrb[40].mxu1 %v9622_v26 }
0x1355   :  { %7988 = vmatpush3.bf16.msra.mxu1 %v9423_v56  ;;  %6830 = vmatprep.mubr.msk.f32.mxu1 %vm8699_vm0, %v8698_v0  ;;  %v3769_v56 = vld [vmem:[#allocation9 + $0x100] sm:$0xff] }
0x1356   :  { %7989 = vmatprep.subr.bf16.mxu1 %v8700_v8 }
0x1359   :  { %7991 = vmatpush3.bf16.msra.mxu1 %v9426_v59  ;;  %v3770_v59 = vld [vmem:[#allocation9 + $0x108] sm:$0xff] }
0x135a   :  { %7992 = vmatprep.subr.bf16.mxu1 %v8700_v8 }
0x135d   :  { %7994 = vmatpush3.bf16.msra.mxu1 %v9430_v63  ;;  %v8010_v63 = vpack.c.bf16 %v3770_v59, %v3769_v56  ;;  %v3907_v56 = vld [vmem:[#allocation11 + $0x140] sm:$0xff]  ;;  %v3908_v59 = vld [vmem:[#allocation11 + $0x148] sm:$0xff] }
0x135e   :  { %7995 = vmatprep.subr.bf16.mxu1 %v8700_v8 }
0x135f   :  { %8011 = vmatprep.subr.bf16.mxu0 %v8010_v63 }
0x1361   :  { %7997 = vmatpush3.bf16.msra.mxu1 %v9434_v5 }
0x1362   :  { %7998 = vmatprep.subr.bf16.mxu1 %v8700_v8 }
0x1365   :  { %8000 = vmatpush3.bf16.msra.mxu1 %v9467_v49 }
0x1366   :  { %8001 = vmatprep.subr.bf16.mxu1 %v8700_v8 }
0x1369   :  { %8003 = vmatpush3.bf16.msra.mxu1 %v9470_v33  ;;  %v8014_v33 = vpack.c.bf16 %v3772_v39, %v3771_v38  ;;  %v3911_v38 = vld [vmem:[#allocation11 + $0x160] sm:$0xff]  ;;  %v3912_v39 = vld [vmem:[#allocation11 + $0x168] sm:$0xff] }
0x136a   :  { %8004 = vmatprep.subr.bf16.mxu1 %v8700_v8 }
0x136d   :  { %8006 = vmatpush3.bf16.msra.mxu1 %v9476_v36  ;;  %v3774_v36 = vld [vmem:[#allocation9 + $0x128] sm:$0xff] }
0x136e   :  { %8007 = vmatprep.subr.bf16.mxu1 %v8700_v8 }
0x1371   :  { %8009 = vmatpush3.bf16.msra.mxu1 %v9485_v42  ;;  %v8018_v42 = vpack.c.bf16 %v3774_v36, %v3773_v46  ;;  %v3913_v36 = vld [vmem:[#allocation11 + $0x170] sm:$0xff] }
0x1372   :  { %8043 = vmatprep.subr.bf16.mxu1 %v8042_v13 }
0x1427   :  { %v3605_v5 = vpop.f32.mrb[40].mxu1 }
0x1428   :  { %v3609_v34 = vadd.f32 %v3605_v5, %v9516_v61  ;;  %v6762_v49 = vpop.f32.mrb[41].mxu1  ;;  %v3782_v61 = vld [vmem:[#allocation9 + $0x168] sm:$0xff]  ;;  %v3909_v5 = vld [vmem:[#allocation11 + $0x150] sm:$0xff] }
0x1429   :  { %v8034_v2 = vpack.c.bf16 %v3782_v61, %v3781_v60  ;;  %v4051_v60 = vld [vmem:[#allocation12 + $0x1f0] sm:$0xff]  ;;  %v4052_v61 = vld [vmem:[#allocation12 + $0x1f8] sm:$0xff] }
0x142a   :  { %8433 = vtanh.f32 %v3609_v34  ;;  %v3910_v34 = vld [vmem:[#allocation11 + $0x158] sm:$0xff] }
0x142b   :  { %v8062_v49 = vpack.c.bf16 %v3910_v34, %v3909_v5 }
0x1434   :  { %v9643_v43 = vpop.eup %8433 }
0x1435   :  { %6796 = vmatmul.mubr.f32.vlgmr.msra.gmra.mrb[38].mxu0 %v9643_v43 }
0x1436   :  { %8013 = vmatpush3.bf16.msra.mxu0 %v8010_v63  ;;  %6865 = vmatprep.mubr.f32.mxu0 %v9536_v23  ;;  %v8058_v63 = vpack.c.bf16 %v3908_v59, %v3907_v56 }
0x1437   :  { %8015 = vmatprep.subr.bf16.mxu0 %v8014_v33 }
0x143a   :  { %8017 = vmatpush3.bf16.msra.mxu0 %v8014_v33  ;;  %v8066_v33 = vpack.c.bf16 %v3912_v39, %v3911_v38 }
0x143b   :  { %8019 = vmatprep.subr.bf16.mxu0 %v8018_v42 }
0x143e   :  { %8021 = vmatpush3.bf16.msra.mxu0 %v8018_v42  ;;  %v3914_v42 = vld [vmem:[#allocation11 + $0x178] sm:$0xff] }
0x143f   :  { %8023 = vmatprep.subr.bf16.mxu0 %v8022_v1  ;;  %v8070_v48 = vpack.c.bf16 %v3914_v42, %v3913_v36 }
0x1442   :  { %8025 = vmatpush3.bf16.msra.mxu0 %v8022_v1 }
0x1443   :  { %8027 = vmatprep.subr.bf16.mxu0 %v8026_v52 }
0x1446   :  { %8029 = vmatpush3.bf16.msra.mxu0 %v8026_v52  ;;  %v4048_v52 = vld [vmem:[#allocation12 + $0x1d8] sm:$0xff] }
0x1447   :  { %8031 = vmatprep.subr.bf16.mxu0 %v8030_v57 }
0x144a   :  { %8033 = vmatpush3.bf16.msra.mxu0 %v8030_v57 }
0x144b   :  { %8035 = vmatprep.subr.bf16.mxu0 %v8034_v2 }
0x144e   :  { %8037 = vmatpush3.bf16.msra.mxu0 %v8034_v2  ;;  %v9715_v2 = vpack.c.bf16 %v4052_v61, %v4051_v60  ;;  %v4665_v60 = vld [vmem:[#allocation15 + $0x10] sm:$0xff] }
0x144f   :  { %8039 = vmatprep.subr.bf16.mxu0 %v8038_v45 }
0x1452   :  { %8041 = vmatpush3.bf16.msra.mxu0 %v8038_v45 }
0x1453   :  { %8074 = vmatprep.subr.bf16.mxu0 %v8700_v8 }
0x1455   :  { %6866 = vmatmul.mubr.f32.vlgmr.msra.gmra.mrb[40].mxu0 %v9557_v27 }
0x1456   :  { %6868 = vmatprep.mubr.f32.mxu0 %v9579_v29  ;;  %8076 = vmatpush3.bf16.msra.mxu0 %v9653_v18 }
0x1457   :  { %8077 = vmatprep.subr.bf16.mxu0 %v8700_v8 }
0x1459   :  { %6869 = vmatmul.mubr.f32.gmra.mrb[42].mxu0 %v9601_v11 }
0x145a   :  { %6871 = vmatprep.mubr.f32.mxu0 %v9622_v26  ;;  %8079 = vmatpush3.bf16.msra.mxu0 %v9656_v62 }
0x145b   :  { %8080 = vmatprep.subr.bf16.mxu0 %v8700_v8 }
0x145d   :  { %6872 = vmatmul.mubr.f32.gmra.mrb[44].mxu0 %v9643_v43 }
0x145e   :  { %8082 = vmatpush3.bf16.msra.mxu0 %v9660_v35 }
0x145f   :  { %8083 = vmatprep.subr.bf16.mxu0 %v8700_v8 }
0x1462   :  { %8085 = vmatpush3.bf16.msra.mxu0 %v9664_v58 }
0x1463   :  { %8086 = vmatprep.subr.bf16.mxu0 %v8700_v8 }
0x1508   :  { %v3679_v24 = vpop.f32.mrb[38].mxu0 }
0x1509   :  { %v3683_v6 = vadd.f32 %v3679_v24, %v9534_v44  ;;  %v6797_v20 = vpop.f32.mrb[39].mxu0  ;;  %v8054_v44 = vpack.c.bf16 %v3906_v32, %v3905_v10 }
0x150b   :  { %8435 = vtanh.f32 %v3683_v6 }
0x1515   :  { %v8436_v40 = vpop.eup %8435 }
0x1516   :  { %6831 = vmatmul.mubr.f32.vlgmr.msra.gmra.mrb[42].mxu1 %v8436_v40  ;;  %6874 = vmatprep.mubr.f32.mxu0 %v8436_v40 }
0x1517   :  { %8045 = vmatpush3.bf16.msra.mxu1 %v8042_v13  ;;  %6909 = vmatprep.mubr.f32.mxu1 %v9536_v23  ;;  %v4963_v13 = vld [vmem:[%s9921_s6 + $0x3] ss:$0 sm:$0xff] }
0x1518   :  { %8047 = vmatprep.subr.bf16.mxu1 %v8046_v28 }
0x151b   :  { %8049 = vmatpush3.bf16.msra.mxu1 %v8046_v28 }
0x151c   :  { %8051 = vmatprep.subr.bf16.mxu1 %v8050_v15 }
0x151f   :  { %8053 = vmatpush3.bf16.msra.mxu1 %v8050_v15 }
0x1520   :  { %8055 = vmatprep.subr.bf16.mxu1 %v8054_v44 }
0x1523   :  { %8057 = vmatpush3.bf16.msra.mxu1 %v8054_v44 }
0x1524   :  { %8059 = vmatprep.subr.bf16.mxu1 %v8058_v63 }
0x1527   :  { %8061 = vmatpush3.bf16.msra.mxu1 %v8058_v63 }
0x1528   :  { %v9671_v23 = vpop.f32.mrb[40].mxu0  ;;  %8063 = vmatprep.subr.bf16.mxu1 %v8062_v49 }
0x1529   :  { %v9673_v46 = vpop.f32.mrb[41].mxu0  ;;  %v3865_v28 = vadd.f32 %v9671_v23, %v4963_v13 }
0x152a   :  { %v3860_v25 = vadd.f32 %v4963_v13, %v9673_v46 }
0x152b   :  { %8065 = vmatpush3.bf16.msra.mxu1 %v8062_v49 }
0x152c   :  { %v9675_v47 = vpop.f32.mrb[42].mxu0  ;;  %8067 = vmatprep.subr.bf16.mxu1 %v8066_v33 }
0x152d   :  { %v9677_v1 = vpop.f32.mrb[43].mxu0  ;;  %v3875_v21 = vadd.f32 %v9675_v47, %v4963_v13 }
0x152e   :  { %v3870_v41 = vadd.f32 %v4963_v13, %v9677_v1 }
0x152f   :  { %8069 = vmatpush3.bf16.msra.mxu1 %v8066_v33 }
0x1530   :  { %v9679_v50 = vpop.f32.mrb[44].mxu0  ;;  %8071 = vmatprep.subr.bf16.mxu1 %v8070_v48 }
0x1531   :  { %v9681_v51 = vpop.f32.mrb[45].mxu0  ;;  %v3885_v16 = vadd.f32 %v9679_v50, %v4963_v13 }
0x1532   :  { %v3880_v14 = vadd.f32 %v4963_v13, %v9681_v51 }
0x1533   :  { %8073 = vmatpush3.bf16.msra.mxu1 %v8070_v48 }
0x1534   :  { %8098 = vmatprep.subr.bf16.mxu1 %v8700_v8 }
0x1536   :  { %6910 = vmatmul.mubr.f32.vlgmr.msra.gmra.mrb[44].mxu1 %v9557_v27  ;;  %v4045_v27 = vld [vmem:[#allocation12 + $0x1c0] sm:$0xff] }
0x1537   :  { %6912 = vmatprep.mubr.f32.mxu1 %v9579_v29  ;;  %8100 = vmatpush3.bf16.msra.mxu1 %v9653_v18  ;;  %v4046_v29 = vld [vmem:[#allocation12 + $0x1c8] sm:$0xff] }
0x1538   :  { %8101 = vmatprep.subr.bf16.mxu1 %v8700_v8 }
0x153a   :  { %6913 = vmatmul.mubr.f32.gmra.mrb[46].mxu1 %v9601_v11  ;;  %v9697_v11 = vpack.c.bf16 %v4046_v29, %v4045_v27 }
0x153b   :  { %6915 = vmatprep.mubr.f32.mxu1 %v9622_v26  ;;  %8103 = vmatpush3.bf16.msra.mxu1 %v9656_v62  ;;  %v4047_v26 = vld [vmem:[#allocation12 + $0x1d0] sm:$0xff] }
0x153c   :  { %8104 = vmatprep.subr.bf16.mxu1 %v8700_v8  ;;  %8088 = vmatpush3.bf16.msra.mxu0 %v9697_v11  ;;  %v9700_v53 = vpack.c.bf16 %v4048_v52, %v4047_v26 }
0x153d   :  { %8089 = vmatprep.subr.bf16.mxu0 %v8700_v8 }
0x153e   :  { %6916 = vmatmul.mubr.f32.gmra.mrb[48].mxu1 %v9643_v43  ;;  %v4049_v43 = vld [vmem:[#allocation12 + $0x1e0] sm:$0xff] }
0x153f   :  { %6918 = vmatprep.mubr.f32.mxu1 %v8436_v40  ;;  %8106 = vmatpush3.bf16.msra.mxu1 %v9660_v35  ;;  %v9706_v57 = vpack.c.bf16 %v4050_v55, %v4049_v43 }
0x1540   :  { %8107 = vmatprep.subr.bf16.mxu1 %v8700_v8  ;;  %8091 = vmatpush3.bf16.msra.mxu0 %v9700_v53 }
0x1541   :  { %8092 = vmatprep.subr.bf16.mxu0 %v8700_v8 }
0x1543   :  { %8109 = vmatpush3.bf16.msra.mxu1 %v9664_v58 }
0x1544   :  { %8110 = vmatprep.subr.bf16.mxu1 %v8700_v8  ;;  %8094 = vmatpush3.bf16.msra.mxu0 %v9706_v57 }
0x1545   :  { %8095 = vmatprep.subr.bf16.mxu0 %v8700_v8 }
0x1547   :  { %8112 = vmatpush3.bf16.msra.mxu1 %v9697_v11 }
0x1548   :  { %8113 = vmatprep.subr.bf16.mxu1 %v8700_v8  ;;  %8097 = vmatpush3.bf16.msra.mxu0 %v9715_v2 }
0x1549   :  { %8122 = vmatprep.subr.bf16.mxu0 %v8700_v8 }
0x154b   :  { %8115 = vmatpush3.bf16.msra.mxu1 %v9700_v53 }
0x154c   :  { %8116 = vmatprep.subr.bf16.mxu1 %v8700_v8 }
0x154f   :  { %8118 = vmatpush3.bf16.msra.mxu1 %v9706_v57 }
0x1550   :  { %8119 = vmatprep.subr.bf16.mxu1 %v8700_v8 }
0x1553   :  { %8121 = vmatpush3.bf16.msra.mxu1 %v9715_v2 }
0x1554   :  { %8146 = vmatprep.subr.bf16.mxu1 %v8700_v8 }
0x15e9   :  { %v3753_v4 = vpop.f32.mrb[42].mxu1 }
0x15ea   :  { %v3757_v7 = vadd.f32 %v3753_v4, %v9532_v37  ;;  %v6832_v45 = vpop.f32.mrb[43].mxu1  ;;  %v4668_v4 = vld [vmem:[#allocation15 + $0x28] sm:$0xff] }
0x15eb   :  { %v4669_v45 = vld [vmem:[#allocation15 + $0x30] sm:$0xff] }
0x15ec   :  { %8437 = vtanh.f32 %v3757_v7 }
0x15f6   :  { %v8438_v9 = vpop.eup %8437 }
0x15f7   :  { %6875 = vmatmul.mubr.f32.gmra.mrb[46].mxu0 %v8438_v9  ;;  %6919 = vmatmul.mubr.f32.gmra.mrb[50].mxu1 %v8438_v9  ;;  %v4670_v9 = vld [vmem:[#allocation15 + $0x38] sm:$0xff] }
0x15f8   :  { %6953 = vmatprep.mubr.msk.f32.mxu0 %vm8699_vm0, %v8698_v0  ;;  %6988 = vmatprep.mubr.msk.f32.mxu1 %vm8699_vm0, %v8698_v0 }
0x15fb   :  { %6954 = vmatmul.mubr.f32.vlgmr.msra.gmra.mrb[48].mxu0 %v8698_v0 }
0x15fc   :  { %8124 = vmatpush3.bf16.msra.mxu0 %v9653_v18  ;;  %7023 = vmatprep.mubr.msk.f32.mxu0 %vm8699_vm0, %v8698_v0 }
0x15fd   :  { %8125 = vmatprep.subr.bf16.mxu0 %v8700_v8 }
0x1600   :  { %8127 = vmatpush3.bf16.msra.mxu0 %v9656_v62 }
0x1601   :  { %8128 = vmatprep.subr.bf16.mxu0 %v8700_v8 }
0x1604   :  { %8130 = vmatpush3.bf16.msra.mxu0 %v9660_v35 }
0x1605   :  { %8131 = vmatprep.subr.bf16.mxu0 %v8700_v8 }
0x1608   :  { %8133 = vmatpush3.bf16.msra.mxu0 %v9664_v58 }
0x1609   :  { %v6911_v37 = vpop.f32.mrb[44].mxu1  ;;  %8134 = vmatprep.subr.bf16.mxu0 %v8700_v8 }
0x160a   :  { %v3981_v12 = vpop.f32.mrb[45].mxu1 }
0x160c   :  { %8136 = vmatpush3.bf16.msra.mxu0 %v9697_v11 }
0x160d   :  { %v6914_v17 = vpop.f32.mrb[46].mxu1  ;;  %8137 = vmatprep.subr.bf16.mxu0 %v8700_v8 }
0x160e   :  { %v9744_v54 = vadd.f32 %v6914_v17, %v3880_v14  ;;  %v3991_v19 = vpop.f32.mrb[47].mxu1  ;;  %v4674_v17 = vld [vmem:[#allocation15 + $0x58] sm:$0xff] }
0x160f   :  { %v9746_v3 = vadd.f32 %v3991_v19, %v3885_v16  ;;  %v4673_v16 = vld [vmem:[#allocation15 + $0x50] sm:$0xff]  ;;  %v4675_v19 = vld [vmem:[#allocation15 + $0x60] sm:$0xff] }
0x1610   :  { %8139 = vmatpush3.bf16.msra.mxu0 %v9700_v53 }
0x1611   :  { %v6917_v24 = vpop.f32.mrb[48].mxu1  ;;  %8140 = vmatprep.subr.bf16.mxu0 %v8700_v8 }
0x1612   :  { %v9752_v6 = vadd.f32 %v6917_v24, %v3870_v41  ;;  %v4001_v20 = vpop.f32.mrb[49].mxu1  ;;  %v4678_v24 = vld [vmem:[#allocation15 + $0x78] sm:$0xff] }
0x1613   :  { %v9754_v22 = vadd.f32 %v4001_v20, %v3875_v21  ;;  %v4677_v21 = vld [vmem:[#allocation15 + $0x70] sm:$0xff] }
0x1614   :  { %8142 = vmatpush3.bf16.msra.mxu0 %v9706_v57 }
0x1615   :  { %8143 = vmatprep.subr.bf16.mxu0 %v8700_v8 }
0x1618   :  { %8145 = vmatpush3.bf16.msra.mxu0 %v9715_v2 }
0x1619   :  { %8170 = vmatprep.subr.bf16.mxu0 %v8700_v8 }
0x16ca   :  { %v6876_v40 = vpop.f32.mrb[46].mxu0  ;;  %v6920_v30 = vpop.f32.mrb[50].mxu1 }
0x16cb   :  { %v3895_v31 = vadd.f32 %v6876_v40, %v4963_v13  ;;  %v4020_v15 = vadd.f32 %v6920_v30, %v3860_v25  ;;  %v3889_v10 = vpop.f32.mrb[47].mxu0  ;;  %v4011_v32 = vpop.f32.mrb[51].mxu1  ;;  %v4647_v40 = vld [vmem:[#allocation14 + $0x8] sm:$0xff] }
0x16cc   :  { %v3890_v44 = vadd.f32 %v4963_v13, %v3889_v10  ;;  %v4022_v56 = vadd.f32 %v4011_v32, %v3865_v28  ;;  %v4672_v13 = vld [vmem:[#allocation15 + $0x48] sm:$0xff]  ;;  %v4646_v28 = vld [vmem:[#allocation14] sm:$0xff] }
0x16cd   :  { %v9762_v59 = vadd.f32 %v3981_v12, %v3895_v31  ;;  %v4671_v12 = vld [vmem:[#allocation15 + $0x40] sm:$0xff]  ;;  %v8291_v30 = vpack.c.bf16 %v4647_v40, %v4646_v28  ;;  %v4648_v31 = vld [vmem:[#allocation14 + $0x10] sm:$0xff] }
0x16ce   :  { %v4120_v63 = vpop.f32.mrb[48].mxu0  ;;  %v9764_v5 = vadd.f32 %v6911_v37, %v3890_v44  ;;  %v8276_v37 = vpack.c.bf16 %v4670_v9, %v4669_v45  ;;  %v8279_v14 = vpack.c.bf16 %v4672_v13, %v4671_v12  ;;  %v4650_v44 = vld [vmem:[#allocation14 + $0x20] sm:$0xff] }
0x16cf   :  { %v4124_v34 = vadd.f32 %v4120_v63, %v4020_v15  ;;  %v6955_v49 = vpop.f32.mrb[49].mxu0  ;;  %v4649_v15 = vld [vmem:[#allocation14 + $0x18] sm:$0xff] }
0x16d0   :  { %v8294_v32 = vpack.c.bf16 %v4649_v15, %v4648_v31 }
0x16d1   :  { %8439 = vtanh.f32 %v4124_v34  ;;  %v4653_v34 = vld [vmem:[#allocation14 + $0x38] sm:$0xff] }
0x16db   :  { %v9766_v38 = vpop.eup %8439 }
0x16dc   :  { %6989 = vmatmul.mubr.f32.vlgmr.msra.gmra.mrb[52].mxu1 %v9766_v38 }
0x16dd   :  { %8148 = vmatpush3.bf16.msra.mxu1 %v9653_v18  ;;  %7058 = vmatprep.mubr.msk.f32.mxu1 %vm8699_vm0, %v8698_v0 }
0x16de   :  { %8149 = vmatprep.subr.bf16.mxu1 %v8700_v8 }
0x16e1   :  { %8151 = vmatpush3.bf16.msra.mxu1 %v9656_v62 }
0x16e2   :  { %8152 = vmatprep.subr.bf16.mxu1 %v8700_v8 }
0x16e5   :  { %8154 = vmatpush3.bf16.msra.mxu1 %v9660_v35 }
0x16e6   :  { %8155 = vmatprep.subr.bf16.mxu1 %v8700_v8 }
0x16e9   :  { %8157 = vmatpush3.bf16.msra.mxu1 %v9664_v58 }
0x16ea   :  { %8158 = vmatprep.subr.bf16.mxu1 %v8700_v8 }
0x16ed   :  { %8160 = vmatpush3.bf16.msra.mxu1 %v9697_v11 }
0x16ee   :  { %8161 = vmatprep.subr.bf16.mxu1 %v8700_v8 }
0x16f1   :  { %8163 = vmatpush3.bf16.msra.mxu1 %v9700_v53 }
0x16f2   :  { %8164 = vmatprep.subr.bf16.mxu1 %v8700_v8 }
0x16f5   :  { %8166 = vmatpush3.bf16.msra.mxu1 %v9706_v57 }
0x16f6   :  { %8167 = vmatprep.subr.bf16.mxu1 %v8700_v8 }
0x16f9   :  { %8169 = vmatpush3.bf16.msra.mxu1 %v9715_v2 }
0x16fa   :  { %8194 = vmatprep.subr.bf16.mxu1 %v8700_v8 }
0x17af   :  { %v4194_v39 = vpop.f32.mrb[52].mxu1 }
0x17b0   :  { %v4198_v23 = vadd.f32 %v4194_v39, %v4022_v56  ;;  %v6990_v33 = vpop.f32.mrb[53].mxu1  ;;  %v4651_v56 = vld [vmem:[#allocation14 + $0x28] sm:$0xff] }
0x17b1   :  { %v8297_v63 = vpack.c.bf16 %v4651_v56, %v4650_v44  ;;  %v4655_v39 = vld [vmem:[#allocation14 + $0x48] sm:$0xff] }
0x17b2   :  { %8441 = vtanh.f32 %v4198_v23 }
0x17bc   :  { %v8442_v46 = vpop.eup %8441 }
0x17bd   :  { %7024 = vmatmul.mubr.f32.vlgmr.msra.gmra.mrb[50].mxu0 %v8442_v46  ;;  %v4656_v46 = vld [vmem:[#allocation14 + $0x50] sm:$0xff] }
0x17be   :  { %8172 = vmatpush3.bf16.msra.mxu0 %v9653_v18  ;;  %7093 = vmatprep.mubr.msk.f32.mxu0 %vm8699_vm0, %v8698_v0 }
0x17bf   :  { %8173 = vmatprep.subr.bf16.mxu0 %v8700_v8 }
0x17c2   :  { %8175 = vmatpush3.bf16.msra.mxu0 %v9656_v62 }
0x17c3   :  { %8176 = vmatprep.subr.bf16.mxu0 %v8700_v8 }
0x17c6   :  { %8178 = vmatpush3.bf16.msra.mxu0 %v9660_v35 }
0x17c7   :  { %8179 = vmatprep.subr.bf16.mxu0 %v8700_v8 }
0x17ca   :  { %8181 = vmatpush3.bf16.msra.mxu0 %v9664_v58 }
0x17cb   :  { %8182 = vmatprep.subr.bf16.mxu0 %v8700_v8 }
0x17ce   :  { %8184 = vmatpush3.bf16.msra.mxu0 %v9697_v11 }
0x17cf   :  { %8185 = vmatprep.subr.bf16.mxu0 %v8700_v8 }
0x17d2   :  { %8187 = vmatpush3.bf16.msra.mxu0 %v9700_v53 }
0x17d3   :  { %8188 = vmatprep.subr.bf16.mxu0 %v8700_v8 }
0x17d6   :  { %8190 = vmatpush3.bf16.msra.mxu0 %v9706_v57 }
0x17d7   :  { %8191 = vmatprep.subr.bf16.mxu0 %v8700_v8 }
0x17da   :  { %8193 = vmatpush3.bf16.msra.mxu0 %v9715_v2 }
0x17db   :  { %8218 = vmatprep.subr.bf16.mxu0 %v8700_v8 }
0x1890   :  { %v4268_v36 = vpop.f32.mrb[50].mxu0 }
0x1891   :  { %v4272_v42 = vadd.f32 %v4268_v36, %v9752_v6  ;;  %v7025_v47 = vpop.f32.mrb[51].mxu0  ;;  %v8288_v6 = vpack.c.bf16 %v4678_v24, %v4677_v21  ;;  %v4657_v36 = vld [vmem:[#allocation14 + $0x58] sm:$0xff]  ;;  %v4964_v21 = vld [vmem:[%s9924_s9] ss:$0 sm:$0xff] }
0x1892   :  { %v4658_v47 = vld [vmem:[#allocation14 + $0x60] sm:$0xff] }
0x1893   :  { %8443 = vtanh.f32 %v4272_v42  ;;  %v8306_v42 = vpack.c.bf16 %v4657_v36, %v4656_v46 }
0x189d   :  { %v8444_v48 = vpop.eup %8443 }
0x189e   :  { %7059 = vmatmul.mubr.f32.vlgmr.msra.gmra.mrb[54].mxu1 %v8444_v48  ;;  %v4659_v48 = vld [vmem:[#allocation14 + $0x68] sm:$0xff] }
0x189f   :  { %8196 = vmatpush3.bf16.msra.mxu1 %v9653_v18  ;;  %7128 = vmatprep.mubr.msk.f32.mxu1 %vm8699_vm0, %v8698_v0 }
0x18a0   :  { %8197 = vmatprep.subr.bf16.mxu1 %v8700_v8 }
0x18a3   :  { %8199 = vmatpush3.bf16.msra.mxu1 %v9656_v62 }
0x18a4   :  { %8200 = vmatprep.subr.bf16.mxu1 %v8700_v8 }
0x18a7   :  { %8202 = vmatpush3.bf16.msra.mxu1 %v9660_v35 }
0x18a8   :  { %8203 = vmatprep.subr.bf16.mxu1 %v8700_v8 }
0x18ab   :  { %8205 = vmatpush3.bf16.msra.mxu1 %v9664_v58 }
0x18ac   :  { %8206 = vmatprep.subr.bf16.mxu1 %v8700_v8 }
0x18af   :  { %8208 = vmatpush3.bf16.msra.mxu1 %v9697_v11 }
0x18b0   :  { %8209 = vmatprep.subr.bf16.mxu1 %v8700_v8 }
0x18b3   :  { %8211 = vmatpush3.bf16.msra.mxu1 %v9700_v53 }
0x18b4   :  { %8212 = vmatprep.subr.bf16.mxu1 %v8700_v8 }
0x18b7   :  { %8214 = vmatpush3.bf16.msra.mxu1 %v9706_v57 }
0x18b8   :  { %8215 = vmatprep.subr.bf16.mxu1 %v8700_v8 }
0x18bb   :  { %8217 = vmatpush3.bf16.msra.mxu1 %v9715_v2 }
0x18bc   :  { %8242 = vmatprep.subr.bf16.mxu1 %v8700_v8 }
0x1971   :  { %v4342_v1 = vpop.f32.mrb[54].mxu1 }
0x1972   :  { %v4346_v50 = vadd.f32 %v4342_v1, %v9754_v22  ;;  %v7060_v51 = vpop.f32.mrb[55].mxu1  ;;  %v8309_v1 = vpack.c.bf16 %v4659_v48, %v4658_v47 }
0x1973   :  { %v4661_v51 = vld [vmem:[#allocation14 + $0x78] sm:$0xff] }
0x1974   :  { %8445 = vtanh.f32 %v4346_v50  ;;  %v4660_v50 = vld [vmem:[#allocation14 + $0x70] sm:$0xff] }
0x197e   :  { %v8446_v27 = vpop.eup %8445 }
0x197f   :  { %7094 = vmatmul.mubr.f32.vlgmr.msra.gmra.mrb[52].mxu0 %v8446_v27  ;;  %v8312_v27 = vpack.c.bf16 %v4661_v51, %v4660_v50 }
0x1980   :  { %8220 = vmatpush3.bf16.msra.mxu0 %v9653_v18  ;;  %7163 = vmatprep.mubr.msk.f32.mxu0 %vm8699_vm0, %v8698_v0 }
0x1981   :  { %8221 = vmatprep.subr.bf16.mxu0 %v8700_v8 }
0x1984   :  { %8223 = vmatpush3.bf16.msra.mxu0 %v9656_v62 }
0x1985   :  { %8224 = vmatprep.subr.bf16.mxu0 %v8700_v8 }
0x1988   :  { %8226 = vmatpush3.bf16.msra.mxu0 %v9660_v35 }
0x1989   :  { %8227 = vmatprep.subr.bf16.mxu0 %v8700_v8 }
0x198c   :  { %8229 = vmatpush3.bf16.msra.mxu0 %v9664_v58 }
0x198d   :  { %8230 = vmatprep.subr.bf16.mxu0 %v8700_v8 }
0x1990   :  { %8232 = vmatpush3.bf16.msra.mxu0 %v9697_v11 }
0x1991   :  { %8233 = vmatprep.subr.bf16.mxu0 %v8700_v8 }
0x1994   :  { %8235 = vmatpush3.bf16.msra.mxu0 %v9700_v53 }
0x1995   :  { %8236 = vmatprep.subr.bf16.mxu0 %v8700_v8 }
0x1998   :  { %8238 = vmatpush3.bf16.msra.mxu0 %v9706_v57 }
0x1999   :  { %8239 = vmatprep.subr.bf16.mxu0 %v8700_v8 }
0x199c   :  { %8241 = vmatpush3.bf16.msra.mxu0 %v9715_v2 }
0x199d   :  { %8266 = vmatprep.subr.bf16.mxu0 %v8700_v8 }
0x1a52   :  { %v4416_v29 = vpop.f32.mrb[52].mxu0 }
0x1a53   :  { %v4420_v26 = vadd.f32 %v4416_v29, %v9744_v54  ;;  %v7095_v52 = vpop.f32.mrb[53].mxu0  ;;  %v8282_v54 = vpack.c.bf16 %v4674_v17, %v4673_v16  ;;  %v4828_v29 = vld [vmem:[#allocation17] sm:$0xff]  ;;  %v4841_v16 = vld [vmem:[#allocation17 + $0x68] sm:$0xff] }
0x1a54   :  { %v4830_v52 = vld [vmem:[#allocation17 + $0x10] sm:$0xff] }
0x1a55   :  { %8447 = vtanh.f32 %v4420_v26  ;;  %v4829_v26 = vld [vmem:[#allocation17 + $0x8] sm:$0xff] }
0x1a5f   :  { %v8448_v43 = vpop.eup %8447 }
0x1a60   :  { %7129 = vmatmul.mubr.f32.vlgmr.msra.gmra.mrb[56].mxu1 %v8448_v43  ;;  %v8315_v43 = vpack.c.bf16 %v4829_v26, %v4828_v29 }
0x1a61   :  { %8244 = vmatpush3.bf16.msra.mxu1 %v9653_v18  ;;  %7198 = vmatprep.mubr.msk.f32.mxu1 %vm8699_vm0, %v8698_v0 }
0x1a62   :  { %8245 = vmatprep.subr.bf16.mxu1 %v8700_v8 }
0x1a65   :  { %8247 = vmatpush3.bf16.msra.mxu1 %v9656_v62 }
0x1a66   :  { %8248 = vmatprep.subr.bf16.mxu1 %v8700_v8 }
0x1a69   :  { %8250 = vmatpush3.bf16.msra.mxu1 %v9660_v35 }
0x1a6a   :  { %8251 = vmatprep.subr.bf16.mxu1 %v8700_v8 }
0x1a6d   :  { %8253 = vmatpush3.bf16.msra.mxu1 %v9664_v58  ;;  %v4663_v58 = vld [vmem:[#allocation15] sm:$0xff] }
0x1a6e   :  { %8254 = vmatprep.subr.bf16.mxu1 %v8700_v8 }
0x1a71   :  { %8256 = vmatpush3.bf16.msra.mxu1 %v9697_v11  ;;  %v4664_v11 = vld [vmem:[#allocation15 + $0x8] sm:$0xff] }
0x1a72   :  { %8257 = vmatprep.subr.bf16.mxu1 %v8700_v8  ;;  %v8267_v55 = vpack.c.bf16 %v4664_v11, %v4663_v58  ;;  %v4833_v58 = vld [vmem:[#allocation17 + $0x28] sm:$0xff] }
0x1a75   :  { %8259 = vmatpush3.bf16.msra.mxu1 %v9700_v53  ;;  %v4666_v53 = vld [vmem:[#allocation15 + $0x18] sm:$0xff] }
0x1a76   :  { %8260 = vmatprep.subr.bf16.mxu1 %v8700_v8 }
0x1a79   :  { %8262 = vmatpush3.bf16.msra.mxu1 %v9706_v57  ;;  %v8270_v57 = vpack.c.bf16 %v4666_v53, %v4665_v60  ;;  %v4835_v60 = vld [vmem:[#allocation17 + $0x38] sm:$0xff] }
0x1a7a   :  { %8263 = vmatprep.subr.bf16.mxu1 %v8700_v8 }
0x1a7d   :  { %8265 = vmatpush3.bf16.msra.mxu1 %v9715_v2  ;;  %v4667_v2 = vld [vmem:[#allocation15 + $0x20] sm:$0xff] }
0x1a7e   :  { %8290 = vmatprep.subr.bf16.mxu1 %v8700_v8  ;;  %v8273_v7 = vpack.c.bf16 %v4668_v4, %v4667_v2  ;;  %v4838_v4 = vld [vmem:[#allocation17 + $0x50] sm:$0xff] }
0x1b33   :  { %v4490_v18 = vpop.f32.mrb[56].mxu1 }
0x1b34   :  { %v4494_v62 = vadd.f32 %v4490_v18, %v9746_v3  ;;  %v7130_v35 = vpop.f32.mrb[57].mxu1  ;;  %v4676_v3 = vld [vmem:[#allocation15 + $0x68] sm:$0xff]  ;;  %v4831_v18 = vld [vmem:[#allocation17 + $0x18] sm:$0xff] }
0x1b35   :  { %v8285_v41 = vpack.c.bf16 %v4676_v3, %v4675_v19  ;;  %v4832_v35 = vld [vmem:[#allocation17 + $0x20] sm:$0xff]  ;;  %v4843_v19 = vld [vmem:[#allocation17 + $0x78] sm:$0xff] }
0x1b36   :  { %8449 = vtanh.f32 %v4494_v62  ;;  %v8318_v62 = vpack.c.bf16 %v4831_v18, %v4830_v52  ;;  %v8321_v11 = vpack.c.bf16 %v4833_v58, %v4832_v35 }
0x1b40   :  { %v8450_v61 = vpop.eup %8449 }
0x1b41   :  { %7164 = vmatmul.mubr.f32.vlgmr.msra.gmra.mrb[54].mxu0 %v8450_v61  ;;  %v4836_v61 = vld [vmem:[#allocation17 + $0x40] sm:$0xff] }
0x1b42   :  { %8268 = vmatpush3.bf16.msra.mxu0 %v8267_v55  ;;  %7233 = vmatprep.mubr.msk.f32.mxu0 %vm8699_vm0, %v8698_v0  ;;  %v4834_v55 = vld [vmem:[#allocation17 + $0x30] sm:$0xff] }
0x1b43   :  { %8269 = vmatprep.subr.bf16.mxu0 %v8700_v8  ;;  %v8324_v53 = vpack.c.bf16 %v4835_v60, %v4834_v55 }
0x1b46   :  { %8271 = vmatpush3.bf16.msra.mxu0 %v8270_v57  ;;  %v4837_v57 = vld [vmem:[#allocation17 + $0x48] sm:$0xff] }
0x1b47   :  { %8272 = vmatprep.subr.bf16.mxu0 %v8700_v8  ;;  %v8327_v2 = vpack.c.bf16 %v4837_v57, %v4836_v61 }
0x1b4a   :  { %8274 = vmatpush3.bf16.msra.mxu0 %v8273_v7  ;;  %v4839_v7 = vld [vmem:[#allocation17 + $0x58] sm:$0xff] }
0x1b4b   :  { %8275 = vmatprep.subr.bf16.mxu0 %v8700_v8  ;;  %v8330_v45 = vpack.c.bf16 %v4839_v7, %v4838_v4 }
0x1b4e   :  { %8277 = vmatpush3.bf16.msra.mxu0 %v8276_v37 }
0x1b4f   :  { %8278 = vmatprep.subr.bf16.mxu0 %v8700_v8 }
0x1b52   :  { %8280 = vmatpush3.bf16.msra.mxu0 %v8279_v14  ;;  %v4840_v14 = vld [vmem:[#allocation17 + $0x60] sm:$0xff] }
0x1b53   :  { %8281 = vmatprep.subr.bf16.mxu0 %v8700_v8  ;;  %v8333_v17 = vpack.c.bf16 %v4841_v16, %v4840_v14 }
0x1b56   :  { %8283 = vmatpush3.bf16.msra.mxu0 %v8282_v54  ;;  %v4842_v54 = vld [vmem:[#allocation17 + $0x70] sm:$0xff] }
0x1b57   :  { %8284 = vmatprep.subr.bf16.mxu0 %v8700_v8  ;;  %v8336_v3 = vpack.c.bf16 %v4843_v19, %v4842_v54 }
0x1b5a   :  { %8286 = vmatpush3.bf16.msra.mxu0 %v8285_v41 }
0x1b5b   :  { %8287 = vmatprep.subr.bf16.mxu0 %v8700_v8 }
0x1b5e   :  { %8289 = vmatpush3.bf16.msra.mxu0 %v8288_v6 }
0x1b5f   :  { %8314 = vmatprep.subr.bf16.mxu0 %v8700_v8 }
0x1b61   :  { %7234 = vmatmul.mubr.f32.vlgmr.msra.gmra.mrb[56].mxu0 %v9766_v38  ;;  %v4654_v38 = vld [vmem:[#allocation14 + $0x40] sm:$0xff] }
0x1b62   :  { %7303 = vmatprep.mubr.msk.f32.mxu0 %vm8699_vm0, %v8698_v0  ;;  %v8303_v23 = vpack.c.bf16 %v4655_v39, %v4654_v38  ;;  %8316 = vmatpush3.bf16.msra.mxu0 %v8315_v43 }
0x1b63   :  { %8317 = vmatprep.subr.bf16.mxu0 %v8700_v8 }
0x1b66   :  { %8319 = vmatpush3.bf16.msra.mxu0 %v8318_v62 }
0x1b67   :  { %8320 = vmatprep.subr.bf16.mxu0 %v8700_v8 }
0x1b6a   :  { %8322 = vmatpush3.bf16.msra.mxu0 %v8321_v11 }
0x1b6b   :  { %8323 = vmatprep.subr.bf16.mxu0 %v8700_v8 }
0x1b6e   :  { %8325 = vmatpush3.bf16.msra.mxu0 %v8324_v53 }
0x1b6f   :  { %8326 = vmatprep.subr.bf16.mxu0 %v8700_v8 }
0x1b72   :  { %8328 = vmatpush3.bf16.msra.mxu0 %v8327_v2 }
0x1b73   :  { %8329 = vmatprep.subr.bf16.mxu0 %v8700_v8 }
0x1b76   :  { %8331 = vmatpush3.bf16.msra.mxu0 %v8330_v45 }
0x1b77   :  { %8332 = vmatprep.subr.bf16.mxu0 %v8700_v8 }
0x1b7a   :  { %8334 = vmatpush3.bf16.msra.mxu0 %v8333_v17 }
0x1b7b   :  { %8335 = vmatprep.subr.bf16.mxu0 %v8700_v8 }
0x1b7e   :  { %8337 = vmatpush3.bf16.msra.mxu0 %v8336_v3 }
0x1c14   :  { %v4564_v20 = vpop.f32.mrb[54].mxu0 }
0x1c15   :  { %v4568_v22 = vadd.f32 %v4564_v20, %v9764_v5  ;;  %v7165_v25 = vpop.f32.mrb[55].mxu0  ;;  %v4652_v5 = vld [vmem:[#allocation14 + $0x30] sm:$0xff] }
0x1c16   :  { %v8300_v49 = vpack.c.bf16 %v4653_v34, %v4652_v5 }
0x1c17   :  { %8451 = vtanh.f32 %v4568_v22  ;;  %v4965_v22 = vld [vmem:[%s9926_s11] ss:$0 sm:$0xff] }
0x1c21   :  { %v8452_v10 = vpop.eup %8451 }
0x1c22   :  { %7199 = vmatmul.mubr.f32.vlgmr.msra.gmra.mrb[58].mxu1 %v8452_v10 }
0x1c23   :  { %8292 = vmatpush3.bf16.msra.mxu1 %v8291_v30  ;;  %7268 = vmatprep.mubr.msk.f32.mxu1 %vm8699_vm0, %v8698_v0 }
0x1c24   :  { %8293 = vmatprep.subr.bf16.mxu1 %v8700_v8 }
0x1c27   :  { %8295 = vmatpush3.bf16.msra.mxu1 %v8294_v32 }
0x1c28   :  { %8296 = vmatprep.subr.bf16.mxu1 %v8700_v8 }
0x1c2b   :  { %8298 = vmatpush3.bf16.msra.mxu1 %v8297_v63 }
0x1c2c   :  { %8299 = vmatprep.subr.bf16.mxu1 %v8700_v8 }
0x1c2f   :  { %8301 = vmatpush3.bf16.msra.mxu1 %v8300_v49 }
0x1c30   :  { %8302 = vmatprep.subr.bf16.mxu1 %v8700_v8 }
0x1c33   :  { %8304 = vmatpush3.bf16.msra.mxu1 %v8303_v23 }
0x1c34   :  { %v9883_v0 = vpop.f32.mrb[56].mxu0  ;;  %8305 = vmatprep.subr.bf16.mxu1 %v8700_v8 }
0x1c35   :  { %v7235_v33 = vpop.f32.mrb[57].mxu0 }
0x1c37   :  { %8307 = vmatpush3.bf16.msra.mxu1 %v8306_v42 }
0x1c38   :  { %8308 = vmatprep.subr.bf16.mxu1 %v8700_v8 }
0x1c3b   :  { %8310 = vmatpush3.bf16.msra.mxu1 %v8309_v1 }
0x1c3c   :  { %8311 = vmatprep.subr.bf16.mxu1 %v8700_v8 }
0x1c3f   :  { %8313 = vmatpush3.bf16.msra.mxu1 %v8312_v27 }
0x1cf5   :  { %v4638_v9 = vpop.f32.mrb[58].mxu1 }
0x1cf6   :  { %v4642_v37 = vadd.f32 %v4638_v9, %v9762_v59  ;;  %v7200_v12 = vpop.f32.mrb[59].mxu1 }
0x1cf8   :  { %8453 = vtanh.f32 %v4642_v37 }
0x1d02   :  { %v8454_v13 = vpop.eup %8453 }
0x1d03   :  { %7269 = vmatmul.mubr.f32.vlgmr.msra.gmra.mrb[60].mxu1 %v8454_v13 }
0x1dd6   :  { %v4815_v41 = vpop.f32.mrb[60].mxu1 }
0x1dd7   :  { %v4816_v59 = vadd.f32 %v4815_v41, %v9883_v0  ;;  %v7270_v24 = vpop.f32.mrb[61].mxu1 }
0x1dd9   :  { %v4826_v6 = vadd.f32 %v4964_v21, %v4816_v59 }
0x1ddb   :  { %v4827_v20 = vmax.f32 %v4826_v6, 0.0 }
0x1ddd   :  { %7304 = vmatmul.mubr.f32.vlgmr.msra.gmra.mrb[58].mxu0 %v4827_v20 }
0x1eb0   :  { %v4917_v8 = vpop.f32.mrb[58].mxu0 }
0x1eb1   :  { %v4918_v25 = vadd.f32 %v4965_v22, %v4917_v8  ;;  %v7305_v28 = vpop.f32.mrb[59].mxu0 }
0x1eb3   :  { %4921 = vst [vmem:[#allocation18] sm:$0xff] %v4918_v25 }
0x1eb4   :  { %8664 = shalt.err (!%p8661_p6)
}
0x1eb5   :  { %s8665_s13 = scalar_lea.hbm %s9927_s12, 128 }
0x1eb6   :  { %p8666_p7 = scmp.ne.s32.totalorder %s9927_s12, %s8665_s13  ;;  %p8669_p8 = scmp.lt.u32.totalorder %s8665_s13, %s9927_s12 }
0x1eb8   :  { %p8671_p9 = pnand %p8669_p8, %p8666_p7 }
0x1eba   :  { %8674 = shalt.err (!%p8671_p9)
}
0x1ebb   :  { %4931 = dma.vmem_to_hbm [thread:$0]  %s4929_s26, 128, %s9927_s12, [#allocation5]  }
0x1ebc   :  { %8685 = dma.done.wait [#allocation5], 128  }
0x1ebd   :  { %8686 = vsyncadd [#allocation5], 4294967168 }
0x1ebe   :  { %4935 = vsyncpa [#allocation4], 1 }
0x1ebf   :  { %4936 = vsyncpa [#allocation7], 1 }
0x1ec0   :  { %4937 = vsyncpa [#allocation10], 1 }
0x1ec1   :  { %4938 = vsyncpa [#allocation13], 1 }
0x1ec2   :  { %4939 = vsyncpa [#allocation16], 1 }
0x1ec3   :  { %4940 = vsyncpa [#allocation5], 1 }

</bundles_post_ra>
